<compile_context>
chip_gen: v6e
topology: v6e:2x2x1
jax: 0.10.0
libtpu: 0.0.40
codegen_flags: <defaults>
</compile_context>

<pallas_src>
import functools

import jax
import jax.numpy as jnp
from jax import lax
from jax.experimental import pallas as pl
from jax.experimental.pallas import tpu as pltpu


# -----------------------------------------------------------------------------
# Fused kernel: one batch element per grid step.
#   x_ref : (1, C*H, W)    VMEM  - NCHW input with (C,H) merged (free reshape)
#   w1_ref: (C*C*9,)       SMEM  - Conv2d(C,C,3) weight, OIHW row-major flat
#   b1_ref: (C,)           SMEM
#   w2_ref: (4*C*C,)       SMEM  - Conv2d(4C,C,1) weight (4C,C) row-major flat
#   b2_ref: (C,)           SMEM
#   s_ref : (W, W/2)       VMEM  - column pair-sum/compaction matrix (resident)
#   o_ref : (1, C*H/2, W/2) VMEM
#   y_ref : (C*H, W)       VMEM scratch - stage-1 output Y
# -----------------------------------------------------------------------------
def _downsample_kernel(x_ref, w1_ref, b1_ref, w2_ref, b2_ref, s_ref, o_ref,
                       y_ref):
    C = b1_ref.shape[0]
    CH = x_ref.shape[1]
    W = x_ref.shape[2]
    H = CH // C
    Hh = H // 2

    X = x_ref[0].astype(jnp.float32)                 # (C*H, W), W on lanes

    # ---------------- stage 1: 3x3 conv (pad=1) + bias + ReLU ----------------
    row_in_img = lax.broadcasted_iota(jnp.int32, (CH, W), 0) % H
    not_top = row_in_img != 0                        # row h-1 exists
    not_bot = row_in_img != (H - 1)                  # row h+1 exists

    zcol = jnp.zeros((CH, 1), jnp.float32)
    # Column-shifted copies (built ONCE; the only unaligned lane ops left).
    x_cols = {
        -1: jnp.concatenate([zcol, X[:, :W - 1]], axis=1),  # [:, w] = X[:, w-1]
        0: X,
        1: jnp.concatenate([X[:, 1:], zcol], axis=1),        # [:, w] = X[:, w+1]
    }
    # Row shifts via XLU sublane rolls on the channel-stacked slab; the border
    # mask also zeroes the channel-seam rows the roll wraps across.
    taps = {}
    for dw in (-1, 0, 1):
        base = x_cols[dw]
        taps[(0, dw)] = base
        up = pltpu.roll(base, 1, axis=0)                     # [r] = base[r-1]
        taps[(-1, dw)] = jnp.where(not_top, up, 0.0)
        dn = pltpu.roll(base, CH - 1, axis=0)                # [r] = base[r+1]
        taps[(1, dw)] = jnp.where(not_bot, dn, 0.0)

    # One live accumulator (co outermost); result parked in the VMEM scratch.
    for co in range(C):
        acc = jnp.zeros((H, W), jnp.float32) + b1_ref[co]
        for dh in (-1, 0, 1):
            for dw in (-1, 0, 1):
                slab = taps[(dh, dw)]
                for ci in range(C):
                    w = w1_ref[((co * C + ci) * 3 + (dh + 1)) * 3 + (dw + 1)]
                    acc = acc + w * slab[ci * H:(ci + 1) * H, :]
        y_ref[co * H:(co + 1) * H, :] = jnp.maximum(acc, 0.0)

    # ------ stage 2: invPixelShuffle(2) + 1x1 conv == stride-2 2x2 conv ------
    #   out[co,i,j] = ReLU(b2[co] + sum_{c,ry,rx} w2[c*4+ry*2+rx, co]
    #                                           * Y[c, 2i+ry, 2j+rx])
    # Row phase ry: sublane-strided reads of Y.  Column phase rx: weights are
    # selected per lane parity; the (2j, 2j+1) pair-sum + lane compaction are
    # folded into one selection matmul with S[w, j] = (w // 2 == j).
    lane_even = (lax.broadcasted_iota(jnp.int32, (Hh, W), 1) % 2) == 0
    phase_rows = [y_ref[pl.ds(c * H + ry, Hh, stride=2), :]   # (Hh, W)
                  for c in range(C) for ry in range(2)]

    g_list = []
    for co in range(C):
        f = jnp.where(lane_even, b2_ref[co], 0.0)             # bias counted once
        for c in range(C):
            for ry in range(2):
                w_e = w2_ref[(c * 4 + ry * 2 + 0) * C + co]    # rx = 0 (even col)
                w_o = w2_ref[(c * 4 + ry * 2 + 1) * C + co]    # rx = 1 (odd col)
                f = f + jnp.where(lane_even, w_e, w_o) * phase_rows[c * 2 + ry]
        g_list.append(f)
    g = jnp.concatenate(g_list, axis=0)                        # (C*Hh, W)

    # Exact-enough selection matmul: hi/lo bf16 split -> 2 default-precision
    # MXU passes (S is exactly bf16-representable, so no mantissa loss vs
    # a precision=HIGHEST dot, and one pass cheaper).
    s = s_ref[...]
    g_hi = g.astype(jnp.bfloat16).astype(jnp.float32)
    g_lo = g - g_hi
    out = (jnp.dot(g_hi, s, preferred_element_type=jnp.float32) +
           jnp.dot(g_lo, s, preferred_element_type=jnp.float32))
    o_ref[0] = jnp.maximum(out, 0.0).astype(o_ref.dtype)       # single store


@functools.partial(jax.jit, static_argnames=("scale",))
def downsample_forward(x_nchw, w1, b1, w2, b2, scale=2):
    """DownSample forward. x_nchw: (B, C, H, W) f32 -> (B, C, H/2, W/2) f32."""
    assert scale == 2
    B, C, H, W = x_nchw.shape
    Hh, Wh = H // 2, W // 2

    x_r = x_nchw.reshape(B, C * H, W)        # free row-major merge, no HBM pass

    # Column pair-sum + compaction matrix, precomputed once (shape-only):
    #   S[w, j] = 1.0  iff  w in {2j, 2j+1}
    sel = (jnp.arange(W, dtype=jnp.int32)[:, None] // 2
           == jnp.arange(Wh, dtype=jnp.int32)[None, :]).astype(jnp.float32)

    out = pl.pallas_call(
        _downsample_kernel,
        out_shape=jax.ShapeDtypeStruct((B, C * Hh, Wh), x_nchw.dtype),
        grid=(B,),
        in_specs=[
            pl.BlockSpec((1, C * H, W), lambda b: (b, 0, 0)),
            pl.BlockSpec(memory_space=pltpu.MemorySpace.SMEM),   # w1 (flat)
            pl.BlockSpec(memory_space=pltpu.MemorySpace.SMEM),   # b1
            pl.BlockSpec(memory_space=pltpu.MemorySpace.SMEM),   # w2 (flat)
            pl.BlockSpec(memory_space=pltpu.MemorySpace.SMEM),   # b2
            pl.BlockSpec((W, Wh), lambda b: (0, 0)),             # S (resident)
        ],
        out_specs=pl.BlockSpec((1, C * Hh, Wh), lambda b: (b, 0, 0)),
        scratch_shapes=[pltpu.VMEM((C * H, W), jnp.float32)],    # Y
        compiler_params=pltpu.CompilerParams(
            dimension_semantics=("parallel",),
            # Re-budget together with the H-band size when banding is added.
            vmem_limit_bytes=32 * 1024 * 1024),
    )(x_r, w1.reshape(-1), b1, w2.reshape(-1), b2, sel)

    return out.reshape(B, C, Hh, Wh)


# -----------------------------------------------------------------------------
# Pure-JAX reference (mirrors the PyTorch NCHW semantics) for validation.
# -----------------------------------------------------------------------------
def downsample_reference(x_nchw, w1, b1, w2, b2, scale=2):
    C = w1.shape[0]
    y = lax.conv_general_dilated(
        x_nchw, w1, window_strides=(1, 1), padding=((1, 1), (1, 1)),
        dimension_numbers=("NCHW", "OIHW", "NCHW"))
    y = jnp.maximum(y + b1.reshape(1, C, 1, 1), 0.0)
    B, Cc, H, W = y.shape
    r = scale
    y = y.reshape(B, Cc, H // r, r, W // r, r)
    y = jnp.transpose(y, (0, 1, 3, 5, 2, 4)).reshape(B, Cc * r * r, H // r, W // r)
    w2_oihw = jnp.transpose(w2, (1, 0)).reshape(C, Cc * r * r, 1, 1)
    z = lax.conv_general_dilated(
        y, w2_oihw, window_strides=(1, 1), padding=((0, 0), (0, 0)),
        dimension_numbers=("NCHW", "OIHW", "NCHW"))
    return jnp.maximum(z + b2.reshape(1, C, 1, 1), 0.0)


if __name__ == "__main__":
    B, C, H, W = 2, 4, 16, 16
    scale = 2

    key = jax.random.PRNGKey(0)
    kx, k1, k2, k3, k4 = jax.random.split(key, 5)

    x = jax.random.normal(kx, (B, C, H, W), dtype=jnp.float32)
    # Parameters (shapes from the module's __init__):
    #   Conv2d(C, C, 3): weight (C, C, 3, 3) OIHW, bias (C,)
    #   Conv2d(4C, C, 1): weight (4C, C), bias (C,)
    w1 = jax.random.normal(k1, (C, C, 3, 3), dtype=jnp.float32) * 0.1
    b1 = jax.random.normal(k2, (C,), dtype=jnp.float32) * 0.1
    w2 = jax.random.normal(k3, (C * scale * scale, C), dtype=jnp.float32) * 0.1
    b2 = jax.random.normal(k4, (C,), dtype=jnp.float32) * 0.1

    out = downsample_forward(x, w1, b1, w2, b2, scale=scale)
    out = jax.block_until_ready(out)

    ref = downsample_reference(x, w1, b1, w2, b2, scale=scale)
    ref = jax.block_until_ready(ref)

    assert out.shape == (B, C, H // scale, W // scale), out.shape
    assert jnp.allclose(out, ref, atol=1e-4, rtol=1e-4), (
        float(jnp.max(jnp.abs(out - ref))))

    print("KERNEL_OK")
</pallas_src>

<mosaic_0001>
module attributes {stable_mosaic.version = 11 : i64} {
  func.func @_downsample_kernel(%arg0: i32, %arg1: memref<1x64x16xf32, #tpu.memory_space<vmem>>, %arg2: memref<144xf32, #tpu.memory_space<smem>>, %arg3: memref<4xf32, #tpu.memory_space<smem>>, %arg4: memref<64xf32, #tpu.memory_space<smem>>, %arg5: memref<4xf32, #tpu.memory_space<smem>>, %arg6: memref<16x8xf32, #tpu.memory_space<vmem>>, %arg7: memref<1x32x8xf32, #tpu.memory_space<vmem>>, %arg8: memref<64x16xf32, #tpu.memory_space<vmem>>) attributes {dimension_semantics = [#tpu.dimension_semantics<parallel>], iteration_bounds = array<i64: 2>, scalar_prefetch = 0 : i64, scratch_operands = 1 : i64, tpu.core_type = #tpu.core_type<tc>, window_params = [{transform_indices = @transform_0, window_bounds = array<i64: 1, 64, 16>}, {transform_indices = @transform_1, window_bounds = array<i64: 144>}, {transform_indices = @transform_2, window_bounds = array<i64: 4>}, {transform_indices = @transform_3, window_bounds = array<i64: 64>}, {transform_indices = @transform_4, window_bounds = array<i64: 4>}, {pipeline_mode = #tpu.pipeline_mode<synchronous>, transform_indices = @transform_5, window_bounds = array<i64: 16, 8>}, {transform_indices = @transform_6, window_bounds = array<i64: 1, 32, 8>}]} {
    %c0 = arith.constant 0 : index
    %c0_0 = arith.constant 0 : index
    %c0_1 = arith.constant 0 : index
    %0 = vector.load %arg1[%c0, %c0_0, %c0_1] : memref<1x64x16xf32, #tpu.memory_space<vmem>>, vector<1x64x16xf32>
    %1 = vector.shape_cast %0 : vector<1x64x16xf32> to vector<64x16xf32>
    %2 = tpu.iota {dimensions = array<i32: 0>} : vector<64x16xi32>
    %c16_i32 = arith.constant 16 : i32
    %c0_i32 = arith.constant 0 : i32
    %3 = arith.cmpi eq, %c16_i32, %c0_i32 : i32
    %c1_i32 = arith.constant 1 : i32
    %4 = arith.select %3, %c1_i32, %c16_i32 : i32
    %5 = vector.broadcast %4 : i32 to vector<64x16xi32>
    %6 = arith.remsi %2, %5 : vector<64x16xi32>
    %c0_i32_2 = arith.constant 0 : i32
    %7 = vector.broadcast %c0_i32_2 : i32 to vector<64x16xi32>
    %8 = arith.cmpi ne, %6, %7 : vector<64x16xi32>
    %c0_i32_3 = arith.constant 0 : i32
    %9 = vector.broadcast %c0_i32_3 : i32 to vector<64x16xi32>
    %10 = arith.cmpi slt, %6, %9 : vector<64x16xi32>
    %c0_i32_4 = arith.constant 0 : i32
    %11 = arith.cmpi slt, %4, %c0_i32_4 : i32
    %12 = vector.broadcast %11 : i1 to vector<64x16xi1>
    %13 = vector.broadcast %12 : vector<64x16xi1> to vector<64x16xi1>
    %14 = arith.xori %10, %13 : vector<64x16xi1>
    %15 = arith.andi %14, %8 : vector<64x16xi1>
    %16 = vector.broadcast %4 : i32 to vector<64x16xi32>
    %17 = arith.addi %6, %16 : vector<64x16xi32>
    %18 = arith.select %15, %17, %6 : vector<64x16xi1>, vector<64x16xi32>
    %c0_i32_5 = arith.constant 0 : i32
    %19 = vector.broadcast %c0_i32_5 : i32 to vector<64x16xi32>
    %20 = arith.cmpi ne, %18, %19 : vector<64x16xi32>
    %c15_i32 = arith.constant 15 : i32
    %21 = vector.broadcast %c15_i32 : i32 to vector<64x16xi32>
    %22 = arith.cmpi ne, %18, %21 : vector<64x16xi32>
    %cst = arith.constant 0.000000e+00 : f32
    %23 = vector.broadcast %cst : f32 to vector<64x1xf32>
    %24 = vector.extract_strided_slice %1 {offsets = [0, 0], sizes = [64, 15], strides = [1, 1]} : vector<64x16xf32> to vector<64x15xf32>
    %25 = tpu.concatenate %23, %24 in 1 : vector<64x1xf32>, vector<64x15xf32> -> vector<64x16xf32>
    %26 = vector.extract_strided_slice %1 {offsets = [0, 1], sizes = [64, 15], strides = [1, 1]} : vector<64x16xf32> to vector<64x15xf32>
    %27 = tpu.concatenate %26, %23 in 1 : vector<64x15xf32>, vector<64x1xf32> -> vector<64x16xf32>
    %c1_i32_6 = arith.constant 1 : i32
    %28 = tpu.dynamic_rotate %25 by %c1_i32_6 dim 0 : vector<64x16xf32>, i32 -> vector<64x16xf32>
    %cst_7 = arith.constant 0.000000e+00 : f32
    %29 = vector.broadcast %cst_7 : f32 to vector<64x16xf32>
    %30 = arith.select %20, %28, %29 : vector<64x16xi1>, vector<64x16xf32>
    %c63_i32 = arith.constant 63 : i32
    %31 = tpu.dynamic_rotate %25 by %c63_i32 dim 0 : vector<64x16xf32>, i32 -> vector<64x16xf32>
    %cst_8 = arith.constant 0.000000e+00 : f32
    %32 = vector.broadcast %cst_8 : f32 to vector<64x16xf32>
    %33 = arith.select %22, %31, %32 : vector<64x16xi1>, vector<64x16xf32>
    %c1_i32_9 = arith.constant 1 : i32
    %34 = tpu.dynamic_rotate %1 by %c1_i32_9 dim 0 : vector<64x16xf32>, i32 -> vector<64x16xf32>
    %cst_10 = arith.constant 0.000000e+00 : f32
    %35 = vector.broadcast %cst_10 : f32 to vector<64x16xf32>
    %36 = arith.select %20, %34, %35 : vector<64x16xi1>, vector<64x16xf32>
    %c63_i32_11 = arith.constant 63 : i32
    %37 = tpu.dynamic_rotate %1 by %c63_i32_11 dim 0 : vector<64x16xf32>, i32 -> vector<64x16xf32>
    %cst_12 = arith.constant 0.000000e+00 : f32
    %38 = vector.broadcast %cst_12 : f32 to vector<64x16xf32>
    %39 = arith.select %22, %37, %38 : vector<64x16xi1>, vector<64x16xf32>
    %c1_i32_13 = arith.constant 1 : i32
    %40 = tpu.dynamic_rotate %27 by %c1_i32_13 dim 0 : vector<64x16xf32>, i32 -> vector<64x16xf32>
    %cst_14 = arith.constant 0.000000e+00 : f32
    %41 = vector.broadcast %cst_14 : f32 to vector<64x16xf32>
    %42 = arith.select %20, %40, %41 : vector<64x16xi1>, vector<64x16xf32>
    %c63_i32_15 = arith.constant 63 : i32
    %43 = tpu.dynamic_rotate %27 by %c63_i32_15 dim 0 : vector<64x16xf32>, i32 -> vector<64x16xf32>
    %cst_16 = arith.constant 0.000000e+00 : f32
    %44 = vector.broadcast %cst_16 : f32 to vector<64x16xf32>
    %45 = arith.select %22, %43, %44 : vector<64x16xi1>, vector<64x16xf32>
    %cst_17 = arith.constant 0.000000e+00 : f32
    %46 = vector.broadcast %cst_17 : f32 to vector<16x16xf32>
    %c0_18 = arith.constant 0 : index
    %47 = memref.load %arg3[%c0_18] : memref<4xf32, #tpu.memory_space<smem>>
    %48 = vector.broadcast %47 : f32 to vector<16x16xf32>
    %49 = arith.addf %46, %48 : vector<16x16xf32>
    %c0_19 = arith.constant 0 : index
    %50 = memref.load %arg2[%c0_19] : memref<144xf32, #tpu.memory_space<smem>>
    %51 = vector.extract_strided_slice %30 {offsets = [0, 0], sizes = [16, 16], strides = [1, 1]} : vector<64x16xf32> to vector<16x16xf32>
    %52 = vector.broadcast %50 : f32 to vector<16x16xf32>
    %53 = arith.mulf %52, %51 : vector<16x16xf32>
    %54 = arith.addf %49, %53 : vector<16x16xf32>
    %c9 = arith.constant 9 : index
    %55 = memref.load %arg2[%c9] : memref<144xf32, #tpu.memory_space<smem>>
    %56 = vector.extract_strided_slice %30 {offsets = [16, 0], sizes = [16, 16], strides = [1, 1]} : vector<64x16xf32> to vector<16x16xf32>
    %57 = vector.broadcast %55 : f32 to vector<16x16xf32>
    %58 = arith.mulf %57, %56 : vector<16x16xf32>
    %59 = arith.addf %54, %58 : vector<16x16xf32>
    %c18 = arith.constant 18 : index
    %60 = memref.load %arg2[%c18] : memref<144xf32, #tpu.memory_space<smem>>
    %61 = vector.extract_strided_slice %30 {offsets = [32, 0], sizes = [16, 16], strides = [1, 1]} : vector<64x16xf32> to vector<16x16xf32>
    %62 = vector.broadcast %60 : f32 to vector<16x16xf32>
    %63 = arith.mulf %62, %61 : vector<16x16xf32>
    %64 = arith.addf %59, %63 : vector<16x16xf32>
    %c27 = arith.constant 27 : index
    %65 = memref.load %arg2[%c27] : memref<144xf32, #tpu.memory_space<smem>>
    %66 = vector.extract_strided_slice %30 {offsets = [48, 0], sizes = [16, 16], strides = [1, 1]} : vector<64x16xf32> to vector<16x16xf32>
    %67 = vector.broadcast %65 : f32 to vector<16x16xf32>
    %68 = arith.mulf %67, %66 : vector<16x16xf32>
    %69 = arith.addf %64, %68 : vector<16x16xf32>
    %c1 = arith.constant 1 : index
    %70 = memref.load %arg2[%c1] : memref<144xf32, #tpu.memory_space<smem>>
    %71 = vector.extract_strided_slice %36 {offsets = [0, 0], sizes = [16, 16], strides = [1, 1]} : vector<64x16xf32> to vector<16x16xf32>
    %72 = vector.broadcast %70 : f32 to vector<16x16xf32>
    %73 = arith.mulf %72, %71 : vector<16x16xf32>
    %74 = arith.addf %69, %73 : vector<16x16xf32>
    %c10 = arith.constant 10 : index
    %75 = memref.load %arg2[%c10] : memref<144xf32, #tpu.memory_space<smem>>
    %76 = vector.extract_strided_slice %36 {offsets = [16, 0], sizes = [16, 16], strides = [1, 1]} : vector<64x16xf32> to vector<16x16xf32>
    %77 = vector.broadcast %75 : f32 to vector<16x16xf32>
    %78 = arith.mulf %77, %76 : vector<16x16xf32>
    %79 = arith.addf %74, %78 : vector<16x16xf32>
    %c19 = arith.constant 19 : index
    %80 = memref.load %arg2[%c19] : memref<144xf32, #tpu.memory_space<smem>>
    %81 = vector.extract_strided_slice %36 {offsets = [32, 0], sizes = [16, 16], strides = [1, 1]} : vector<64x16xf32> to vector<16x16xf32>
    %82 = vector.broadcast %80 : f32 to vector<16x16xf32>
    %83 = arith.mulf %82, %81 : vector<16x16xf32>
    %84 = arith.addf %79, %83 : vector<16x16xf32>
    %c28 = arith.constant 28 : index
    %85 = memref.load %arg2[%c28] : memref<144xf32, #tpu.memory_space<smem>>
    %86 = vector.extract_strided_slice %36 {offsets = [48, 0], sizes = [16, 16], strides = [1, 1]} : vector<64x16xf32> to vector<16x16xf32>
    %87 = vector.broadcast %85 : f32 to vector<16x16xf32>
    %88 = arith.mulf %87, %86 : vector<16x16xf32>
    %89 = arith.addf %84, %88 : vector<16x16xf32>
    %c2 = arith.constant 2 : index
    %90 = memref.load %arg2[%c2] : memref<144xf32, #tpu.memory_space<smem>>
    %91 = vector.extract_strided_slice %42 {offsets = [0, 0], sizes = [16, 16], strides = [1, 1]} : vector<64x16xf32> to vector<16x16xf32>
    %92 = vector.broadcast %90 : f32 to vector<16x16xf32>
    %93 = arith.mulf %92, %91 : vector<16x16xf32>
    %94 = arith.addf %89, %93 : vector<16x16xf32>
    %c11 = arith.constant 11 : index
    %95 = memref.load %arg2[%c11] : memref<144xf32, #tpu.memory_space<smem>>
    %96 = vector.extract_strided_slice %42 {offsets = [16, 0], sizes = [16, 16], strides = [1, 1]} : vector<64x16xf32> to vector<16x16xf32>
    %97 = vector.broadcast %95 : f32 to vector<16x16xf32>
    %98 = arith.mulf %97, %96 : vector<16x16xf32>
    %99 = arith.addf %94, %98 : vector<16x16xf32>
    %c20 = arith.constant 20 : index
    %100 = memref.load %arg2[%c20] : memref<144xf32, #tpu.memory_space<smem>>
    %101 = vector.extract_strided_slice %42 {offsets = [32, 0], sizes = [16, 16], strides = [1, 1]} : vector<64x16xf32> to vector<16x16xf32>
    %102 = vector.broadcast %100 : f32 to vector<16x16xf32>
    %103 = arith.mulf %102, %101 : vector<16x16xf32>
    %104 = arith.addf %99, %103 : vector<16x16xf32>
    %c29 = arith.constant 29 : index
    %105 = memref.load %arg2[%c29] : memref<144xf32, #tpu.memory_space<smem>>
    %106 = vector.extract_strided_slice %42 {offsets = [48, 0], sizes = [16, 16], strides = [1, 1]} : vector<64x16xf32> to vector<16x16xf32>
    %107 = vector.broadcast %105 : f32 to vector<16x16xf32>
    %108 = arith.mulf %107, %106 : vector<16x16xf32>
    %109 = arith.addf %104, %108 : vector<16x16xf32>
    %c3 = arith.constant 3 : index
    %110 = memref.load %arg2[%c3] : memref<144xf32, #tpu.memory_space<smem>>
    %111 = vector.extract_strided_slice %25 {offsets = [0, 0], sizes = [16, 16], strides = [1, 1]} : vector<64x16xf32> to vector<16x16xf32>
    %112 = vector.broadcast %110 : f32 to vector<16x16xf32>
    %113 = arith.mulf %112, %111 : vector<16x16xf32>
    %114 = arith.addf %109, %113 : vector<16x16xf32>
    %c12 = arith.constant 12 : index
    %115 = memref.load %arg2[%c12] : memref<144xf32, #tpu.memory_space<smem>>
    %116 = vector.extract_strided_slice %25 {offsets = [16, 0], sizes = [16, 16], strides = [1, 1]} : vector<64x16xf32> to vector<16x16xf32>
    %117 = vector.broadcast %115 : f32 to vector<16x16xf32>
    %118 = arith.mulf %117, %116 : vector<16x16xf32>
    %119 = arith.addf %114, %118 : vector<16x16xf32>
    %c21 = arith.constant 21 : index
    %120 = memref.load %arg2[%c21] : memref<144xf32, #tpu.memory_space<smem>>
    %121 = vector.extract_strided_slice %25 {offsets = [32, 0], sizes = [16, 16], strides = [1, 1]} : vector<64x16xf32> to vector<16x16xf32>
    %122 = vector.broadcast %120 : f32 to vector<16x16xf32>
    %123 = arith.mulf %122, %121 : vector<16x16xf32>
    %124 = arith.addf %119, %123 : vector<16x16xf32>
    %c30 = arith.constant 30 : index
    %125 = memref.load %arg2[%c30] : memref<144xf32, #tpu.memory_space<smem>>
    %126 = vector.extract_strided_slice %25 {offsets = [48, 0], sizes = [16, 16], strides = [1, 1]} : vector<64x16xf32> to vector<16x16xf32>
    %127 = vector.broadcast %125 : f32 to vector<16x16xf32>
    %128 = arith.mulf %127, %126 : vector<16x16xf32>
    %129 = arith.addf %124, %128 : vector<16x16xf32>
    %c4 = arith.constant 4 : index
    %130 = memref.load %arg2[%c4] : memref<144xf32, #tpu.memory_space<smem>>
    %131 = vector.extract_strided_slice %1 {offsets = [0, 0], sizes = [16, 16], strides = [1, 1]} : vector<64x16xf32> to vector<16x16xf32>
    %132 = vector.broadcast %130 : f32 to vector<16x16xf32>
    %133 = arith.mulf %132, %131 : vector<16x16xf32>
    %134 = arith.addf %129, %133 : vector<16x16xf32>
    %c13 = arith.constant 13 : index
    %135 = memref.load %arg2[%c13] : memref<144xf32, #tpu.memory_space<smem>>
    %136 = vector.extract_strided_slice %1 {offsets = [16, 0], sizes = [16, 16], strides = [1, 1]} : vector<64x16xf32> to vector<16x16xf32>
    %137 = vector.broadcast %135 : f32 to vector<16x16xf32>
    %138 = arith.mulf %137, %136 : vector<16x16xf32>
    %139 = arith.addf %134, %138 : vector<16x16xf32>
    %c22 = arith.constant 22 : index
    %140 = memref.load %arg2[%c22] : memref<144xf32, #tpu.memory_space<smem>>
    %141 = vector.extract_strided_slice %1 {offsets = [32, 0], sizes = [16, 16], strides = [1, 1]} : vector<64x16xf32> to vector<16x16xf32>
    %142 = vector.broadcast %140 : f32 to vector<16x16xf32>
    %143 = arith.mulf %142, %141 : vector<16x16xf32>
    %144 = arith.addf %139, %143 : vector<16x16xf32>
    %c31 = arith.constant 31 : index
    %145 = memref.load %arg2[%c31] : memref<144xf32, #tpu.memory_space<smem>>
    %146 = vector.extract_strided_slice %1 {offsets = [48, 0], sizes = [16, 16], strides = [1, 1]} : vector<64x16xf32> to vector<16x16xf32>
    %147 = vector.broadcast %145 : f32 to vector<16x16xf32>
    %148 = arith.mulf %147, %146 : vector<16x16xf32>
    %149 = arith.addf %144, %148 : vector<16x16xf32>
    %c5 = arith.constant 5 : index
    %150 = memref.load %arg2[%c5] : memref<144xf32, #tpu.memory_space<smem>>
    %151 = vector.extract_strided_slice %27 {offsets = [0, 0], sizes = [16, 16], strides = [1, 1]} : vector<64x16xf32> to vector<16x16xf32>
    %152 = vector.broadcast %150 : f32 to vector<16x16xf32>
    %153 = arith.mulf %152, %151 : vector<16x16xf32>
    %154 = arith.addf %149, %153 : vector<16x16xf32>
    %c14 = arith.constant 14 : index
    %155 = memref.load %arg2[%c14] : memref<144xf32, #tpu.memory_space<smem>>
    %156 = vector.extract_strided_slice %27 {offsets = [16, 0], sizes = [16, 16], strides = [1, 1]} : vector<64x16xf32> to vector<16x16xf32>
    %157 = vector.broadcast %155 : f32 to vector<16x16xf32>
    %158 = arith.mulf %157, %156 : vector<16x16xf32>
    %159 = arith.addf %154, %158 : vector<16x16xf32>
    %c23 = arith.constant 23 : index
    %160 = memref.load %arg2[%c23] : memref<144xf32, #tpu.memory_space<smem>>
    %161 = vector.extract_strided_slice %27 {offsets = [32, 0], sizes = [16, 16], strides = [1, 1]} : vector<64x16xf32> to vector<16x16xf32>
    %162 = vector.broadcast %160 : f32 to vector<16x16xf32>
    %163 = arith.mulf %162, %161 : vector<16x16xf32>
    %164 = arith.addf %159, %163 : vector<16x16xf32>
    %c32 = arith.constant 32 : index
    %165 = memref.load %arg2[%c32] : memref<144xf32, #tpu.memory_space<smem>>
    %166 = vector.extract_strided_slice %27 {offsets = [48, 0], sizes = [16, 16], strides = [1, 1]} : vector<64x16xf32> to vector<16x16xf32>
    %167 = vector.broadcast %165 : f32 to vector<16x16xf32>
    %168 = arith.mulf %167, %166 : vector<16x16xf32>
    %169 = arith.addf %164, %168 : vector<16x16xf32>
    %c6 = arith.constant 6 : index
    %170 = memref.load %arg2[%c6] : memref<144xf32, #tpu.memory_space<smem>>
    %171 = vector.extract_strided_slice %33 {offsets = [0, 0], sizes = [16, 16], strides = [1, 1]} : vector<64x16xf32> to vector<16x16xf32>
    %172 = vector.broadcast %170 : f32 to vector<16x16xf32>
    %173 = arith.mulf %172, %171 : vector<16x16xf32>
    %174 = arith.addf %169, %173 : vector<16x16xf32>
    %c15 = arith.constant 15 : index
    %175 = memref.load %arg2[%c15] : memref<144xf32, #tpu.memory_space<smem>>
    %176 = vector.extract_strided_slice %33 {offsets = [16, 0], sizes = [16, 16], strides = [1, 1]} : vector<64x16xf32> to vector<16x16xf32>
    %177 = vector.broadcast %175 : f32 to vector<16x16xf32>
    %178 = arith.mulf %177, %176 : vector<16x16xf32>
    %179 = arith.addf %174, %178 : vector<16x16xf32>
    %c24 = arith.constant 24 : index
    %180 = memref.load %arg2[%c24] : memref<144xf32, #tpu.memory_space<smem>>
    %181 = vector.extract_strided_slice %33 {offsets = [32, 0], sizes = [16, 16], strides = [1, 1]} : vector<64x16xf32> to vector<16x16xf32>
    %182 = vector.broadcast %180 : f32 to vector<16x16xf32>
    %183 = arith.mulf %182, %181 : vector<16x16xf32>
    %184 = arith.addf %179, %183 : vector<16x16xf32>
    %c33 = arith.constant 33 : index
    %185 = memref.load %arg2[%c33] : memref<144xf32, #tpu.memory_space<smem>>
    %186 = vector.extract_strided_slice %33 {offsets = [48, 0], sizes = [16, 16], strides = [1, 1]} : vector<64x16xf32> to vector<16x16xf32>
    %187 = vector.broadcast %185 : f32 to vector<16x16xf32>
    %188 = arith.mulf %187, %186 : vector<16x16xf32>
    %189 = arith.addf %184, %188 : vector<16x16xf32>
    %c7 = arith.constant 7 : index
    %190 = memref.load %arg2[%c7] : memref<144xf32, #tpu.memory_space<smem>>
    %191 = vector.extract_strided_slice %39 {offsets = [0, 0], sizes = [16, 16], strides = [1, 1]} : vector<64x16xf32> to vector<16x16xf32>
    %192 = vector.broadcast %190 : f32 to vector<16x16xf32>
    %193 = arith.mulf %192, %191 : vector<16x16xf32>
    %194 = arith.addf %189, %193 : vector<16x16xf32>
    %c16 = arith.constant 16 : index
    %195 = memref.load %arg2[%c16] : memref<144xf32, #tpu.memory_space<smem>>
    %196 = vector.extract_strided_slice %39 {offsets = [16, 0], sizes = [16, 16], strides = [1, 1]} : vector<64x16xf32> to vector<16x16xf32>
    %197 = vector.broadcast %195 : f32 to vector<16x16xf32>
    %198 = arith.mulf %197, %196 : vector<16x16xf32>
    %199 = arith.addf %194, %198 : vector<16x16xf32>
    %c25 = arith.constant 25 : index
    %200 = memref.load %arg2[%c25] : memref<144xf32, #tpu.memory_space<smem>>
    %201 = vector.extract_strided_slice %39 {offsets = [32, 0], sizes = [16, 16], strides = [1, 1]} : vector<64x16xf32> to vector<16x16xf32>
    %202 = vector.broadcast %200 : f32 to vector<16x16xf32>
    %203 = arith.mulf %202, %201 : vector<16x16xf32>
    %204 = arith.addf %199, %203 : vector<16x16xf32>
    %c34 = arith.constant 34 : index
    %205 = memref.load %arg2[%c34] : memref<144xf32, #tpu.memory_space<smem>>
    %206 = vector.extract_strided_slice %39 {offsets = [48, 0], sizes = [16, 16], strides = [1, 1]} : vector<64x16xf32> to vector<16x16xf32>
    %207 = vector.broadcast %205 : f32 to vector<16x16xf32>
    %208 = arith.mulf %207, %206 : vector<16x16xf32>
    %209 = arith.addf %204, %208 : vector<16x16xf32>
    %c8 = arith.constant 8 : index
    %210 = memref.load %arg2[%c8] : memref<144xf32, #tpu.memory_space<smem>>
    %211 = vector.extract_strided_slice %45 {offsets = [0, 0], sizes = [16, 16], strides = [1, 1]} : vector<64x16xf32> to vector<16x16xf32>
    %212 = vector.broadcast %210 : f32 to vector<16x16xf32>
    %213 = arith.mulf %212, %211 : vector<16x16xf32>
    %214 = arith.addf %209, %213 : vector<16x16xf32>
    %c17 = arith.constant 17 : index
    %215 = memref.load %arg2[%c17] : memref<144xf32, #tpu.memory_space<smem>>
    %216 = vector.extract_strided_slice %45 {offsets = [16, 0], sizes = [16, 16], strides = [1, 1]} : vector<64x16xf32> to vector<16x16xf32>
    %217 = vector.broadcast %215 : f32 to vector<16x16xf32>
    %218 = arith.mulf %217, %216 : vector<16x16xf32>
    %219 = arith.addf %214, %218 : vector<16x16xf32>
    %c26 = arith.constant 26 : index
    %220 = memref.load %arg2[%c26] : memref<144xf32, #tpu.memory_space<smem>>
    %221 = vector.extract_strided_slice %45 {offsets = [32, 0], sizes = [16, 16], strides = [1, 1]} : vector<64x16xf32> to vector<16x16xf32>
    %222 = vector.broadcast %220 : f32 to vector<16x16xf32>
    %223 = arith.mulf %222, %221 : vector<16x16xf32>
    %224 = arith.addf %219, %223 : vector<16x16xf32>
    %c35 = arith.constant 35 : index
    %225 = memref.load %arg2[%c35] : memref<144xf32, #tpu.memory_space<smem>>
    %226 = vector.extract_strided_slice %45 {offsets = [48, 0], sizes = [16, 16], strides = [1, 1]} : vector<64x16xf32> to vector<16x16xf32>
    %227 = vector.broadcast %225 : f32 to vector<16x16xf32>
    %228 = arith.mulf %227, %226 : vector<16x16xf32>
    %229 = arith.addf %224, %228 : vector<16x16xf32>
    %cst_20 = arith.constant 0.000000e+00 : f32
    %230 = vector.broadcast %cst_20 : f32 to vector<16x16xf32>
    %231 = arith.maximumf %229, %230 : vector<16x16xf32>
    %c0_21 = arith.constant 0 : index
    %c0_22 = arith.constant 0 : index
    %232 = vector.load %arg8[%c0_21, %c0_22] : memref<64x16xf32, #tpu.memory_space<vmem>>, vector<16x16xf32>
    tpu.vector_store %arg8[%c0_21, %c0_22], %231 {strides = array<i32>} : memref<64x16xf32, #tpu.memory_space<vmem>>, vector<16x16xf32>,
    %cst_23 = arith.constant 0.000000e+00 : f32
    %233 = vector.broadcast %cst_23 : f32 to vector<16x16xf32>
    %c1_24 = arith.constant 1 : index
    %234 = memref.load %arg3[%c1_24] : memref<4xf32, #tpu.memory_space<smem>>
    %235 = vector.broadcast %234 : f32 to vector<16x16xf32>
    %236 = arith.addf %233, %235 : vector<16x16xf32>
    %c36 = arith.constant 36 : index
    %237 = memref.load %arg2[%c36] : memref<144xf32, #tpu.memory_space<smem>>
    %238 = vector.extract_strided_slice %30 {offsets = [0, 0], sizes = [16, 16], strides = [1, 1]} : vector<64x16xf32> to vector<16x16xf32>
    %239 = vector.broadcast %237 : f32 to vector<16x16xf32>
    %240 = arith.mulf %239, %238 : vector<16x16xf32>
    %241 = arith.addf %236, %240 : vector<16x16xf32>
    %c45 = arith.constant 45 : index
    %242 = memref.load %arg2[%c45] : memref<144xf32, #tpu.memory_space<smem>>
    %243 = vector.extract_strided_slice %30 {offsets = [16, 0], sizes = [16, 16], strides = [1, 1]} : vector<64x16xf32> to vector<16x16xf32>
    %244 = vector.broadcast %242 : f32 to vector<16x16xf32>
    %245 = arith.mulf %244, %243 : vector<16x16xf32>
    %246 = arith.addf %241, %245 : vector<16x16xf32>
    %c54 = arith.constant 54 : index
    %247 = memref.load %arg2[%c54] : memref<144xf32, #tpu.memory_space<smem>>
    %248 = vector.extract_strided_slice %30 {offsets = [32, 0], sizes = [16, 16], strides = [1, 1]} : vector<64x16xf32> to vector<16x16xf32>
    %249 = vector.broadcast %247 : f32 to vector<16x16xf32>
    %250 = arith.mulf %249, %248 : vector<16x16xf32>
    %251 = arith.addf %246, %250 : vector<16x16xf32>
    %c63 = arith.constant 63 : index
    %252 = memref.load %arg2[%c63] : memref<144xf32, #tpu.memory_space<smem>>
    %253 = vector.extract_strided_slice %30 {offsets = [48, 0], sizes = [16, 16], strides = [1, 1]} : vector<64x16xf32> to vector<16x16xf32>
    %254 = vector.broadcast %252 : f32 to vector<16x16xf32>
    %255 = arith.mulf %254, %253 : vector<16x16xf32>
    %256 = arith.addf %251, %255 : vector<16x16xf32>
    %c37 = arith.constant 37 : index
    %257 = memref.load %arg2[%c37] : memref<144xf32, #tpu.memory_space<smem>>
    %258 = vector.extract_strided_slice %36 {offsets = [0, 0], sizes = [16, 16], strides = [1, 1]} : vector<64x16xf32> to vector<16x16xf32>
    %259 = vector.broadcast %257 : f32 to vector<16x16xf32>
    %260 = arith.mulf %259, %258 : vector<16x16xf32>
    %261 = arith.addf %256, %260 : vector<16x16xf32>
    %c46 = arith.constant 46 : index
    %262 = memref.load %arg2[%c46] : memref<144xf32, #tpu.memory_space<smem>>
    %263 = vector.extract_strided_slice %36 {offsets = [16, 0], sizes = [16, 16], strides = [1, 1]} : vector<64x16xf32> to vector<16x16xf32>
    %264 = vector.broadcast %262 : f32 to vector<16x16xf32>
    %265 = arith.mulf %264, %263 : vector<16x16xf32>
    %266 = arith.addf %261, %265 : vector<16x16xf32>
    %c55 = arith.constant 55 : index
    %267 = memref.load %arg2[%c55] : memref<144xf32, #tpu.memory_space<smem>>
    %268 = vector.extract_strided_slice %36 {offsets = [32, 0], sizes = [16, 16], strides = [1, 1]} : vector<64x16xf32> to vector<16x16xf32>
    %269 = vector.broadcast %267 : f32 to vector<16x16xf32>
    %270 = arith.mulf %269, %268 : vector<16x16xf32>
    %271 = arith.addf %266, %270 : vector<16x16xf32>
    %c64 = arith.constant 64 : index
    %272 = memref.load %arg2[%c64] : memref<144xf32, #tpu.memory_space<smem>>
    %273 = vector.extract_strided_slice %36 {offsets = [48, 0], sizes = [16, 16], strides = [1, 1]} : vector<64x16xf32> to vector<16x16xf32>
    %274 = vector.broadcast %272 : f32 to vector<16x16xf32>
    %275 = arith.mulf %274, %273 : vector<16x16xf32>
    %276 = arith.addf %271, %275 : vector<16x16xf32>
    %c38 = arith.constant 38 : index
    %277 = memref.load %arg2[%c38] : memref<144xf32, #tpu.memory_space<smem>>
    %278 = vector.extract_strided_slice %42 {offsets = [0, 0], sizes = [16, 16], strides = [1, 1]} : vector<64x16xf32> to vector<16x16xf32>
    %279 = vector.broadcast %277 : f32 to vector<16x16xf32>
    %280 = arith.mulf %279, %278 : vector<16x16xf32>
    %281 = arith.addf %276, %280 : vector<16x16xf32>
    %c47 = arith.constant 47 : index
    %282 = memref.load %arg2[%c47] : memref<144xf32, #tpu.memory_space<smem>>
    %283 = vector.extract_strided_slice %42 {offsets = [16, 0], sizes = [16, 16], strides = [1, 1]} : vector<64x16xf32> to vector<16x16xf32>
    %284 = vector.broadcast %282 : f32 to vector<16x16xf32>
    %285 = arith.mulf %284, %283 : vector<16x16xf32>
    %286 = arith.addf %281, %285 : vector<16x16xf32>
    %c56 = arith.constant 56 : index
    %287 = memref.load %arg2[%c56] : memref<144xf32, #tpu.memory_space<smem>>
    %288 = vector.extract_strided_slice %42 {offsets = [32, 0], sizes = [16, 16], strides = [1, 1]} : vector<64x16xf32> to vector<16x16xf32>
    %289 = vector.broadcast %287 : f32 to vector<16x16xf32>
    %290 = arith.mulf %289, %288 : vector<16x16xf32>
    %291 = arith.addf %286, %290 : vector<16x16xf32>
    %c65 = arith.constant 65 : index
    %292 = memref.load %arg2[%c65] : memref<144xf32, #tpu.memory_space<smem>>
    %293 = vector.extract_strided_slice %42 {offsets = [48, 0], sizes = [16, 16], strides = [1, 1]} : vector<64x16xf32> to vector<16x16xf32>
    %294 = vector.broadcast %292 : f32 to vector<16x16xf32>
    %295 = arith.mulf %294, %293 : vector<16x16xf32>
    %296 = arith.addf %291, %295 : vector<16x16xf32>
    %c39 = arith.constant 39 : index
    %297 = memref.load %arg2[%c39] : memref<144xf32, #tpu.memory_space<smem>>
    %298 = vector.extract_strided_slice %25 {offsets = [0, 0], sizes = [16, 16], strides = [1, 1]} : vector<64x16xf32> to vector<16x16xf32>
    %299 = vector.broadcast %297 : f32 to vector<16x16xf32>
    %300 = arith.mulf %299, %298 : vector<16x16xf32>
    %301 = arith.addf %296, %300 : vector<16x16xf32>
    %c48 = arith.constant 48 : index
    %302 = memref.load %arg2[%c48] : memref<144xf32, #tpu.memory_space<smem>>
    %303 = vector.extract_strided_slice %25 {offsets = [16, 0], sizes = [16, 16], strides = [1, 1]} : vector<64x16xf32> to vector<16x16xf32>
    %304 = vector.broadcast %302 : f32 to vector<16x16xf32>
    %305 = arith.mulf %304, %303 : vector<16x16xf32>
    %306 = arith.addf %301, %305 : vector<16x16xf32>
    %c57 = arith.constant 57 : index
    %307 = memref.load %arg2[%c57] : memref<144xf32, #tpu.memory_space<smem>>
    %308 = vector.extract_strided_slice %25 {offsets = [32, 0], sizes = [16, 16], strides = [1, 1]} : vector<64x16xf32> to vector<16x16xf32>
    %309 = vector.broadcast %307 : f32 to vector<16x16xf32>
    %310 = arith.mulf %309, %308 : vector<16x16xf32>
    %311 = arith.addf %306, %310 : vector<16x16xf32>
    %c66 = arith.constant 66 : index
    %312 = memref.load %arg2[%c66] : memref<144xf32, #tpu.memory_space<smem>>
    %313 = vector.extract_strided_slice %25 {offsets = [48, 0], sizes = [16, 16], strides = [1, 1]} : vector<64x16xf32> to vector<16x16xf32>
    %314 = vector.broadcast %312 : f32 to vector<16x16xf32>
    %315 = arith.mulf %314, %313 : vector<16x16xf32>
    %316 = arith.addf %311, %315 : vector<16x16xf32>
    %c40 = arith.constant 40 : index
    %317 = memref.load %arg2[%c40] : memref<144xf32, #tpu.memory_space<smem>>
    %318 = vector.extract_strided_slice %1 {offsets = [0, 0], sizes = [16, 16], strides = [1, 1]} : vector<64x16xf32> to vector<16x16xf32>
    %319 = vector.broadcast %317 : f32 to vector<16x16xf32>
    %320 = arith.mulf %319, %318 : vector<16x16xf32>
    %321 = arith.addf %316, %320 : vector<16x16xf32>
    %c49 = arith.constant 49 : index
    %322 = memref.load %arg2[%c49] : memref<144xf32, #tpu.memory_space<smem>>
    %323 = vector.extract_strided_slice %1 {offsets = [16, 0], sizes = [16, 16], strides = [1, 1]} : vector<64x16xf32> to vector<16x16xf32>
    %324 = vector.broadcast %322 : f32 to vector<16x16xf32>
    %325 = arith.mulf %324, %323 : vector<16x16xf32>
    %326 = arith.addf %321, %325 : vector<16x16xf32>
    %c58 = arith.constant 58 : index
    %327 = memref.load %arg2[%c58] : memref<144xf32, #tpu.memory_space<smem>>
    %328 = vector.extract_strided_slice %1 {offsets = [32, 0], sizes = [16, 16], strides = [1, 1]} : vector<64x16xf32> to vector<16x16xf32>
    %329 = vector.broadcast %327 : f32 to vector<16x16xf32>
    %330 = arith.mulf %329, %328 : vector<16x16xf32>
    %331 = arith.addf %326, %330 : vector<16x16xf32>
    %c67 = arith.constant 67 : index
    %332 = memref.load %arg2[%c67] : memref<144xf32, #tpu.memory_space<smem>>
    %333 = vector.extract_strided_slice %1 {offsets = [48, 0], sizes = [16, 16], strides = [1, 1]} : vector<64x16xf32> to vector<16x16xf32>
    %334 = vector.broadcast %332 : f32 to vector<16x16xf32>
    %335 = arith.mulf %334, %333 : vector<16x16xf32>
    %336 = arith.addf %331, %335 : vector<16x16xf32>
    %c41 = arith.constant 41 : index
    %337 = memref.load %arg2[%c41] : memref<144xf32, #tpu.memory_space<smem>>
    %338 = vector.extract_strided_slice %27 {offsets = [0, 0], sizes = [16, 16], strides = [1, 1]} : vector<64x16xf32> to vector<16x16xf32>
    %339 = vector.broadcast %337 : f32 to vector<16x16xf32>
    %340 = arith.mulf %339, %338 : vector<16x16xf32>
    %341 = arith.addf %336, %340 : vector<16x16xf32>
    %c50 = arith.constant 50 : index
    %342 = memref.load %arg2[%c50] : memref<144xf32, #tpu.memory_space<smem>>
    %343 = vector.extract_strided_slice %27 {offsets = [16, 0], sizes = [16, 16], strides = [1, 1]} : vector<64x16xf32> to vector<16x16xf32>
    %344 = vector.broadcast %342 : f32 to vector<16x16xf32>
    %345 = arith.mulf %344, %343 : vector<16x16xf32>
    %346 = arith.addf %341, %345 : vector<16x16xf32>
    %c59 = arith.constant 59 : index
    %347 = memref.load %arg2[%c59] : memref<144xf32, #tpu.memory_space<smem>>
    %348 = vector.extract_strided_slice %27 {offsets = [32, 0], sizes = [16, 16], strides = [1, 1]} : vector<64x16xf32> to vector<16x16xf32>
    %349 = vector.broadcast %347 : f32 to vector<16x16xf32>
    %350 = arith.mulf %349, %348 : vector<16x16xf32>
    %351 = arith.addf %346, %350 : vector<16x16xf32>
    %c68 = arith.constant 68 : index
    %352 = memref.load %arg2[%c68] : memref<144xf32, #tpu.memory_space<smem>>
    %353 = vector.extract_strided_slice %27 {offsets = [48, 0], sizes = [16, 16], strides = [1, 1]} : vector<64x16xf32> to vector<16x16xf32>
    %354 = vector.broadcast %352 : f32 to vector<16x16xf32>
    %355 = arith.mulf %354, %353 : vector<16x16xf32>
    %356 = arith.addf %351, %355 : vector<16x16xf32>
    %c42 = arith.constant 42 : index
    %357 = memref.load %arg2[%c42] : memref<144xf32, #tpu.memory_space<smem>>
    %358 = vector.extract_strided_slice %33 {offsets = [0, 0], sizes = [16, 16], strides = [1, 1]} : vector<64x16xf32> to vector<16x16xf32>
    %359 = vector.broadcast %357 : f32 to vector<16x16xf32>
    %360 = arith.mulf %359, %358 : vector<16x16xf32>
    %361 = arith.addf %356, %360 : vector<16x16xf32>
    %c51 = arith.constant 51 : index
    %362 = memref.load %arg2[%c51] : memref<144xf32, #tpu.memory_space<smem>>
    %363 = vector.extract_strided_slice %33 {offsets = [16, 0], sizes = [16, 16], strides = [1, 1]} : vector<64x16xf32> to vector<16x16xf32>
    %364 = vector.broadcast %362 : f32 to vector<16x16xf32>
    %365 = arith.mulf %364, %363 : vector<16x16xf32>
    %366 = arith.addf %361, %365 : vector<16x16xf32>
    %c60 = arith.constant 60 : index
    %367 = memref.load %arg2[%c60] : memref<144xf32, #tpu.memory_space<smem>>
    %368 = vector.extract_strided_slice %33 {offsets = [32, 0], sizes = [16, 16], strides = [1, 1]} : vector<64x16xf32> to vector<16x16xf32>
    %369 = vector.broadcast %367 : f32 to vector<16x16xf32>
    %370 = arith.mulf %369, %368 : vector<16x16xf32>
    %371 = arith.addf %366, %370 : vector<16x16xf32>
    %c69 = arith.constant 69 : index
    %372 = memref.load %arg2[%c69] : memref<144xf32, #tpu.memory_space<smem>>
    %373 = vector.extract_strided_slice %33 {offsets = [48, 0], sizes = [16, 16], strides = [1, 1]} : vector<64x16xf32> to vector<16x16xf32>
    %374 = vector.broadcast %372 : f32 to vector<16x16xf32>
    %375 = arith.mulf %374, %373 : vector<16x16xf32>
    %376 = arith.addf %371, %375 : vector<16x16xf32>
    %c43 = arith.constant 43 : index
    %377 = memref.load %arg2[%c43] : memref<144xf32, #tpu.memory_space<smem>>
    %378 = vector.extract_strided_slice %39 {offsets = [0, 0], sizes = [16, 16], strides = [1, 1]} : vector<64x16xf32> to vector<16x16xf32>
    %379 = vector.broadcast %377 : f32 to vector<16x16xf32>
    %380 = arith.mulf %379, %378 : vector<16x16xf32>
    %381 = arith.addf %376, %380 : vector<16x16xf32>
    %c52 = arith.constant 52 : index
    %382 = memref.load %arg2[%c52] : memref<144xf32, #tpu.memory_space<smem>>
    %383 = vector.extract_strided_slice %39 {offsets = [16, 0], sizes = [16, 16], strides = [1, 1]} : vector<64x16xf32> to vector<16x16xf32>
    %384 = vector.broadcast %382 : f32 to vector<16x16xf32>
    %385 = arith.mulf %384, %383 : vector<16x16xf32>
    %386 = arith.addf %381, %385 : vector<16x16xf32>
    %c61 = arith.constant 61 : index
    %387 = memref.load %arg2[%c61] : memref<144xf32, #tpu.memory_space<smem>>
    %388 = vector.extract_strided_slice %39 {offsets = [32, 0], sizes = [16, 16], strides = [1, 1]} : vector<64x16xf32> to vector<16x16xf32>
    %389 = vector.broadcast %387 : f32 to vector<16x16xf32>
    %390 = arith.mulf %389, %388 : vector<16x16xf32>
    %391 = arith.addf %386, %390 : vector<16x16xf32>
    %c70 = arith.constant 70 : index
    %392 = memref.load %arg2[%c70] : memref<144xf32, #tpu.memory_space<smem>>
    %393 = vector.extract_strided_slice %39 {offsets = [48, 0], sizes = [16, 16], strides = [1, 1]} : vector<64x16xf32> to vector<16x16xf32>
    %394 = vector.broadcast %392 : f32 to vector<16x16xf32>
    %395 = arith.mulf %394, %393 : vector<16x16xf32>
    %396 = arith.addf %391, %395 : vector<16x16xf32>
    %c44 = arith.constant 44 : index
    %397 = memref.load %arg2[%c44] : memref<144xf32, #tpu.memory_space<smem>>
    %398 = vector.extract_strided_slice %45 {offsets = [0, 0], sizes = [16, 16], strides = [1, 1]} : vector<64x16xf32> to vector<16x16xf32>
    %399 = vector.broadcast %397 : f32 to vector<16x16xf32>
    %400 = arith.mulf %399, %398 : vector<16x16xf32>
    %401 = arith.addf %396, %400 : vector<16x16xf32>
    %c53 = arith.constant 53 : index
    %402 = memref.load %arg2[%c53] : memref<144xf32, #tpu.memory_space<smem>>
    %403 = vector.extract_strided_slice %45 {offsets = [16, 0], sizes = [16, 16], strides = [1, 1]} : vector<64x16xf32> to vector<16x16xf32>
    %404 = vector.broadcast %402 : f32 to vector<16x16xf32>
    %405 = arith.mulf %404, %403 : vector<16x16xf32>
    %406 = arith.addf %401, %405 : vector<16x16xf32>
    %c62 = arith.constant 62 : index
    %407 = memref.load %arg2[%c62] : memref<144xf32, #tpu.memory_space<smem>>
    %408 = vector.extract_strided_slice %45 {offsets = [32, 0], sizes = [16, 16], strides = [1, 1]} : vector<64x16xf32> to vector<16x16xf32>
    %409 = vector.broadcast %407 : f32 to vector<16x16xf32>
    %410 = arith.mulf %409, %408 : vector<16x16xf32>
    %411 = arith.addf %406, %410 : vector<16x16xf32>
    %c71 = arith.constant 71 : index
    %412 = memref.load %arg2[%c71] : memref<144xf32, #tpu.memory_space<smem>>
    %413 = vector.extract_strided_slice %45 {offsets = [48, 0], sizes = [16, 16], strides = [1, 1]} : vector<64x16xf32> to vector<16x16xf32>
    %414 = vector.broadcast %412 : f32 to vector<16x16xf32>
    %415 = arith.mulf %414, %413 : vector<16x16xf32>
    %416 = arith.addf %411, %415 : vector<16x16xf32>
    %cst_25 = arith.constant 0.000000e+00 : f32
    %417 = vector.broadcast %cst_25 : f32 to vector<16x16xf32>
    %418 = arith.maximumf %416, %417 : vector<16x16xf32>
    %c16_26 = arith.constant 16 : index
    %c0_27 = arith.constant 0 : index
    %419 = vector.load %arg8[%c16_26, %c0_27] : memref<64x16xf32, #tpu.memory_space<vmem>>, vector<16x16xf32>
    tpu.vector_store %arg8[%c16_26, %c0_27], %418 {strides = array<i32>} : memref<64x16xf32, #tpu.memory_space<vmem>>, vector<16x16xf32>,
    %cst_28 = arith.constant 0.000000e+00 : f32
    %420 = vector.broadcast %cst_28 : f32 to vector<16x16xf32>
    %c2_29 = arith.constant 2 : index
    %421 = memref.load %arg3[%c2_29] : memref<4xf32, #tpu.memory_space<smem>>
    %422 = vector.broadcast %421 : f32 to vector<16x16xf32>
    %423 = arith.addf %420, %422 : vector<16x16xf32>
    %c72 = arith.constant 72 : index
    %424 = memref.load %arg2[%c72] : memref<144xf32, #tpu.memory_space<smem>>
    %425 = vector.extract_strided_slice %30 {offsets = [0, 0], sizes = [16, 16], strides = [1, 1]} : vector<64x16xf32> to vector<16x16xf32>
    %426 = vector.broadcast %424 : f32 to vector<16x16xf32>
    %427 = arith.mulf %426, %425 : vector<16x16xf32>
    %428 = arith.addf %423, %427 : vector<16x16xf32>
    %c81 = arith.constant 81 : index
    %429 = memref.load %arg2[%c81] : memref<144xf32, #tpu.memory_space<smem>>
    %430 = vector.extract_strided_slice %30 {offsets = [16, 0], sizes = [16, 16], strides = [1, 1]} : vector<64x16xf32> to vector<16x16xf32>
    %431 = vector.broadcast %429 : f32 to vector<16x16xf32>
    %432 = arith.mulf %431, %430 : vector<16x16xf32>
    %433 = arith.addf %428, %432 : vector<16x16xf32>
    %c90 = arith.constant 90 : index
    %434 = memref.load %arg2[%c90] : memref<144xf32, #tpu.memory_space<smem>>
    %435 = vector.extract_strided_slice %30 {offsets = [32, 0], sizes = [16, 16], strides = [1, 1]} : vector<64x16xf32> to vector<16x16xf32>
    %436 = vector.broadcast %434 : f32 to vector<16x16xf32>
    %437 = arith.mulf %436, %435 : vector<16x16xf32>
    %438 = arith.addf %433, %437 : vector<16x16xf32>
    %c99 = arith.constant 99 : index
    %439 = memref.load %arg2[%c99] : memref<144xf32, #tpu.memory_space<smem>>
    %440 = vector.extract_strided_slice %30 {offsets = [48, 0], sizes = [16, 16], strides = [1, 1]} : vector<64x16xf32> to vector<16x16xf32>
    %441 = vector.broadcast %439 : f32 to vector<16x16xf32>
    %442 = arith.mulf %441, %440 : vector<16x16xf32>
    %443 = arith.addf %438, %442 : vector<16x16xf32>
    %c73 = arith.constant 73 : index
    %444 = memref.load %arg2[%c73] : memref<144xf32, #tpu.memory_space<smem>>
    %445 = vector.extract_strided_slice %36 {offsets = [0, 0], sizes = [16, 16], strides = [1, 1]} : vector<64x16xf32> to vector<16x16xf32>
    %446 = vector.broadcast %444 : f32 to vector<16x16xf32>
    %447 = arith.mulf %446, %445 : vector<16x16xf32>
    %448 = arith.addf %443, %447 : vector<16x16xf32>
    %c82 = arith.constant 82 : index
    %449 = memref.load %arg2[%c82] : memref<144xf32, #tpu.memory_space<smem>>
    %450 = vector.extract_strided_slice %36 {offsets = [16, 0], sizes = [16, 16], strides = [1, 1]} : vector<64x16xf32> to vector<16x16xf32>
    %451 = vector.broadcast %449 : f32 to vector<16x16xf32>
    %452 = arith.mulf %451, %450 : vector<16x16xf32>
    %453 = arith.addf %448, %452 : vector<16x16xf32>
    %c91 = arith.constant 91 : index
    %454 = memref.load %arg2[%c91] : memref<144xf32, #tpu.memory_space<smem>>
    %455 = vector.extract_strided_slice %36 {offsets = [32, 0], sizes = [16, 16], strides = [1, 1]} : vector<64x16xf32> to vector<16x16xf32>
    %456 = vector.broadcast %454 : f32 to vector<16x16xf32>
    %457 = arith.mulf %456, %455 : vector<16x16xf32>
    %458 = arith.addf %453, %457 : vector<16x16xf32>
    %c100 = arith.constant 100 : index
    %459 = memref.load %arg2[%c100] : memref<144xf32, #tpu.memory_space<smem>>
    %460 = vector.extract_strided_slice %36 {offsets = [48, 0], sizes = [16, 16], strides = [1, 1]} : vector<64x16xf32> to vector<16x16xf32>
    %461 = vector.broadcast %459 : f32 to vector<16x16xf32>
    %462 = arith.mulf %461, %460 : vector<16x16xf32>
    %463 = arith.addf %458, %462 : vector<16x16xf32>
    %c74 = arith.constant 74 : index
    %464 = memref.load %arg2[%c74] : memref<144xf32, #tpu.memory_space<smem>>
    %465 = vector.extract_strided_slice %42 {offsets = [0, 0], sizes = [16, 16], strides = [1, 1]} : vector<64x16xf32> to vector<16x16xf32>
    %466 = vector.broadcast %464 : f32 to vector<16x16xf32>
    %467 = arith.mulf %466, %465 : vector<16x16xf32>
    %468 = arith.addf %463, %467 : vector<16x16xf32>
    %c83 = arith.constant 83 : index
    %469 = memref.load %arg2[%c83] : memref<144xf32, #tpu.memory_space<smem>>
    %470 = vector.extract_strided_slice %42 {offsets = [16, 0], sizes = [16, 16], strides = [1, 1]} : vector<64x16xf32> to vector<16x16xf32>
    %471 = vector.broadcast %469 : f32 to vector<16x16xf32>
    %472 = arith.mulf %471, %470 : vector<16x16xf32>
    %473 = arith.addf %468, %472 : vector<16x16xf32>
    %c92 = arith.constant 92 : index
    %474 = memref.load %arg2[%c92] : memref<144xf32, #tpu.memory_space<smem>>
    %475 = vector.extract_strided_slice %42 {offsets = [32, 0], sizes = [16, 16], strides = [1, 1]} : vector<64x16xf32> to vector<16x16xf32>
    %476 = vector.broadcast %474 : f32 to vector<16x16xf32>
    %477 = arith.mulf %476, %475 : vector<16x16xf32>
    %478 = arith.addf %473, %477 : vector<16x16xf32>
    %c101 = arith.constant 101 : index
    %479 = memref.load %arg2[%c101] : memref<144xf32, #tpu.memory_space<smem>>
    %480 = vector.extract_strided_slice %42 {offsets = [48, 0], sizes = [16, 16], strides = [1, 1]} : vector<64x16xf32> to vector<16x16xf32>
    %481 = vector.broadcast %479 : f32 to vector<16x16xf32>
    %482 = arith.mulf %481, %480 : vector<16x16xf32>
    %483 = arith.addf %478, %482 : vector<16x16xf32>
    %c75 = arith.constant 75 : index
    %484 = memref.load %arg2[%c75] : memref<144xf32, #tpu.memory_space<smem>>
    %485 = vector.extract_strided_slice %25 {offsets = [0, 0], sizes = [16, 16], strides = [1, 1]} : vector<64x16xf32> to vector<16x16xf32>
    %486 = vector.broadcast %484 : f32 to vector<16x16xf32>
    %487 = arith.mulf %486, %485 : vector<16x16xf32>
    %488 = arith.addf %483, %487 : vector<16x16xf32>
    %c84 = arith.constant 84 : index
    %489 = memref.load %arg2[%c84] : memref<144xf32, #tpu.memory_space<smem>>
    %490 = vector.extract_strided_slice %25 {offsets = [16, 0], sizes = [16, 16], strides = [1, 1]} : vector<64x16xf32> to vector<16x16xf32>
    %491 = vector.broadcast %489 : f32 to vector<16x16xf32>
    %492 = arith.mulf %491, %490 : vector<16x16xf32>
    %493 = arith.addf %488, %492 : vector<16x16xf32>
    %c93 = arith.constant 93 : index
    %494 = memref.load %arg2[%c93] : memref<144xf32, #tpu.memory_space<smem>>
    %495 = vector.extract_strided_slice %25 {offsets = [32, 0], sizes = [16, 16], strides = [1, 1]} : vector<64x16xf32> to vector<16x16xf32>
    %496 = vector.broadcast %494 : f32 to vector<16x16xf32>
    %497 = arith.mulf %496, %495 : vector<16x16xf32>
    %498 = arith.addf %493, %497 : vector<16x16xf32>
    %c102 = arith.constant 102 : index
    %499 = memref.load %arg2[%c102] : memref<144xf32, #tpu.memory_space<smem>>
    %500 = vector.extract_strided_slice %25 {offsets = [48, 0], sizes = [16, 16], strides = [1, 1]} : vector<64x16xf32> to vector<16x16xf32>
    %501 = vector.broadcast %499 : f32 to vector<16x16xf32>
    %502 = arith.mulf %501, %500 : vector<16x16xf32>
    %503 = arith.addf %498, %502 : vector<16x16xf32>
    %c76 = arith.constant 76 : index
    %504 = memref.load %arg2[%c76] : memref<144xf32, #tpu.memory_space<smem>>
    %505 = vector.extract_strided_slice %1 {offsets = [0, 0], sizes = [16, 16], strides = [1, 1]} : vector<64x16xf32> to vector<16x16xf32>
    %506 = vector.broadcast %504 : f32 to vector<16x16xf32>
    %507 = arith.mulf %506, %505 : vector<16x16xf32>
    %508 = arith.addf %503, %507 : vector<16x16xf32>
    %c85 = arith.constant 85 : index
    %509 = memref.load %arg2[%c85] : memref<144xf32, #tpu.memory_space<smem>>
    %510 = vector.extract_strided_slice %1 {offsets = [16, 0], sizes = [16, 16], strides = [1, 1]} : vector<64x16xf32> to vector<16x16xf32>
    %511 = vector.broadcast %509 : f32 to vector<16x16xf32>
    %512 = arith.mulf %511, %510 : vector<16x16xf32>
    %513 = arith.addf %508, %512 : vector<16x16xf32>
    %c94 = arith.constant 94 : index
    %514 = memref.load %arg2[%c94] : memref<144xf32, #tpu.memory_space<smem>>
    %515 = vector.extract_strided_slice %1 {offsets = [32, 0], sizes = [16, 16], strides = [1, 1]} : vector<64x16xf32> to vector<16x16xf32>
    %516 = vector.broadcast %514 : f32 to vector<16x16xf32>
    %517 = arith.mulf %516, %515 : vector<16x16xf32>
    %518 = arith.addf %513, %517 : vector<16x16xf32>
    %c103 = arith.constant 103 : index
    %519 = memref.load %arg2[%c103] : memref<144xf32, #tpu.memory_space<smem>>
    %520 = vector.extract_strided_slice %1 {offsets = [48, 0], sizes = [16, 16], strides = [1, 1]} : vector<64x16xf32> to vector<16x16xf32>
    %521 = vector.broadcast %519 : f32 to vector<16x16xf32>
    %522 = arith.mulf %521, %520 : vector<16x16xf32>
    %523 = arith.addf %518, %522 : vector<16x16xf32>
    %c77 = arith.constant 77 : index
    %524 = memref.load %arg2[%c77] : memref<144xf32, #tpu.memory_space<smem>>
    %525 = vector.extract_strided_slice %27 {offsets = [0, 0], sizes = [16, 16], strides = [1, 1]} : vector<64x16xf32> to vector<16x16xf32>
    %526 = vector.broadcast %524 : f32 to vector<16x16xf32>
    %527 = arith.mulf %526, %525 : vector<16x16xf32>
    %528 = arith.addf %523, %527 : vector<16x16xf32>
    %c86 = arith.constant 86 : index
    %529 = memref.load %arg2[%c86] : memref<144xf32, #tpu.memory_space<smem>>
    %530 = vector.extract_strided_slice %27 {offsets = [16, 0], sizes = [16, 16], strides = [1, 1]} : vector<64x16xf32> to vector<16x16xf32>
    %531 = vector.broadcast %529 : f32 to vector<16x16xf32>
    %532 = arith.mulf %531, %530 : vector<16x16xf32>
    %533 = arith.addf %528, %532 : vector<16x16xf32>
    %c95 = arith.constant 95 : index
    %534 = memref.load %arg2[%c95] : memref<144xf32, #tpu.memory_space<smem>>
    %535 = vector.extract_strided_slice %27 {offsets = [32, 0], sizes = [16, 16], strides = [1, 1]} : vector<64x16xf32> to vector<16x16xf32>
    %536 = vector.broadcast %534 : f32 to vector<16x16xf32>
    %537 = arith.mulf %536, %535 : vector<16x16xf32>
    %538 = arith.addf %533, %537 : vector<16x16xf32>
    %c104 = arith.constant 104 : index
    %539 = memref.load %arg2[%c104] : memref<144xf32, #tpu.memory_space<smem>>
    %540 = vector.extract_strided_slice %27 {offsets = [48, 0], sizes = [16, 16], strides = [1, 1]} : vector<64x16xf32> to vector<16x16xf32>
    %541 = vector.broadcast %539 : f32 to vector<16x16xf32>
    %542 = arith.mulf %541, %540 : vector<16x16xf32>
    %543 = arith.addf %538, %542 : vector<16x16xf32>
    %c78 = arith.constant 78 : index
    %544 = memref.load %arg2[%c78] : memref<144xf32, #tpu.memory_space<smem>>
    %545 = vector.extract_strided_slice %33 {offsets = [0, 0], sizes = [16, 16], strides = [1, 1]} : vector<64x16xf32> to vector<16x16xf32>
    %546 = vector.broadcast %544 : f32 to vector<16x16xf32>
    %547 = arith.mulf %546, %545 : vector<16x16xf32>
    %548 = arith.addf %543, %547 : vector<16x16xf32>
    %c87 = arith.constant 87 : index
    %549 = memref.load %arg2[%c87] : memref<144xf32, #tpu.memory_space<smem>>
    %550 = vector.extract_strided_slice %33 {offsets = [16, 0], sizes = [16, 16], strides = [1, 1]} : vector<64x16xf32> to vector<16x16xf32>
    %551 = vector.broadcast %549 : f32 to vector<16x16xf32>
    %552 = arith.mulf %551, %550 : vector<16x16xf32>
    %553 = arith.addf %548, %552 : vector<16x16xf32>
    %c96 = arith.constant 96 : index
    %554 = memref.load %arg2[%c96] : memref<144xf32, #tpu.memory_space<smem>>
    %555 = vector.extract_strided_slice %33 {offsets = [32, 0], sizes = [16, 16], strides = [1, 1]} : vector<64x16xf32> to vector<16x16xf32>
    %556 = vector.broadcast %554 : f32 to vector<16x16xf32>
    %557 = arith.mulf %556, %555 : vector<16x16xf32>
    %558 = arith.addf %553, %557 : vector<16x16xf32>
    %c105 = arith.constant 105 : index
    %559 = memref.load %arg2[%c105] : memref<144xf32, #tpu.memory_space<smem>>
    %560 = vector.extract_strided_slice %33 {offsets = [48, 0], sizes = [16, 16], strides = [1, 1]} : vector<64x16xf32> to vector<16x16xf32>
    %561 = vector.broadcast %559 : f32 to vector<16x16xf32>
    %562 = arith.mulf %561, %560 : vector<16x16xf32>
    %563 = arith.addf %558, %562 : vector<16x16xf32>
    %c79 = arith.constant 79 : index
    %564 = memref.load %arg2[%c79] : memref<144xf32, #tpu.memory_space<smem>>
    %565 = vector.extract_strided_slice %39 {offsets = [0, 0], sizes = [16, 16], strides = [1, 1]} : vector<64x16xf32> to vector<16x16xf32>
    %566 = vector.broadcast %564 : f32 to vector<16x16xf32>
    %567 = arith.mulf %566, %565 : vector<16x16xf32>
    %568 = arith.addf %563, %567 : vector<16x16xf32>
    %c88 = arith.constant 88 : index
    %569 = memref.load %arg2[%c88] : memref<144xf32, #tpu.memory_space<smem>>
    %570 = vector.extract_strided_slice %39 {offsets = [16, 0], sizes = [16, 16], strides = [1, 1]} : vector<64x16xf32> to vector<16x16xf32>
    %571 = vector.broadcast %569 : f32 to vector<16x16xf32>
    %572 = arith.mulf %571, %570 : vector<16x16xf32>
    %573 = arith.addf %568, %572 : vector<16x16xf32>
    %c97 = arith.constant 97 : index
    %574 = memref.load %arg2[%c97] : memref<144xf32, #tpu.memory_space<smem>>
    %575 = vector.extract_strided_slice %39 {offsets = [32, 0], sizes = [16, 16], strides = [1, 1]} : vector<64x16xf32> to vector<16x16xf32>
    %576 = vector.broadcast %574 : f32 to vector<16x16xf32>
    %577 = arith.mulf %576, %575 : vector<16x16xf32>
    %578 = arith.addf %573, %577 : vector<16x16xf32>
    %c106 = arith.constant 106 : index
    %579 = memref.load %arg2[%c106] : memref<144xf32, #tpu.memory_space<smem>>
    %580 = vector.extract_strided_slice %39 {offsets = [48, 0], sizes = [16, 16], strides = [1, 1]} : vector<64x16xf32> to vector<16x16xf32>
    %581 = vector.broadcast %579 : f32 to vector<16x16xf32>
    %582 = arith.mulf %581, %580 : vector<16x16xf32>
    %583 = arith.addf %578, %582 : vector<16x16xf32>
    %c80 = arith.constant 80 : index
    %584 = memref.load %arg2[%c80] : memref<144xf32, #tpu.memory_space<smem>>
    %585 = vector.extract_strided_slice %45 {offsets = [0, 0], sizes = [16, 16], strides = [1, 1]} : vector<64x16xf32> to vector<16x16xf32>
    %586 = vector.broadcast %584 : f32 to vector<16x16xf32>
    %587 = arith.mulf %586, %585 : vector<16x16xf32>
    %588 = arith.addf %583, %587 : vector<16x16xf32>
    %c89 = arith.constant 89 : index
    %589 = memref.load %arg2[%c89] : memref<144xf32, #tpu.memory_space<smem>>
    %590 = vector.extract_strided_slice %45 {offsets = [16, 0], sizes = [16, 16], strides = [1, 1]} : vector<64x16xf32> to vector<16x16xf32>
    %591 = vector.broadcast %589 : f32 to vector<16x16xf32>
    %592 = arith.mulf %591, %590 : vector<16x16xf32>
    %593 = arith.addf %588, %592 : vector<16x16xf32>
    %c98 = arith.constant 98 : index
    %594 = memref.load %arg2[%c98] : memref<144xf32, #tpu.memory_space<smem>>
    %595 = vector.extract_strided_slice %45 {offsets = [32, 0], sizes = [16, 16], strides = [1, 1]} : vector<64x16xf32> to vector<16x16xf32>
    %596 = vector.broadcast %594 : f32 to vector<16x16xf32>
    %597 = arith.mulf %596, %595 : vector<16x16xf32>
    %598 = arith.addf %593, %597 : vector<16x16xf32>
    %c107 = arith.constant 107 : index
    %599 = memref.load %arg2[%c107] : memref<144xf32, #tpu.memory_space<smem>>
    %600 = vector.extract_strided_slice %45 {offsets = [48, 0], sizes = [16, 16], strides = [1, 1]} : vector<64x16xf32> to vector<16x16xf32>
    %601 = vector.broadcast %599 : f32 to vector<16x16xf32>
    %602 = arith.mulf %601, %600 : vector<16x16xf32>
    %603 = arith.addf %598, %602 : vector<16x16xf32>
    %cst_30 = arith.constant 0.000000e+00 : f32
    %604 = vector.broadcast %cst_30 : f32 to vector<16x16xf32>
    %605 = arith.maximumf %603, %604 : vector<16x16xf32>
    %c32_31 = arith.constant 32 : index
    %c0_32 = arith.constant 0 : index
    %606 = vector.load %arg8[%c32_31, %c0_32] : memref<64x16xf32, #tpu.memory_space<vmem>>, vector<16x16xf32>
    tpu.vector_store %arg8[%c32_31, %c0_32], %605 {strides = array<i32>} : memref<64x16xf32, #tpu.memory_space<vmem>>, vector<16x16xf32>,
    %cst_33 = arith.constant 0.000000e+00 : f32
    %607 = vector.broadcast %cst_33 : f32 to vector<16x16xf32>
    %c3_34 = arith.constant 3 : index
    %608 = memref.load %arg3[%c3_34] : memref<4xf32, #tpu.memory_space<smem>>
    %609 = vector.broadcast %608 : f32 to vector<16x16xf32>
    %610 = arith.addf %607, %609 : vector<16x16xf32>
    %c108 = arith.constant 108 : index
    %611 = memref.load %arg2[%c108] : memref<144xf32, #tpu.memory_space<smem>>
    %612 = vector.extract_strided_slice %30 {offsets = [0, 0], sizes = [16, 16], strides = [1, 1]} : vector<64x16xf32> to vector<16x16xf32>
    %613 = vector.broadcast %611 : f32 to vector<16x16xf32>
    %614 = arith.mulf %613, %612 : vector<16x16xf32>
    %615 = arith.addf %610, %614 : vector<16x16xf32>
    %c117 = arith.constant 117 : index
    %616 = memref.load %arg2[%c117] : memref<144xf32, #tpu.memory_space<smem>>
    %617 = vector.extract_strided_slice %30 {offsets = [16, 0], sizes = [16, 16], strides = [1, 1]} : vector<64x16xf32> to vector<16x16xf32>
    %618 = vector.broadcast %616 : f32 to vector<16x16xf32>
    %619 = arith.mulf %618, %617 : vector<16x16xf32>
    %620 = arith.addf %615, %619 : vector<16x16xf32>
    %c126 = arith.constant 126 : index
    %621 = memref.load %arg2[%c126] : memref<144xf32, #tpu.memory_space<smem>>
    %622 = vector.extract_strided_slice %30 {offsets = [32, 0], sizes = [16, 16], strides = [1, 1]} : vector<64x16xf32> to vector<16x16xf32>
    %623 = vector.broadcast %621 : f32 to vector<16x16xf32>
    %624 = arith.mulf %623, %622 : vector<16x16xf32>
    %625 = arith.addf %620, %624 : vector<16x16xf32>
    %c135 = arith.constant 135 : index
    %626 = memref.load %arg2[%c135] : memref<144xf32, #tpu.memory_space<smem>>
    %627 = vector.extract_strided_slice %30 {offsets = [48, 0], sizes = [16, 16], strides = [1, 1]} : vector<64x16xf32> to vector<16x16xf32>
    %628 = vector.broadcast %626 : f32 to vector<16x16xf32>
    %629 = arith.mulf %628, %627 : vector<16x16xf32>
    %630 = arith.addf %625, %629 : vector<16x16xf32>
    %c109 = arith.constant 109 : index
    %631 = memref.load %arg2[%c109] : memref<144xf32, #tpu.memory_space<smem>>
    %632 = vector.extract_strided_slice %36 {offsets = [0, 0], sizes = [16, 16], strides = [1, 1]} : vector<64x16xf32> to vector<16x16xf32>
    %633 = vector.broadcast %631 : f32 to vector<16x16xf32>
    %634 = arith.mulf %633, %632 : vector<16x16xf32>
    %635 = arith.addf %630, %634 : vector<16x16xf32>
    %c118 = arith.constant 118 : index
    %636 = memref.load %arg2[%c118] : memref<144xf32, #tpu.memory_space<smem>>
    %637 = vector.extract_strided_slice %36 {offsets = [16, 0], sizes = [16, 16], strides = [1, 1]} : vector<64x16xf32> to vector<16x16xf32>
    %638 = vector.broadcast %636 : f32 to vector<16x16xf32>
    %639 = arith.mulf %638, %637 : vector<16x16xf32>
    %640 = arith.addf %635, %639 : vector<16x16xf32>
    %c127 = arith.constant 127 : index
    %641 = memref.load %arg2[%c127] : memref<144xf32, #tpu.memory_space<smem>>
    %642 = vector.extract_strided_slice %36 {offsets = [32, 0], sizes = [16, 16], strides = [1, 1]} : vector<64x16xf32> to vector<16x16xf32>
    %643 = vector.broadcast %641 : f32 to vector<16x16xf32>
    %644 = arith.mulf %643, %642 : vector<16x16xf32>
    %645 = arith.addf %640, %644 : vector<16x16xf32>
    %c136 = arith.constant 136 : index
    %646 = memref.load %arg2[%c136] : memref<144xf32, #tpu.memory_space<smem>>
    %647 = vector.extract_strided_slice %36 {offsets = [48, 0], sizes = [16, 16], strides = [1, 1]} : vector<64x16xf32> to vector<16x16xf32>
    %648 = vector.broadcast %646 : f32 to vector<16x16xf32>
    %649 = arith.mulf %648, %647 : vector<16x16xf32>
    %650 = arith.addf %645, %649 : vector<16x16xf32>
    %c110 = arith.constant 110 : index
    %651 = memref.load %arg2[%c110] : memref<144xf32, #tpu.memory_space<smem>>
    %652 = vector.extract_strided_slice %42 {offsets = [0, 0], sizes = [16, 16], strides = [1, 1]} : vector<64x16xf32> to vector<16x16xf32>
    %653 = vector.broadcast %651 : f32 to vector<16x16xf32>
    %654 = arith.mulf %653, %652 : vector<16x16xf32>
    %655 = arith.addf %650, %654 : vector<16x16xf32>
    %c119 = arith.constant 119 : index
    %656 = memref.load %arg2[%c119] : memref<144xf32, #tpu.memory_space<smem>>
    %657 = vector.extract_strided_slice %42 {offsets = [16, 0], sizes = [16, 16], strides = [1, 1]} : vector<64x16xf32> to vector<16x16xf32>
    %658 = vector.broadcast %656 : f32 to vector<16x16xf32>
    %659 = arith.mulf %658, %657 : vector<16x16xf32>
    %660 = arith.addf %655, %659 : vector<16x16xf32>
    %c128 = arith.constant 128 : index
    %661 = memref.load %arg2[%c128] : memref<144xf32, #tpu.memory_space<smem>>
    %662 = vector.extract_strided_slice %42 {offsets = [32, 0], sizes = [16, 16], strides = [1, 1]} : vector<64x16xf32> to vector<16x16xf32>
    %663 = vector.broadcast %661 : f32 to vector<16x16xf32>
    %664 = arith.mulf %663, %662 : vector<16x16xf32>
    %665 = arith.addf %660, %664 : vector<16x16xf32>
    %c137 = arith.constant 137 : index
    %666 = memref.load %arg2[%c137] : memref<144xf32, #tpu.memory_space<smem>>
    %667 = vector.extract_strided_slice %42 {offsets = [48, 0], sizes = [16, 16], strides = [1, 1]} : vector<64x16xf32> to vector<16x16xf32>
    %668 = vector.broadcast %666 : f32 to vector<16x16xf32>
    %669 = arith.mulf %668, %667 : vector<16x16xf32>
    %670 = arith.addf %665, %669 : vector<16x16xf32>
    %c111 = arith.constant 111 : index
    %671 = memref.load %arg2[%c111] : memref<144xf32, #tpu.memory_space<smem>>
    %672 = vector.extract_strided_slice %25 {offsets = [0, 0], sizes = [16, 16], strides = [1, 1]} : vector<64x16xf32> to vector<16x16xf32>
    %673 = vector.broadcast %671 : f32 to vector<16x16xf32>
    %674 = arith.mulf %673, %672 : vector<16x16xf32>
    %675 = arith.addf %670, %674 : vector<16x16xf32>
    %c120 = arith.constant 120 : index
    %676 = memref.load %arg2[%c120] : memref<144xf32, #tpu.memory_space<smem>>
    %677 = vector.extract_strided_slice %25 {offsets = [16, 0], sizes = [16, 16], strides = [1, 1]} : vector<64x16xf32> to vector<16x16xf32>
    %678 = vector.broadcast %676 : f32 to vector<16x16xf32>
    %679 = arith.mulf %678, %677 : vector<16x16xf32>
    %680 = arith.addf %675, %679 : vector<16x16xf32>
    %c129 = arith.constant 129 : index
    %681 = memref.load %arg2[%c129] : memref<144xf32, #tpu.memory_space<smem>>
    %682 = vector.extract_strided_slice %25 {offsets = [32, 0], sizes = [16, 16], strides = [1, 1]} : vector<64x16xf32> to vector<16x16xf32>
    %683 = vector.broadcast %681 : f32 to vector<16x16xf32>
    %684 = arith.mulf %683, %682 : vector<16x16xf32>
    %685 = arith.addf %680, %684 : vector<16x16xf32>
    %c138 = arith.constant 138 : index
    %686 = memref.load %arg2[%c138] : memref<144xf32, #tpu.memory_space<smem>>
    %687 = vector.extract_strided_slice %25 {offsets = [48, 0], sizes = [16, 16], strides = [1, 1]} : vector<64x16xf32> to vector<16x16xf32>
    %688 = vector.broadcast %686 : f32 to vector<16x16xf32>
    %689 = arith.mulf %688, %687 : vector<16x16xf32>
    %690 = arith.addf %685, %689 : vector<16x16xf32>
    %c112 = arith.constant 112 : index
    %691 = memref.load %arg2[%c112] : memref<144xf32, #tpu.memory_space<smem>>
    %692 = vector.extract_strided_slice %1 {offsets = [0, 0], sizes = [16, 16], strides = [1, 1]} : vector<64x16xf32> to vector<16x16xf32>
    %693 = vector.broadcast %691 : f32 to vector<16x16xf32>
    %694 = arith.mulf %693, %692 : vector<16x16xf32>
    %695 = arith.addf %690, %694 : vector<16x16xf32>
    %c121 = arith.constant 121 : index
    %696 = memref.load %arg2[%c121] : memref<144xf32, #tpu.memory_space<smem>>
    %697 = vector.extract_strided_slice %1 {offsets = [16, 0], sizes = [16, 16], strides = [1, 1]} : vector<64x16xf32> to vector<16x16xf32>
    %698 = vector.broadcast %696 : f32 to vector<16x16xf32>
    %699 = arith.mulf %698, %697 : vector<16x16xf32>
    %700 = arith.addf %695, %699 : vector<16x16xf32>
    %c130 = arith.constant 130 : index
    %701 = memref.load %arg2[%c130] : memref<144xf32, #tpu.memory_space<smem>>
    %702 = vector.extract_strided_slice %1 {offsets = [32, 0], sizes = [16, 16], strides = [1, 1]} : vector<64x16xf32> to vector<16x16xf32>
    %703 = vector.broadcast %701 : f32 to vector<16x16xf32>
    %704 = arith.mulf %703, %702 : vector<16x16xf32>
    %705 = arith.addf %700, %704 : vector<16x16xf32>
    %c139 = arith.constant 139 : index
    %706 = memref.load %arg2[%c139] : memref<144xf32, #tpu.memory_space<smem>>
    %707 = vector.extract_strided_slice %1 {offsets = [48, 0], sizes = [16, 16], strides = [1, 1]} : vector<64x16xf32> to vector<16x16xf32>
    %708 = vector.broadcast %706 : f32 to vector<16x16xf32>
    %709 = arith.mulf %708, %707 : vector<16x16xf32>
    %710 = arith.addf %705, %709 : vector<16x16xf32>
    %c113 = arith.constant 113 : index
    %711 = memref.load %arg2[%c113] : memref<144xf32, #tpu.memory_space<smem>>
    %712 = vector.extract_strided_slice %27 {offsets = [0, 0], sizes = [16, 16], strides = [1, 1]} : vector<64x16xf32> to vector<16x16xf32>
    %713 = vector.broadcast %711 : f32 to vector<16x16xf32>
    %714 = arith.mulf %713, %712 : vector<16x16xf32>
    %715 = arith.addf %710, %714 : vector<16x16xf32>
    %c122 = arith.constant 122 : index
    %716 = memref.load %arg2[%c122] : memref<144xf32, #tpu.memory_space<smem>>
    %717 = vector.extract_strided_slice %27 {offsets = [16, 0], sizes = [16, 16], strides = [1, 1]} : vector<64x16xf32> to vector<16x16xf32>
    %718 = vector.broadcast %716 : f32 to vector<16x16xf32>
    %719 = arith.mulf %718, %717 : vector<16x16xf32>
    %720 = arith.addf %715, %719 : vector<16x16xf32>
    %c131 = arith.constant 131 : index
    %721 = memref.load %arg2[%c131] : memref<144xf32, #tpu.memory_space<smem>>
    %722 = vector.extract_strided_slice %27 {offsets = [32, 0], sizes = [16, 16], strides = [1, 1]} : vector<64x16xf32> to vector<16x16xf32>
    %723 = vector.broadcast %721 : f32 to vector<16x16xf32>
    %724 = arith.mulf %723, %722 : vector<16x16xf32>
    %725 = arith.addf %720, %724 : vector<16x16xf32>
    %c140 = arith.constant 140 : index
    %726 = memref.load %arg2[%c140] : memref<144xf32, #tpu.memory_space<smem>>
    %727 = vector.extract_strided_slice %27 {offsets = [48, 0], sizes = [16, 16], strides = [1, 1]} : vector<64x16xf32> to vector<16x16xf32>
    %728 = vector.broadcast %726 : f32 to vector<16x16xf32>
    %729 = arith.mulf %728, %727 : vector<16x16xf32>
    %730 = arith.addf %725, %729 : vector<16x16xf32>
    %c114 = arith.constant 114 : index
    %731 = memref.load %arg2[%c114] : memref<144xf32, #tpu.memory_space<smem>>
    %732 = vector.extract_strided_slice %33 {offsets = [0, 0], sizes = [16, 16], strides = [1, 1]} : vector<64x16xf32> to vector<16x16xf32>
    %733 = vector.broadcast %731 : f32 to vector<16x16xf32>
    %734 = arith.mulf %733, %732 : vector<16x16xf32>
    %735 = arith.addf %730, %734 : vector<16x16xf32>
    %c123 = arith.constant 123 : index
    %736 = memref.load %arg2[%c123] : memref<144xf32, #tpu.memory_space<smem>>
    %737 = vector.extract_strided_slice %33 {offsets = [16, 0], sizes = [16, 16], strides = [1, 1]} : vector<64x16xf32> to vector<16x16xf32>
    %738 = vector.broadcast %736 : f32 to vector<16x16xf32>
    %739 = arith.mulf %738, %737 : vector<16x16xf32>
    %740 = arith.addf %735, %739 : vector<16x16xf32>
    %c132 = arith.constant 132 : index
    %741 = memref.load %arg2[%c132] : memref<144xf32, #tpu.memory_space<smem>>
    %742 = vector.extract_strided_slice %33 {offsets = [32, 0], sizes = [16, 16], strides = [1, 1]} : vector<64x16xf32> to vector<16x16xf32>
    %743 = vector.broadcast %741 : f32 to vector<16x16xf32>
    %744 = arith.mulf %743, %742 : vector<16x16xf32>
    %745 = arith.addf %740, %744 : vector<16x16xf32>
    %c141 = arith.constant 141 : index
    %746 = memref.load %arg2[%c141] : memref<144xf32, #tpu.memory_space<smem>>
    %747 = vector.extract_strided_slice %33 {offsets = [48, 0], sizes = [16, 16], strides = [1, 1]} : vector<64x16xf32> to vector<16x16xf32>
    %748 = vector.broadcast %746 : f32 to vector<16x16xf32>
    %749 = arith.mulf %748, %747 : vector<16x16xf32>
    %750 = arith.addf %745, %749 : vector<16x16xf32>
    %c115 = arith.constant 115 : index
    %751 = memref.load %arg2[%c115] : memref<144xf32, #tpu.memory_space<smem>>
    %752 = vector.extract_strided_slice %39 {offsets = [0, 0], sizes = [16, 16], strides = [1, 1]} : vector<64x16xf32> to vector<16x16xf32>
    %753 = vector.broadcast %751 : f32 to vector<16x16xf32>
    %754 = arith.mulf %753, %752 : vector<16x16xf32>
    %755 = arith.addf %750, %754 : vector<16x16xf32>
    %c124 = arith.constant 124 : index
    %756 = memref.load %arg2[%c124] : memref<144xf32, #tpu.memory_space<smem>>
    %757 = vector.extract_strided_slice %39 {offsets = [16, 0], sizes = [16, 16], strides = [1, 1]} : vector<64x16xf32> to vector<16x16xf32>
    %758 = vector.broadcast %756 : f32 to vector<16x16xf32>
    %759 = arith.mulf %758, %757 : vector<16x16xf32>
    %760 = arith.addf %755, %759 : vector<16x16xf32>
    %c133 = arith.constant 133 : index
    %761 = memref.load %arg2[%c133] : memref<144xf32, #tpu.memory_space<smem>>
    %762 = vector.extract_strided_slice %39 {offsets = [32, 0], sizes = [16, 16], strides = [1, 1]} : vector<64x16xf32> to vector<16x16xf32>
    %763 = vector.broadcast %761 : f32 to vector<16x16xf32>
    %764 = arith.mulf %763, %762 : vector<16x16xf32>
    %765 = arith.addf %760, %764 : vector<16x16xf32>
    %c142 = arith.constant 142 : index
    %766 = memref.load %arg2[%c142] : memref<144xf32, #tpu.memory_space<smem>>
    %767 = vector.extract_strided_slice %39 {offsets = [48, 0], sizes = [16, 16], strides = [1, 1]} : vector<64x16xf32> to vector<16x16xf32>
    %768 = vector.broadcast %766 : f32 to vector<16x16xf32>
    %769 = arith.mulf %768, %767 : vector<16x16xf32>
    %770 = arith.addf %765, %769 : vector<16x16xf32>
    %c116 = arith.constant 116 : index
    %771 = memref.load %arg2[%c116] : memref<144xf32, #tpu.memory_space<smem>>
    %772 = vector.extract_strided_slice %45 {offsets = [0, 0], sizes = [16, 16], strides = [1, 1]} : vector<64x16xf32> to vector<16x16xf32>
    %773 = vector.broadcast %771 : f32 to vector<16x16xf32>
    %774 = arith.mulf %773, %772 : vector<16x16xf32>
    %775 = arith.addf %770, %774 : vector<16x16xf32>
    %c125 = arith.constant 125 : index
    %776 = memref.load %arg2[%c125] : memref<144xf32, #tpu.memory_space<smem>>
    %777 = vector.extract_strided_slice %45 {offsets = [16, 0], sizes = [16, 16], strides = [1, 1]} : vector<64x16xf32> to vector<16x16xf32>
    %778 = vector.broadcast %776 : f32 to vector<16x16xf32>
    %779 = arith.mulf %778, %777 : vector<16x16xf32>
    %780 = arith.addf %775, %779 : vector<16x16xf32>
    %c134 = arith.constant 134 : index
    %781 = memref.load %arg2[%c134] : memref<144xf32, #tpu.memory_space<smem>>
    %782 = vector.extract_strided_slice %45 {offsets = [32, 0], sizes = [16, 16], strides = [1, 1]} : vector<64x16xf32> to vector<16x16xf32>
    %783 = vector.broadcast %781 : f32 to vector<16x16xf32>
    %784 = arith.mulf %783, %782 : vector<16x16xf32>
    %785 = arith.addf %780, %784 : vector<16x16xf32>
    %c143 = arith.constant 143 : index
    %786 = memref.load %arg2[%c143] : memref<144xf32, #tpu.memory_space<smem>>
    %787 = vector.extract_strided_slice %45 {offsets = [48, 0], sizes = [16, 16], strides = [1, 1]} : vector<64x16xf32> to vector<16x16xf32>
    %788 = vector.broadcast %786 : f32 to vector<16x16xf32>
    %789 = arith.mulf %788, %787 : vector<16x16xf32>
    %790 = arith.addf %785, %789 : vector<16x16xf32>
    %cst_35 = arith.constant 0.000000e+00 : f32
    %791 = vector.broadcast %cst_35 : f32 to vector<16x16xf32>
    %792 = arith.maximumf %790, %791 : vector<16x16xf32>
    %c48_36 = arith.constant 48 : index
    %c0_37 = arith.constant 0 : index
    %793 = vector.load %arg8[%c48_36, %c0_37] : memref<64x16xf32, #tpu.memory_space<vmem>>, vector<16x16xf32>
    tpu.vector_store %arg8[%c48_36, %c0_37], %792 {strides = array<i32>} : memref<64x16xf32, #tpu.memory_space<vmem>>, vector<16x16xf32>,
    %794 = tpu.iota {dimensions = array<i32: 1>} : vector<8x16xi32>
    %c2_i32 = arith.constant 2 : i32
    %c0_i32_38 = arith.constant 0 : i32
    %795 = arith.cmpi eq, %c2_i32, %c0_i32_38 : i32
    %c1_i32_39 = arith.constant 1 : i32
    %796 = arith.select %795, %c1_i32_39, %c2_i32 : i32
    %797 = vector.broadcast %796 : i32 to vector<8x16xi32>
    %798 = arith.remsi %794, %797 : vector<8x16xi32>
    %c0_i32_40 = arith.constant 0 : i32
    %799 = vector.broadcast %c0_i32_40 : i32 to vector<8x16xi32>
    %800 = arith.cmpi ne, %798, %799 : vector<8x16xi32>
    %c0_i32_41 = arith.constant 0 : i32
    %801 = vector.broadcast %c0_i32_41 : i32 to vector<8x16xi32>
    %802 = arith.cmpi slt, %798, %801 : vector<8x16xi32>
    %c0_i32_42 = arith.constant 0 : i32
    %803 = arith.cmpi slt, %796, %c0_i32_42 : i32
    %804 = vector.broadcast %803 : i1 to vector<8x16xi1>
    %805 = vector.broadcast %804 : vector<8x16xi1> to vector<8x16xi1>
    %806 = arith.xori %802, %805 : vector<8x16xi1>
    %807 = arith.andi %806, %800 : vector<8x16xi1>
    %808 = vector.broadcast %796 : i32 to vector<8x16xi32>
    %809 = arith.addi %798, %808 : vector<8x16xi32>
    %810 = arith.select %807, %809, %798 : vector<8x16xi1>, vector<8x16xi32>
    %c0_i32_43 = arith.constant 0 : i32
    %811 = vector.broadcast %c0_i32_43 : i32 to vector<8x16xi32>
    %812 = arith.cmpi eq, %810, %811 : vector<8x16xi32>
    %c0_44 = arith.constant 0 : index
    %c0_45 = arith.constant 0 : index
    %813 = tpu.strided_load %arg8[%c0_44, %c0_45] {strides = array<i32: 2, 1>} : memref<64x16xf32, #tpu.memory_space<vmem>>, vector<8x16xf32>
    %c1_46 = arith.constant 1 : index
    %c0_47 = arith.constant 0 : index
    %814 = tpu.strided_load %arg8[%c1_46, %c0_47] {strides = array<i32: 2, 1>} : memref<64x16xf32, #tpu.memory_space<vmem>>, vector<8x16xf32>
    %c16_48 = arith.constant 16 : index
    %c0_49 = arith.constant 0 : index
    %815 = tpu.strided_load %arg8[%c16_48, %c0_49] {strides = array<i32: 2, 1>} : memref<64x16xf32, #tpu.memory_space<vmem>>, vector<8x16xf32>
    %c17_50 = arith.constant 17 : index
    %c0_51 = arith.constant 0 : index
    %816 = tpu.strided_load %arg8[%c17_50, %c0_51] {strides = array<i32: 2, 1>} : memref<64x16xf32, #tpu.memory_space<vmem>>, vector<8x16xf32>
    %c32_52 = arith.constant 32 : index
    %c0_53 = arith.constant 0 : index
    %817 = tpu.strided_load %arg8[%c32_52, %c0_53] {strides = array<i32: 2, 1>} : memref<64x16xf32, #tpu.memory_space<vmem>>, vector<8x16xf32>
    %c33_54 = arith.constant 33 : index
    %c0_55 = arith.constant 0 : index
    %818 = tpu.strided_load %arg8[%c33_54, %c0_55] {strides = array<i32: 2, 1>} : memref<64x16xf32, #tpu.memory_space<vmem>>, vector<8x16xf32>
    %c48_56 = arith.constant 48 : index
    %c0_57 = arith.constant 0 : index
    %819 = tpu.strided_load %arg8[%c48_56, %c0_57] {strides = array<i32: 2, 1>} : memref<64x16xf32, #tpu.memory_space<vmem>>, vector<8x16xf32>
    %c49_58 = arith.constant 49 : index
    %c0_59 = arith.constant 0 : index
    %820 = tpu.strided_load %arg8[%c49_58, %c0_59] {strides = array<i32: 2, 1>} : memref<64x16xf32, #tpu.memory_space<vmem>>, vector<8x16xf32>
    %c0_60 = arith.constant 0 : index
    %821 = memref.load %arg5[%c0_60] : memref<4xf32, #tpu.memory_space<smem>>
    %cst_61 = arith.constant 0.000000e+00 : f32
    %822 = vector.broadcast %821 : f32 to vector<8x16xf32>
    %823 = vector.broadcast %cst_61 : f32 to vector<8x16xf32>
    %824 = arith.select %812, %822, %823 : vector<8x16xi1>, vector<8x16xf32>
    %c0_62 = arith.constant 0 : index
    %825 = memref.load %arg4[%c0_62] : memref<64xf32, #tpu.memory_space<smem>>
    %c4_63 = arith.constant 4 : index
    %826 = memref.load %arg4[%c4_63] : memref<64xf32, #tpu.memory_space<smem>>
    %827 = vector.broadcast %825 : f32 to vector<8x16xf32>
    %828 = vector.broadcast %826 : f32 to vector<8x16xf32>
    %829 = arith.select %812, %827, %828 : vector<8x16xi1>, vector<8x16xf32>
    %830 = arith.mulf %829, %813 : vector<8x16xf32>
    %831 = arith.addf %824, %830 : vector<8x16xf32>
    %c8_64 = arith.constant 8 : index
    %832 = memref.load %arg4[%c8_64] : memref<64xf32, #tpu.memory_space<smem>>
    %c12_65 = arith.constant 12 : index
    %833 = memref.load %arg4[%c12_65] : memref<64xf32, #tpu.memory_space<smem>>
    %834 = vector.broadcast %832 : f32 to vector<8x16xf32>
    %835 = vector.broadcast %833 : f32 to vector<8x16xf32>
    %836 = arith.select %812, %834, %835 : vector<8x16xi1>, vector<8x16xf32>
    %837 = arith.mulf %836, %814 : vector<8x16xf32>
    %838 = arith.addf %831, %837 : vector<8x16xf32>
    %c16_66 = arith.constant 16 : index
    %839 = memref.load %arg4[%c16_66] : memref<64xf32, #tpu.memory_space<smem>>
    %c20_67 = arith.constant 20 : index
    %840 = memref.load %arg4[%c20_67] : memref<64xf32, #tpu.memory_space<smem>>
    %841 = vector.broadcast %839 : f32 to vector<8x16xf32>
    %842 = vector.broadcast %840 : f32 to vector<8x16xf32>
    %843 = arith.select %812, %841, %842 : vector<8x16xi1>, vector<8x16xf32>
    %844 = arith.mulf %843, %815 : vector<8x16xf32>
    %845 = arith.addf %838, %844 : vector<8x16xf32>
    %c24_68 = arith.constant 24 : index
    %846 = memref.load %arg4[%c24_68] : memref<64xf32, #tpu.memory_space<smem>>
    %c28_69 = arith.constant 28 : index
    %847 = memref.load %arg4[%c28_69] : memref<64xf32, #tpu.memory_space<smem>>
    %848 = vector.broadcast %846 : f32 to vector<8x16xf32>
    %849 = vector.broadcast %847 : f32 to vector<8x16xf32>
    %850 = arith.select %812, %848, %849 : vector<8x16xi1>, vector<8x16xf32>
    %851 = arith.mulf %850, %816 : vector<8x16xf32>
    %852 = arith.addf %845, %851 : vector<8x16xf32>
    %c32_70 = arith.constant 32 : index
    %853 = memref.load %arg4[%c32_70] : memref<64xf32, #tpu.memory_space<smem>>
    %c36_71 = arith.constant 36 : index
    %854 = memref.load %arg4[%c36_71] : memref<64xf32, #tpu.memory_space<smem>>
    %855 = vector.broadcast %853 : f32 to vector<8x16xf32>
    %856 = vector.broadcast %854 : f32 to vector<8x16xf32>
    %857 = arith.select %812, %855, %856 : vector<8x16xi1>, vector<8x16xf32>
    %858 = arith.mulf %857, %817 : vector<8x16xf32>
    %859 = arith.addf %852, %858 : vector<8x16xf32>
    %c40_72 = arith.constant 40 : index
    %860 = memref.load %arg4[%c40_72] : memref<64xf32, #tpu.memory_space<smem>>
    %c44_73 = arith.constant 44 : index
    %861 = memref.load %arg4[%c44_73] : memref<64xf32, #tpu.memory_space<smem>>
    %862 = vector.broadcast %860 : f32 to vector<8x16xf32>
    %863 = vector.broadcast %861 : f32 to vector<8x16xf32>
    %864 = arith.select %812, %862, %863 : vector<8x16xi1>, vector<8x16xf32>
    %865 = arith.mulf %864, %818 : vector<8x16xf32>
    %866 = arith.addf %859, %865 : vector<8x16xf32>
    %c48_74 = arith.constant 48 : index
    %867 = memref.load %arg4[%c48_74] : memref<64xf32, #tpu.memory_space<smem>>
    %c52_75 = arith.constant 52 : index
    %868 = memref.load %arg4[%c52_75] : memref<64xf32, #tpu.memory_space<smem>>
    %869 = vector.broadcast %867 : f32 to vector<8x16xf32>
    %870 = vector.broadcast %868 : f32 to vector<8x16xf32>
    %871 = arith.select %812, %869, %870 : vector<8x16xi1>, vector<8x16xf32>
    %872 = arith.mulf %871, %819 : vector<8x16xf32>
    %873 = arith.addf %866, %872 : vector<8x16xf32>
    %c56_76 = arith.constant 56 : index
    %874 = memref.load %arg4[%c56_76] : memref<64xf32, #tpu.memory_space<smem>>
    %c60_77 = arith.constant 60 : index
    %875 = memref.load %arg4[%c60_77] : memref<64xf32, #tpu.memory_space<smem>>
    %876 = vector.broadcast %874 : f32 to vector<8x16xf32>
    %877 = vector.broadcast %875 : f32 to vector<8x16xf32>
    %878 = arith.select %812, %876, %877 : vector<8x16xi1>, vector<8x16xf32>
    %879 = arith.mulf %878, %820 : vector<8x16xf32>
    %880 = arith.addf %873, %879 : vector<8x16xf32>
    %c1_78 = arith.constant 1 : index
    %881 = memref.load %arg5[%c1_78] : memref<4xf32, #tpu.memory_space<smem>>
    %cst_79 = arith.constant 0.000000e+00 : f32
    %882 = vector.broadcast %881 : f32 to vector<8x16xf32>
    %883 = vector.broadcast %cst_79 : f32 to vector<8x16xf32>
    %884 = arith.select %812, %882, %883 : vector<8x16xi1>, vector<8x16xf32>
    %c1_80 = arith.constant 1 : index
    %885 = memref.load %arg4[%c1_80] : memref<64xf32, #tpu.memory_space<smem>>
    %c5_81 = arith.constant 5 : index
    %886 = memref.load %arg4[%c5_81] : memref<64xf32, #tpu.memory_space<smem>>
    %887 = vector.broadcast %885 : f32 to vector<8x16xf32>
    %888 = vector.broadcast %886 : f32 to vector<8x16xf32>
    %889 = arith.select %812, %887, %888 : vector<8x16xi1>, vector<8x16xf32>
    %890 = arith.mulf %889, %813 : vector<8x16xf32>
    %891 = arith.addf %884, %890 : vector<8x16xf32>
    %c9_82 = arith.constant 9 : index
    %892 = memref.load %arg4[%c9_82] : memref<64xf32, #tpu.memory_space<smem>>
    %c13_83 = arith.constant 13 : index
    %893 = memref.load %arg4[%c13_83] : memref<64xf32, #tpu.memory_space<smem>>
    %894 = vector.broadcast %892 : f32 to vector<8x16xf32>
    %895 = vector.broadcast %893 : f32 to vector<8x16xf32>
    %896 = arith.select %812, %894, %895 : vector<8x16xi1>, vector<8x16xf32>
    %897 = arith.mulf %896, %814 : vector<8x16xf32>
    %898 = arith.addf %891, %897 : vector<8x16xf32>
    %c17_84 = arith.constant 17 : index
    %899 = memref.load %arg4[%c17_84] : memref<64xf32, #tpu.memory_space<smem>>
    %c21_85 = arith.constant 21 : index
    %900 = memref.load %arg4[%c21_85] : memref<64xf32, #tpu.memory_space<smem>>
    %901 = vector.broadcast %899 : f32 to vector<8x16xf32>
    %902 = vector.broadcast %900 : f32 to vector<8x16xf32>
    %903 = arith.select %812, %901, %902 : vector<8x16xi1>, vector<8x16xf32>
    %904 = arith.mulf %903, %815 : vector<8x16xf32>
    %905 = arith.addf %898, %904 : vector<8x16xf32>
    %c25_86 = arith.constant 25 : index
    %906 = memref.load %arg4[%c25_86] : memref<64xf32, #tpu.memory_space<smem>>
    %c29_87 = arith.constant 29 : index
    %907 = memref.load %arg4[%c29_87] : memref<64xf32, #tpu.memory_space<smem>>
    %908 = vector.broadcast %906 : f32 to vector<8x16xf32>
    %909 = vector.broadcast %907 : f32 to vector<8x16xf32>
    %910 = arith.select %812, %908, %909 : vector<8x16xi1>, vector<8x16xf32>
    %911 = arith.mulf %910, %816 : vector<8x16xf32>
    %912 = arith.addf %905, %911 : vector<8x16xf32>
    %c33_88 = arith.constant 33 : index
    %913 = memref.load %arg4[%c33_88] : memref<64xf32, #tpu.memory_space<smem>>
    %c37_89 = arith.constant 37 : index
    %914 = memref.load %arg4[%c37_89] : memref<64xf32, #tpu.memory_space<smem>>
    %915 = vector.broadcast %913 : f32 to vector<8x16xf32>
    %916 = vector.broadcast %914 : f32 to vector<8x16xf32>
    %917 = arith.select %812, %915, %916 : vector<8x16xi1>, vector<8x16xf32>
    %918 = arith.mulf %917, %817 : vector<8x16xf32>
    %919 = arith.addf %912, %918 : vector<8x16xf32>
    %c41_90 = arith.constant 41 : index
    %920 = memref.load %arg4[%c41_90] : memref<64xf32, #tpu.memory_space<smem>>
    %c45_91 = arith.constant 45 : index
    %921 = memref.load %arg4[%c45_91] : memref<64xf32, #tpu.memory_space<smem>>
    %922 = vector.broadcast %920 : f32 to vector<8x16xf32>
    %923 = vector.broadcast %921 : f32 to vector<8x16xf32>
    %924 = arith.select %812, %922, %923 : vector<8x16xi1>, vector<8x16xf32>
    %925 = arith.mulf %924, %818 : vector<8x16xf32>
    %926 = arith.addf %919, %925 : vector<8x16xf32>
    %c49_92 = arith.constant 49 : index
    %927 = memref.load %arg4[%c49_92] : memref<64xf32, #tpu.memory_space<smem>>
    %c53_93 = arith.constant 53 : index
    %928 = memref.load %arg4[%c53_93] : memref<64xf32, #tpu.memory_space<smem>>
    %929 = vector.broadcast %927 : f32 to vector<8x16xf32>
    %930 = vector.broadcast %928 : f32 to vector<8x16xf32>
    %931 = arith.select %812, %929, %930 : vector<8x16xi1>, vector<8x16xf32>
    %932 = arith.mulf %931, %819 : vector<8x16xf32>
    %933 = arith.addf %926, %932 : vector<8x16xf32>
    %c57_94 = arith.constant 57 : index
    %934 = memref.load %arg4[%c57_94] : memref<64xf32, #tpu.memory_space<smem>>
    %c61_95 = arith.constant 61 : index
    %935 = memref.load %arg4[%c61_95] : memref<64xf32, #tpu.memory_space<smem>>
    %936 = vector.broadcast %934 : f32 to vector<8x16xf32>
    %937 = vector.broadcast %935 : f32 to vector<8x16xf32>
    %938 = arith.select %812, %936, %937 : vector<8x16xi1>, vector<8x16xf32>
    %939 = arith.mulf %938, %820 : vector<8x16xf32>
    %940 = arith.addf %933, %939 : vector<8x16xf32>
    %c2_96 = arith.constant 2 : index
    %941 = memref.load %arg5[%c2_96] : memref<4xf32, #tpu.memory_space<smem>>
    %cst_97 = arith.constant 0.000000e+00 : f32
    %942 = vector.broadcast %941 : f32 to vector<8x16xf32>
    %943 = vector.broadcast %cst_97 : f32 to vector<8x16xf32>
    %944 = arith.select %812, %942, %943 : vector<8x16xi1>, vector<8x16xf32>
    %c2_98 = arith.constant 2 : index
    %945 = memref.load %arg4[%c2_98] : memref<64xf32, #tpu.memory_space<smem>>
    %c6_99 = arith.constant 6 : index
    %946 = memref.load %arg4[%c6_99] : memref<64xf32, #tpu.memory_space<smem>>
    %947 = vector.broadcast %945 : f32 to vector<8x16xf32>
    %948 = vector.broadcast %946 : f32 to vector<8x16xf32>
    %949 = arith.select %812, %947, %948 : vector<8x16xi1>, vector<8x16xf32>
    %950 = arith.mulf %949, %813 : vector<8x16xf32>
    %951 = arith.addf %944, %950 : vector<8x16xf32>
    %c10_100 = arith.constant 10 : index
    %952 = memref.load %arg4[%c10_100] : memref<64xf32, #tpu.memory_space<smem>>
    %c14_101 = arith.constant 14 : index
    %953 = memref.load %arg4[%c14_101] : memref<64xf32, #tpu.memory_space<smem>>
    %954 = vector.broadcast %952 : f32 to vector<8x16xf32>
    %955 = vector.broadcast %953 : f32 to vector<8x16xf32>
    %956 = arith.select %812, %954, %955 : vector<8x16xi1>, vector<8x16xf32>
    %957 = arith.mulf %956, %814 : vector<8x16xf32>
    %958 = arith.addf %951, %957 : vector<8x16xf32>
    %c18_102 = arith.constant 18 : index
    %959 = memref.load %arg4[%c18_102] : memref<64xf32, #tpu.memory_space<smem>>
    %c22_103 = arith.constant 22 : index
    %960 = memref.load %arg4[%c22_103] : memref<64xf32, #tpu.memory_space<smem>>
    %961 = vector.broadcast %959 : f32 to vector<8x16xf32>
    %962 = vector.broadcast %960 : f32 to vector<8x16xf32>
    %963 = arith.select %812, %961, %962 : vector<8x16xi1>, vector<8x16xf32>
    %964 = arith.mulf %963, %815 : vector<8x16xf32>
    %965 = arith.addf %958, %964 : vector<8x16xf32>
    %c26_104 = arith.constant 26 : index
    %966 = memref.load %arg4[%c26_104] : memref<64xf32, #tpu.memory_space<smem>>
    %c30_105 = arith.constant 30 : index
    %967 = memref.load %arg4[%c30_105] : memref<64xf32, #tpu.memory_space<smem>>
    %968 = vector.broadcast %966 : f32 to vector<8x16xf32>
    %969 = vector.broadcast %967 : f32 to vector<8x16xf32>
    %970 = arith.select %812, %968, %969 : vector<8x16xi1>, vector<8x16xf32>
    %971 = arith.mulf %970, %816 : vector<8x16xf32>
    %972 = arith.addf %965, %971 : vector<8x16xf32>
    %c34_106 = arith.constant 34 : index
    %973 = memref.load %arg4[%c34_106] : memref<64xf32, #tpu.memory_space<smem>>
    %c38_107 = arith.constant 38 : index
    %974 = memref.load %arg4[%c38_107] : memref<64xf32, #tpu.memory_space<smem>>
    %975 = vector.broadcast %973 : f32 to vector<8x16xf32>
    %976 = vector.broadcast %974 : f32 to vector<8x16xf32>
    %977 = arith.select %812, %975, %976 : vector<8x16xi1>, vector<8x16xf32>
    %978 = arith.mulf %977, %817 : vector<8x16xf32>
    %979 = arith.addf %972, %978 : vector<8x16xf32>
    %c42_108 = arith.constant 42 : index
    %980 = memref.load %arg4[%c42_108] : memref<64xf32, #tpu.memory_space<smem>>
    %c46_109 = arith.constant 46 : index
    %981 = memref.load %arg4[%c46_109] : memref<64xf32, #tpu.memory_space<smem>>
    %982 = vector.broadcast %980 : f32 to vector<8x16xf32>
    %983 = vector.broadcast %981 : f32 to vector<8x16xf32>
    %984 = arith.select %812, %982, %983 : vector<8x16xi1>, vector<8x16xf32>
    %985 = arith.mulf %984, %818 : vector<8x16xf32>
    %986 = arith.addf %979, %985 : vector<8x16xf32>
    %c50_110 = arith.constant 50 : index
    %987 = memref.load %arg4[%c50_110] : memref<64xf32, #tpu.memory_space<smem>>
    %c54_111 = arith.constant 54 : index
    %988 = memref.load %arg4[%c54_111] : memref<64xf32, #tpu.memory_space<smem>>
    %989 = vector.broadcast %987 : f32 to vector<8x16xf32>
    %990 = vector.broadcast %988 : f32 to vector<8x16xf32>
    %991 = arith.select %812, %989, %990 : vector<8x16xi1>, vector<8x16xf32>
    %992 = arith.mulf %991, %819 : vector<8x16xf32>
    %993 = arith.addf %986, %992 : vector<8x16xf32>
    %c58_112 = arith.constant 58 : index
    %994 = memref.load %arg4[%c58_112] : memref<64xf32, #tpu.memory_space<smem>>
    %c62_113 = arith.constant 62 : index
    %995 = memref.load %arg4[%c62_113] : memref<64xf32, #tpu.memory_space<smem>>
    %996 = vector.broadcast %994 : f32 to vector<8x16xf32>
    %997 = vector.broadcast %995 : f32 to vector<8x16xf32>
    %998 = arith.select %812, %996, %997 : vector<8x16xi1>, vector<8x16xf32>
    %999 = arith.mulf %998, %820 : vector<8x16xf32>
    %1000 = arith.addf %993, %999 : vector<8x16xf32>
    %c3_114 = arith.constant 3 : index
    %1001 = memref.load %arg5[%c3_114] : memref<4xf32, #tpu.memory_space<smem>>
    %cst_115 = arith.constant 0.000000e+00 : f32
    %1002 = vector.broadcast %1001 : f32 to vector<8x16xf32>
    %1003 = vector.broadcast %cst_115 : f32 to vector<8x16xf32>
    %1004 = arith.select %812, %1002, %1003 : vector<8x16xi1>, vector<8x16xf32>
    %c3_116 = arith.constant 3 : index
    %1005 = memref.load %arg4[%c3_116] : memref<64xf32, #tpu.memory_space<smem>>
    %c7_117 = arith.constant 7 : index
    %1006 = memref.load %arg4[%c7_117] : memref<64xf32, #tpu.memory_space<smem>>
    %1007 = vector.broadcast %1005 : f32 to vector<8x16xf32>
    %1008 = vector.broadcast %1006 : f32 to vector<8x16xf32>
    %1009 = arith.select %812, %1007, %1008 : vector<8x16xi1>, vector<8x16xf32>
    %1010 = arith.mulf %1009, %813 : vector<8x16xf32>
    %1011 = arith.addf %1004, %1010 : vector<8x16xf32>
    %c11_118 = arith.constant 11 : index
    %1012 = memref.load %arg4[%c11_118] : memref<64xf32, #tpu.memory_space<smem>>
    %c15_119 = arith.constant 15 : index
    %1013 = memref.load %arg4[%c15_119] : memref<64xf32, #tpu.memory_space<smem>>
    %1014 = vector.broadcast %1012 : f32 to vector<8x16xf32>
    %1015 = vector.broadcast %1013 : f32 to vector<8x16xf32>
    %1016 = arith.select %812, %1014, %1015 : vector<8x16xi1>, vector<8x16xf32>
    %1017 = arith.mulf %1016, %814 : vector<8x16xf32>
    %1018 = arith.addf %1011, %1017 : vector<8x16xf32>
    %c19_120 = arith.constant 19 : index
    %1019 = memref.load %arg4[%c19_120] : memref<64xf32, #tpu.memory_space<smem>>
    %c23_121 = arith.constant 23 : index
    %1020 = memref.load %arg4[%c23_121] : memref<64xf32, #tpu.memory_space<smem>>
    %1021 = vector.broadcast %1019 : f32 to vector<8x16xf32>
    %1022 = vector.broadcast %1020 : f32 to vector<8x16xf32>
    %1023 = arith.select %812, %1021, %1022 : vector<8x16xi1>, vector<8x16xf32>
    %1024 = arith.mulf %1023, %815 : vector<8x16xf32>
    %1025 = arith.addf %1018, %1024 : vector<8x16xf32>
    %c27_122 = arith.constant 27 : index
    %1026 = memref.load %arg4[%c27_122] : memref<64xf32, #tpu.memory_space<smem>>
    %c31_123 = arith.constant 31 : index
    %1027 = memref.load %arg4[%c31_123] : memref<64xf32, #tpu.memory_space<smem>>
    %1028 = vector.broadcast %1026 : f32 to vector<8x16xf32>
    %1029 = vector.broadcast %1027 : f32 to vector<8x16xf32>
    %1030 = arith.select %812, %1028, %1029 : vector<8x16xi1>, vector<8x16xf32>
    %1031 = arith.mulf %1030, %816 : vector<8x16xf32>
    %1032 = arith.addf %1025, %1031 : vector<8x16xf32>
    %c35_124 = arith.constant 35 : index
    %1033 = memref.load %arg4[%c35_124] : memref<64xf32, #tpu.memory_space<smem>>
    %c39_125 = arith.constant 39 : index
    %1034 = memref.load %arg4[%c39_125] : memref<64xf32, #tpu.memory_space<smem>>
    %1035 = vector.broadcast %1033 : f32 to vector<8x16xf32>
    %1036 = vector.broadcast %1034 : f32 to vector<8x16xf32>
    %1037 = arith.select %812, %1035, %1036 : vector<8x16xi1>, vector<8x16xf32>
    %1038 = arith.mulf %1037, %817 : vector<8x16xf32>
    %1039 = arith.addf %1032, %1038 : vector<8x16xf32>
    %c43_126 = arith.constant 43 : index
    %1040 = memref.load %arg4[%c43_126] : memref<64xf32, #tpu.memory_space<smem>>
    %c47_127 = arith.constant 47 : index
    %1041 = memref.load %arg4[%c47_127] : memref<64xf32, #tpu.memory_space<smem>>
    %1042 = vector.broadcast %1040 : f32 to vector<8x16xf32>
    %1043 = vector.broadcast %1041 : f32 to vector<8x16xf32>
    %1044 = arith.select %812, %1042, %1043 : vector<8x16xi1>, vector<8x16xf32>
    %1045 = arith.mulf %1044, %818 : vector<8x16xf32>
    %1046 = arith.addf %1039, %1045 : vector<8x16xf32>
    %c51_128 = arith.constant 51 : index
    %1047 = memref.load %arg4[%c51_128] : memref<64xf32, #tpu.memory_space<smem>>
    %c55_129 = arith.constant 55 : index
    %1048 = memref.load %arg4[%c55_129] : memref<64xf32, #tpu.memory_space<smem>>
    %1049 = vector.broadcast %1047 : f32 to vector<8x16xf32>
    %1050 = vector.broadcast %1048 : f32 to vector<8x16xf32>
    %1051 = arith.select %812, %1049, %1050 : vector<8x16xi1>, vector<8x16xf32>
    %1052 = arith.mulf %1051, %819 : vector<8x16xf32>
    %1053 = arith.addf %1046, %1052 : vector<8x16xf32>
    %c59_130 = arith.constant 59 : index
    %1054 = memref.load %arg4[%c59_130] : memref<64xf32, #tpu.memory_space<smem>>
    %c63_131 = arith.constant 63 : index
    %1055 = memref.load %arg4[%c63_131] : memref<64xf32, #tpu.memory_space<smem>>
    %1056 = vector.broadcast %1054 : f32 to vector<8x16xf32>
    %1057 = vector.broadcast %1055 : f32 to vector<8x16xf32>
    %1058 = arith.select %812, %1056, %1057 : vector<8x16xi1>, vector<8x16xf32>
    %1059 = arith.mulf %1058, %820 : vector<8x16xf32>
    %1060 = arith.addf %1053, %1059 : vector<8x16xf32>
    %1061 = tpu.concatenate %880, %940, %1000, %1060 in 0 : vector<8x16xf32>, vector<8x16xf32>, vector<8x16xf32>, vector<8x16xf32> -> vector<32x16xf32>
    %c0_132 = arith.constant 0 : index
    %c0_133 = arith.constant 0 : index
    %1062 = vector.load %arg6[%c0_132, %c0_133] : memref<16x8xf32, #tpu.memory_space<vmem>>, vector<16x8xf32>
    %1063 = arith.truncf %1061 : vector<32x16xf32> to vector<32x16xbf16>
    %1064 = arith.extf %1063 : vector<32x16xbf16> to vector<32x16xf32>
    %1065 = arith.subf %1061, %1064 : vector<32x16xf32>
    %cst_134 = arith.constant dense<0.000000e+00> : vector<32x8xf32>
    %1066 = tpu.matmul %1064, %1062, %cst_134 {dimension_numbers = #tpu.dot_dimension_numbers<[1], [0], [0], [1], [0, 0, 1, 1], [], []>} : vector<32x16xf32>, vector<16x8xf32>, vector<32x8xf32> -> vector<32x8xf32>
    %cst_135 = arith.constant dense<0.000000e+00> : vector<32x8xf32>
    %1067 = tpu.matmul %1065, %1062, %cst_135 {dimension_numbers = #tpu.dot_dimension_numbers<[1], [0], [0], [1], [0, 0, 1, 1], [], []>} : vector<32x16xf32>, vector<16x8xf32>, vector<32x8xf32> -> vector<32x8xf32>
    %1068 = arith.addf %1066, %1067 : vector<32x8xf32>
    %cst_136 = arith.constant 0.000000e+00 : f32
    %1069 = vector.broadcast %cst_136 : f32 to vector<32x8xf32>
    %1070 = arith.maximumf %1068, %1069 : vector<32x8xf32>
    %c0_137 = arith.constant 0 : index
    %c0_138 = arith.constant 0 : index
    %c0_139 = arith.constant 0 : index
    %1071 = vector.load %arg7[%c0_137, %c0_138, %c0_139] : memref<1x32x8xf32, #tpu.memory_space<vmem>>, vector<1x32x8xf32>
    %1072 = vector.shape_cast %1071 : vector<1x32x8xf32> to vector<32x8xf32>
    %1073 = vector.shape_cast %1070 : vector<32x8xf32> to vector<1x32x8xf32>
    tpu.vector_store %arg7[%c0_137, %c0_138, %c0_139], %1073 {strides = array<i32>} : memref<1x32x8xf32, #tpu.memory_space<vmem>>, vector<1x32x8xf32>,
    return
  }
  func.func @transform_0(%arg0: i32) -> (i32, i32, i32) {
    %c0_i32 = arith.constant 0 : i32
    %c0_i32_0 = arith.constant 0 : i32
    %c0_i32_1 = arith.constant 0 : i32
    return %arg0, %c0_i32, %c0_i32_0 : i32, i32, i32
  }
  func.func @transform_1(%arg0: i32) -> i32 {
    %c0_i32 = arith.constant 0 : i32
    %c0_i32_0 = arith.constant 0 : i32
    return %c0_i32 : i32
  }
  func.func @transform_2(%arg0: i32) -> i32 {
    %c0_i32 = arith.constant 0 : i32
    %c0_i32_0 = arith.constant 0 : i32
    return %c0_i32 : i32
  }
  func.func @transform_3(%arg0: i32) -> i32 {
    %c0_i32 = arith.constant 0 : i32
    %c0_i32_0 = arith.constant 0 : i32
    return %c0_i32 : i32
  }
  func.func @transform_4(%arg0: i32) -> i32 {
    %c0_i32 = arith.constant 0 : i32
    %c0_i32_0 = arith.constant 0 : i32
    return %c0_i32 : i32
  }
  func.func @transform_5(%arg0: i32) -> (i32, i32) {
    %c0_i32 = arith.constant 0 : i32
    %c0_i32_0 = arith.constant 0 : i32
    %c0_i32_1 = arith.constant 0 : i32
    return %c0_i32, %c0_i32_0 : i32, i32
  }
  func.func @transform_6(%arg0: i32) -> (i32, i32, i32) {
    %c0_i32 = arith.constant 0 : i32
    %c0_i32_0 = arith.constant 0 : i32
    %c0_i32_1 = arith.constant 0 : i32
    return %arg0, %c0_i32, %c0_i32_0 : i32, i32, i32
  }
}

</mosaic_0001>

<bundles_post_ra>
// kernel: downsample_forward.1
= control target key start
LH: loop header
LB: loop body
LE: loop exit
PB: predicated region body
PF: predicated region fallthrough
CT: control target
= control target key end

     0   :  { %s5363_s0 = inlined_call_operand.vmem [shape: f32[2,64,16], index: 0, kind: input, shape index: {}]   ;;  %s5364_s1 = inlined_call_operand.vmem [shape: f32[144], index: 1, kind: input, shape index: {}]   ;;  %s5365_s2 = inlined_call_operand.vmem [shape: f32[4], index: 2, kind: input, shape index: {}]   ;;  %s5366_s3 = inlined_call_operand.vmem [shape: f32[64], index: 3, kind: input, shape index: {}]   ;;  %s5367_s4 = inlined_call_operand.vmem [shape: f32[4], index: 4, kind: input, shape index: {}]   ;;  %s5368_s5 = inlined_call_operand.vmem [shape: f32[16,8], index: 5, kind: input, shape index: {}]   ;;  %s5369_s6 = inlined_call_operand.hbm [shape: f32[2,32,8], index: 6, kind: output, shape index: {}]  }
   0x1   :  { %5546 = sst [smem:[#allocation267_spill]] %s5363_s0 }
   0x2   :  { %5547 = sst [smem:[#allocation268_spill]] %s5364_s1 }
   0x3   :  { %5548 = sst [smem:[#allocation269_spill]] %s5365_s2 }
   0x4   :  { %5549 = sst [smem:[#allocation270_spill]] %s5366_s3 }
   0x5   :  { %5550 = sst [smem:[#allocation271_spill]] %s5367_s4 }
   0x6   :  { %5551 = sst [smem:[#allocation272_spill]] %s5368_s5 }
   0x7   :  { %5552 = sst [smem:[#allocation273_spill]] %s5369_s6 }
   0x8   :  { %11 = vsyncpa [#allocation5], 0 }
   0x9   :  { %12 = vsyncpa [#allocation7], 0 }
   0xa   :  { %13 = vsyncpa [#allocation10], 0 }
   0xb   :  { %14 = vsyncpa [#allocation4], 0 }
   0xc   :  { %16 = vsyncpa [#allocation4 + $0x1], 0  ;;  %s2686_s21 = smov 0   ;;  %s2688_s22 = smov 0  }
   0xd   :  { %s2690_s23 = smov 0   ;;  %s2692_s24 = smov 0  }
   0xe LB: > { %5553 = sst [smem:[#allocation16_spill]] %s2628_s21  ;;  %s2707_s25 = sadd.s32 4294967295, %s2640_s24   ;;  %s2640_s24 = sphi %s2692_s24, %s6420_s24   ;;  %s2636_s23 = sphi %s2690_s23, %s6423_s23   ;;  %s2632_s22 = sphi %s2688_s22, %s6422_s22   ;;  %s2628_s21 = sphi %s2686_s21, %s6421_s21  }
   0xf   : > { %5554 = sst [smem:[#allocation17_spill]] %s2632_s22  ;;  %s2142_s26 = sadd.s32 4294967294, %s2640_s24  }
  0x10   : > { %5555 = sst [smem:[#allocation18_spill]] %s2636_s23  ;;  %s2711_s27 = sadd.s32 1, %s2640_s24  }
  0x11   : > { %5556 = sst [smem:[#allocation19_spill]] %s2640_s24  ;;  %s160_s28 = sadd.s32 1, %s2636_s23 }
  0x12   : > { %5557 = sst [smem:[#allocation20_spill]] %s2707_s25  ;;  %s157_s29 = ssub.s32 %s2640_s24, %s2711_s27 }
  0x13   : > { %5558 = sst [smem:[#allocation21_spill]] %s2711_s27  ;;  %p170_p0 = scmp.ne.s32.totalorder %s2636_s23, %s2632_s22 }
  0x14   : > { %p158_p1 = scmp.eq.s32.totalorder %s157_s29, 0  ;;  %p171_p2 = scmp.eq.s32.totalorder %s2707_s25, 1 }
  0x15   : > { %p176_p3 = scmp.ne.s32.totalorder %s2632_s22, %s2628_s21  ;;  %p177_p4 = scmp.eq.s32.totalorder %s2142_s26, 1 }
  0x16   : > { %s2722_s30 = scalar_select %p158_p1, %s2636_s23, %s160_s28  }
  0x17   : > { %p2724_p5 = por %p171_p2, %p170_p0  ;;  %p2728_p6 = por %p177_p4, %p176_p3 }
  0x18   : > { %5559 = sst [smem:[#allocation22_spill]] %s2722_s30  ;;  %p2143_p7 = scmp.ge.s32.totalorder %s2640_s24, 1 }
  0x19   : > { %s5560_s7 = scalar_select %p2724_p5, 1, 0 }
  0x1a   : > { %s5562_s8 = scalar_select %p2728_p6, 1, 0 }
  0x1b   : > { %5561 = sst [smem:[#allocation23_spill]] %s5560_s7  ;;  %p184_p8 = scmp.lt.s32.totalorder %s2640_s24, 3 }
  0x1c   : > { %5563 = sst [smem:[#allocation24_spill]] %s5562_s8  ;;  %p5370_p9 = scmp.eq.s32.totalorder %s2707_s25, 0 }
  0x1d   : > { %p2735_p10 = pnand %p2143_p7, %p184_p8  ;;  %s5565_s2 = sld [smem:[#allocation269_spill]] }
  0x1e   : > { %s5566_s1 = sld [smem:[#allocation268_spill]] }
  0x1f   : > { %s5564_s9 = scalar_select %p2735_p10, 1, 0 }
  0x20   : > { %p2434_p11 = pneg %p2735_p10  ;;  %s5568_s3 = sld [smem:[#allocation270_spill]] }
  0x21   : > { %s5569_s4 = sld [smem:[#allocation271_spill]] }
  0x22   : > { %p2749_p12 = pnand %p5370_p9, %p2434_p11 }
  0x23   : > { %s208_s12 = sshll.u32 %s5565_s2, 4  ;;  %s209_s12 = int_to_ptr.vmem [resolvable:$true] %s208_s12 }
  0x24   : > { %s197_s15 = sshll.u32 %s5566_s1, 4  ;;  %s2508_s29 = scalar_lea.vmem %s209_s12, 16  ;;  %s198_s15 = int_to_ptr.vmem [resolvable:$true] %s197_s15 }
  0x25   : > { %p2509_p13 = scmp.ne.s32.totalorder %s209_s12, %s2508_s29  ;;  %p2510_p0 = pneg %p2749_p12 }
  0x26   : > { %s219_s19 = sshll.u32 %s5568_s3, 4  ;;  %p2516_p3 = scmp.lt.s32.totalorder %s209_s12, %s209_s12  ;;  %s2756_s19 = int_to_ptr.vmem [resolvable:$true] %s219_s19 }
  0x27   : > { %s230_s28 = sshll.u32 %s5569_s4, 4  ;;  %p2511_p1 = pnand %p2510_p0, %p2509_p13  ;;  %s231_s28 = int_to_ptr.vmem [resolvable:$true] %s230_s28 }
  0x28   : > { %p2517_p4 = scmp.lt.s32.totalorder %s2508_s29, %s2508_s29 }
  0x29   : > { %p2512_p2 = pneg %p2511_p1 }
  0x2a   : > { %p2518_p7 = por %p2517_p4, %p2516_p3 }
  0x2c   : > { %p2519_p8 = pnand %p2518_p7, %p2512_p2 }
  0x2e   : > { %2522 = shalt.err (!%p2519_p8)
}
  0x2f   : > { %s2642_s10 = smov [#allocation6]   ;;  %s2523_s11 = scalar_lea.vmem %s198_s15, 32 }
  0x30   : > { %2440 = dma.vmem_to_smem (!%p2749_p12), %s209_s12, 16, %s2642_s10, [#allocation7]  }
  0x31   : > { %p2524_p11 = scmp.ne.s32.totalorder %s198_s15, %s2523_s11  ;;  %p2531_p5 = scmp.lt.s32.totalorder %s198_s15, %s198_s15 }
  0x32   : > { %p2532_p10 = scmp.lt.s32.totalorder %s2523_s11, %s2523_s11 }
  0x33   : > { %p2526_p9 = pnand %p2524_p11, %p2510_p0 }
  0x34   : > { %p2533_p13 = por %p2532_p10, %p2531_p5 }
  0x35   : > { %p2527_p6 = pneg %p2526_p9 }
  0x37   : > { %p2534_p1 = pnand %p2533_p13, %p2527_p6 }
  0x39   : > { %2537 = shalt.err (!%p2534_p1)
}
  0x3a   : > { %s2643_s13 = smov [#allocation3]   ;;  %s2538_s12 = scalar_lea.vmem %s2756_s19, 16 }
  0x3b   : > { %2437 = dma.vmem_to_smem (!%p2749_p12), %s198_s15, 32, %s2643_s13, [#allocation5]  }
  0x3c   : > { %p2539_p2 = scmp.ne.s32.totalorder %s2756_s19, %s2538_s12  ;;  %p2546_p9 = scmp.lt.s32.totalorder %s2756_s19, %s2756_s19 }
  0x3d   : > { %p2547_p7 = scmp.lt.s32.totalorder %s2538_s12, %s2538_s12 }
  0x3e   : > { %p2541_p3 = pnand %p2539_p2, %p2510_p0 }
  0x3f   : > { %p2548_p5 = por %p2547_p7, %p2546_p9 }
  0x40   : > { %p2542_p4 = pneg %p2541_p3 }
  0x42   : > { %p2549_p6 = pnand %p2548_p5, %p2542_p4 }
  0x44   : > { %2552 = shalt.err (!%p2549_p6)
}
  0x45   : > { %s2644_s14 = smov [#allocation8]   ;;  %s2553_s18 = scalar_lea.vmem %s231_s28, 16 }
  0x46   : > { %2443 = dma.vmem_to_smem (!%p2749_p12), %s2756_s19, 16, %s2644_s14, [#allocation7]  }
  0x47   : > { %p2554_p10 = scmp.ne.s32.totalorder %s231_s28, %s2553_s18  ;;  %p2561_p13 = scmp.lt.s32.totalorder %s231_s28, %s231_s28 }
  0x48   : > { %p2562_p1 = scmp.lt.s32.totalorder %s2553_s18, %s2553_s18 }
  0x49   : > { %p2556_p8 = pnand %p2554_p10, %p2510_p0 }
  0x4a   : > { %p2563_p2 = por %p2562_p1, %p2561_p13 }
  0x4b   : > { %p2557_p11 = pneg %p2556_p8 }
  0x4d   : > { %p2564_p3 = pnand %p2563_p2, %p2557_p11 }
  0x4f   : > { %2567 = shalt.err (!%p2564_p3)
}
  0x50   : > { %s2645_s20 = smov [#allocation9]   ;;  %p5570_p4 = scmp.ne.s32.totalorder %s5564_s9, 0 }
  0x51   : > { %2446 = dma.vmem_to_smem (!%p2749_p12), %s231_s28, 16, %s2645_s20, [#allocation10]  }
  0x52   : > { %254 = sbr.rel (%p5570_p4) target bundleno = 833 (0x341), region = 44 }
  0x57   : > { %p5571_p9 = scmp.eq.s32.totalorder %s2707_s25, 0 }
  0x59   : > { %2611 = dma.done.wait (%p5571_p9), [#allocation5], 32   ;;  %p5572_p7 = pmov %p5571_p9 }
  0x5b   : > { %2613 = vsyncadd (%p5572_p7), [#allocation5], 4294967264  ;;  %p5573_p0 = pmov %p5572_p7 }
  0x5d   : > { %2615 = dma.done.wait (%p5573_p0), [#allocation7], 32   ;;  %p5574_p5 = pmov %p5573_p0 }
  0x5e   : > { %p5575_p6 = pmov %p5573_p0 }
  0x5f   : > { %2617 = vsyncadd (%p5574_p5), [#allocation7], 4294967264 }
  0x60   : > { %2619 = dma.done.wait (%p5575_p6), [#allocation10], 16   ;;  %p5576_p12 = pmov %p5573_p0 }
  0x62   : > { %2621 = vsyncadd (%p5576_p12), [#allocation10], 4294967280 }
  0x63   : > { %272 = sfence }
  0x64   : > { %p297_p10 = scmp.lt.s32.totalorder %s2707_s25, 1  ;;  %s2807_s9 = sld [smem:[#allocation3 + $0x3]]  ;;  %v310_v8 = vlaneseq  ;;  %vm463_vm10 = vcmask 7168   ;;  %vm496_vm11 = vcmask 121856   ;;  %vm872_vm12 = vcmask 130048  }
  0x65   : > { %s2810_s19 = sld [smem:[#allocation3 + $0x27]]  ;;  %s2646_s14 = smov 1   ;;  %vm2020_vm14 = vcmask 64512  }
  0x66   : > { %s298_s16 = scalar_select %p297_p10, %s2707_s25, 1  ;;  %v2955_v9 = vshrl.u32 %v310_v8, 7  ;;  %v2973_v12 = vand.u32 127, %v310_v8  ;;  %v5653_v8 = vmov 0 }
  0x67   : > { %s2812_s28 = sld [smem:[#allocation3 + $0x4b]]  ;;  %s2647_s8 = smov 127  }
  0x68   : > { %s2382_s26 = sshll.u32 %s298_s16, 6  ;;  %s5580_s0 = sld [smem:[#allocation267_spill]]  ;;  %v312_v10 = vadd.s32 8, %v2955_v9  ;;  %v313_v11 = vadd.s32 16, %v2955_v9  ;;  %5631 = vst [vmem:[#allocation78_spill] sm:$0xff] %v2973_v12  ;;  %v318_v14 = vadd.s32 56, %v2955_v9 }
  0x69   : > { %s2819_s13 = sld [smem:[#allocation3 + $0x6f]]  ;;  %vm513_vm0 = vcmp.lt.s32.totalorder %v2955_v9, 1  ;;  %vm538_vm1 = vcmp.lt.s32.totalorder %v2955_v9, 7  ;;  %v323_v22 = vand.u32 15, %v2955_v9  ;;  %v315_v34 = vadd.s32 32, %v2955_v9 }
  0x6a   : > { %5577 = sst [smem:[#allocation25_spill]] %s2807_s9  ;;  %v330_v13 = vand.u32 15, %v312_v10  ;;  %v337_v19 = vand.u32 15, %v313_v11  ;;  %v372_v25 = vand.u32 15, %v318_v14  ;;  %v314_v38 = vadd.s32 24, %v2955_v9 }
  0x6b   : > { %5578 = sst [smem:[#allocation26_spill]] %s2810_s19  ;;  %vm3023_vm4 = vcmp.ne.s32.totalorder %v323_v22, 0  ;;  %v351_v47 = vand.u32 15, %v315_v34  ;;  %v317_v54 = vadd.s32 48, %v2955_v9  ;;  %v316_v58 = vadd.s32 40, %v2955_v9 }
  0x6c   : > { %s2827_s12 = sld [smem:[#allocation6]]  ;;  %vm2996_vm2 = vcmp.ne.s32.totalorder %v330_v13, 15  ;;  %vm3015_vm3 = vcmp.ne.s32.totalorder %v337_v19, 0  ;;  %vm3040_vm5 = vcmp.ne.s32.totalorder %v372_v25, 15  ;;  %v344_v53 = vand.u32 15, %v314_v38 }
  0x6d   : > { %5579 = sst [smem:[#allocation27_spill]] %s2812_s28  ;;  %vm3096_vm6 = vcmp.ne.s32.totalorder %v351_v47, 0  ;;  %v365_v11 = vand.u32 15, %v317_v54  ;;  %v358_v14 = vand.u32 15, %v316_v58  ;;  %v5664_v38 = vmov 0 }
  0x6e   : > { %s2817_s11 = scalar_lea.vmem %s5580_s0, %s2382_s26  ;;  %s2831_s17 = sld [smem:[#allocation3]]  ;;  %vm3107_vm7 = vcmp.ne.s32.totalorder %v344_v53, 15 }
  0x6f   : > { %5581 = sst [smem:[#allocation28_spill]] %s2817_s11  ;;  %v2822_v0 = vld [vmem:[%s2817_s11 + $0x8] sm:$0xff]  ;;  %v2825_v1 = vld [vmem:[%s2817_s11] sm:$0xff]  ;;  %v2834_v2 = vld [vmem:[%s2817_s11 + $0x10] sm:$0xff]  ;;  %v5654_v8 = vsel %vm3107_vm7, 4294967295, %v5653_v8  ;;  %vm3149_vm8 = vcmp.ne.s32.totalorder %v365_v11, 0 }
  0x70   : > { %5582 = sst [smem:[#allocation29_spill]] %s2819_s13  ;;  %441 = vrot.lane.b32.xlu1 %v2822_v0, %s2646_s14  ;;  %439 = vrot.lane.b32.xlu0 %v2825_v1, %s2646_s14  ;;  %v2837_v3 = vld [vmem:[%s2817_s11 + $0x38] sm:$0xff]  ;;  %v2850_v4 = vld [vmem:[%s2817_s11 + $0x20] sm:$0xff]  ;;  %v557_v15 = vrot.slane %v2834_v2, 7  ;;  %v581_v16 = vrot.slane %v2834_v2, 1  ;;  %v556_v17 = vrot.slane %v2822_v0, 7 }
  0x71   : > { %s2839_s15 = sld [smem:[#allocation3 + $0x6]]  ;;  %v2853_v5 = vld [vmem:[%s2817_s11 + $0x18] sm:$0xff]  ;;  %v2866_v6 = vld [vmem:[%s2817_s11 + $0x30] sm:$0xff]  ;;  %v2869_v7 = vld [vmem:[%s2817_s11 + $0x28] sm:$0xff]  ;;  %v580_v18 = vrot.slane %v2822_v0, 1  ;;  %v562_v26 = vrot.slane %v2837_v3, 7 }
  0x72   : > { %5583 = sst [smem:[#allocation30_spill]] %s2827_s12  ;;  %v568_v27 = vsel %vm513_vm0, %v556_v17, %v557_v15  ;;  %v586_v29 = vrot.slane %v2837_v3, 1  ;;  %v555_v30 = vrot.slane %v2825_v1, 7  ;;  %v579_v37 = vrot.slane %v2825_v1, 1  ;;  %5655 = vst [vmem:[#allocation90_spill] sm:$0xff] %v5654_v8 }
  0x73   : > { %s2841_s18 = sld [smem:[#allocation6 + $0x1]]  ;;  %v592_v28 = vsel %vm538_vm1, %v580_v18, %v581_v16  ;;  %v3034_v40 = vsel %vm3015_vm3, %v568_v27, 0.0  ;;  %v558_v46 = vrot.slane %v2853_v5, 7  ;;  %v559_v48 = vrot.slane %v2850_v4, 7 }
  0x74   : > { %5584 = sst [smem:[#allocation31_spill]] %s2831_s17  ;;  %443 = vrot.lane.b32.xlu1 %v2834_v2, %s2646_s14  ;;  %453 = vrot.lane.b32.xlu0 %v2837_v3, %s2646_s14  ;;  %v3038_v41 = vsel %vm2996_vm2, %v592_v28, 0.0  ;;  %v570_v44 = vsel %vm513_vm0, %v562_v26, %v555_v30  ;;  %v594_v45 = vsel %vm538_vm1, %v586_v29, %v579_v37  ;;  %v582_v49 = vrot.slane %v2853_v5, 1 }
  0x75   : > { %s2843_s20 = sld [smem:[#allocation3 + $0x24]]  ;;  %v583_v50 = vrot.slane %v2850_v4, 1  ;;  %v3066_v52 = vsel %vm513_vm0, %v555_v30, %v556_v17  ;;  %v3074_v56 = vsel %vm3023_vm4, %v570_v44, 0.0  ;;  %v3078_v57 = vsel %vm538_vm1, %v579_v37, %v580_v18 }
  0x76   : > { %s2847_s16 = sld [smem:[#allocation3 + $0x2a]]  ;;  %v3087_v61 = vsel %vm3040_vm5, %v594_v45, 0.0  ;;  %v3091_v62 = vsel %vm513_vm0, %v557_v15, %v558_v46  ;;  %v3115_v10 = vsel %vm538_vm1, %v581_v16, %v582_v49  ;;  %v560_v15 = vrot.slane %v2869_v7, 7 }
  0x77   : > { %5585 = sst [smem:[#allocation32_spill]] %s2839_s15  ;;  %v561_v17 = vrot.slane %v2866_v6, 7  ;;  %v584_v27 = vrot.slane %v2869_v7, 1  ;;  %v585_v28 = vrot.slane %v2866_v6, 1  ;;  %v5665_v38 = vsel %vm3149_vm8, 4294967295, %v5664_v38 }
  0x78   : > { %s2855_s26 = sld [smem:[#allocation6 + $0x2]]  ;;  %447 = vrot.lane.b32.xlu1 %v2850_v4, %s2646_s14  ;;  %445 = vrot.lane.b32.xlu0 %v2853_v5, %s2646_s14  ;;  %5666 = vst [vmem:[#allocation92_spill] sm:$0xff] %v5665_v38  ;;  %vm3157_vm9 = vcmp.ne.s32.totalorder %v358_v14, 15  ;;  %v5669_v45 = vmov 0  ;;  %v3176_v54 = vsel %vm513_vm0, %v559_v48, %v560_v15 }
  0x79   : > { %5586 = sst [smem:[#allocation33_spill]] %s2841_s18  ;;  %v5670_v45 = vsel %vm3157_vm9, 4294967295, %v5669_v45  ;;  %v3186_v11 = vsel %vm538_vm1, %v583_v50, %v584_v27  ;;  %v3310_v63 = vsel %vm513_vm0, %v561_v17, %v562_v26 }
  0x7a   : > { %s2857_s29 = sld [smem:[#allocation3 + $0x48]]  ;;  %5671 = vst [vmem:[#allocation93_spill] sm:$0xff] %v5670_v45 }
  0x7b   : > { %5587 = sst [smem:[#allocation34_spill]] %s2843_s20 }
  0x7c   : > { %5588 = sst [smem:[#allocation35_spill]] %s2847_s16  ;;  %451 = vrot.lane.b32.xlu1 %v2866_v6, %s2646_s14  ;;  %449 = vrot.lane.b32.xlu0 %v2869_v7, %s2646_s14 }
  0x7d   : > { %s2859_s10 = sld [smem:[#allocation3 + $0x4e]] }
  0x7e   : > { %5589 = sst [smem:[#allocation36_spill]] %s2855_s26 }
  0x7f   : > { %s2863_s0 = sld [smem:[#allocation6 + $0x3]] }
  0x80   : > { %5590 = sst [smem:[#allocation37_spill]] %s2857_s29  ;;  %486 = vrot.lane.b32.xlu1 %v2837_v3, %s2647_s8  ;;  %472 = vrot.lane.b32.xlu0 %v2825_v1, %s2647_s8  ;;  %v566_v1 = vsel %vm513_vm0, %v558_v46, %v559_v48  ;;  %v564_v46 = vsel %vm513_vm0, %v560_v15, %v561_v17 }
  0x81   : > { %s2871_s1 = sld [smem:[#allocation3 + $0x6c]]  ;;  %v3128_v16 = vsel %vm3096_vm6, %v566_v1, 0.0  ;;  %v3198_v15 = vsel %vm3149_vm8, %v564_v46, 0.0 }
  0x82   : > { %s2873_s2 = sld [smem:[#allocation3 + $0x72]] }
  0x83   : > { %5591 = sst [smem:[#allocation38_spill]] %s2859_s10 }
  0x84   : > { %s2875_s3 = sld [smem:[#allocation3 + $0x9]]  ;;  %476 = vrot.lane.b32.xlu1 %v2834_v2, %s2647_s8  ;;  %474 = vrot.lane.b32.xlu0 %v2822_v0, %s2647_s8 }
  0x85   : > { %5592 = sst [smem:[#allocation39_spill]] %s2863_s0 }
  0x86   : > { %s2879_s4 = sld [smem:[#allocation3 + $0xa]] }
  0x87   : > { %5593 = sst [smem:[#allocation40_spill]] %s2871_s1 }
  0x88   : > { %5594 = sst [smem:[#allocation41_spill]] %s2873_s2  ;;  %480 = vrot.lane.b32.xlu1 %v2850_v4, %s2647_s8  ;;  %478 = vrot.lane.b32.xlu0 %v2853_v5, %s2647_s8  ;;  %v590_v4 = vsel %vm538_vm1, %v582_v49, %v583_v50 }
  0x89   : > { %s2881_s30 = sld [smem:[#allocation3 + $0xc]]  ;;  %v3132_v19 = vsel %vm3107_vm7, %v590_v4, 0.0  ;;  %v588_v4 = vsel %vm538_vm1, %v584_v27, %v585_v28 }
  0x8a   : > { %5595 = sst [smem:[#allocation42_spill]] %s2875_s3 }
  0x8b   : > { %s2883_s23 = sld [smem:[#allocation3 + $0x7]] }
  0x8c   : > { %s2885_s27 = sld [smem:[#allocation3 + $0x2d]]  ;;  %484 = vrot.lane.b32.xlu1 %v2866_v6, %s2647_s8  ;;  %482 = vrot.lane.b32.xlu0 %v2869_v7, %s2647_s8  ;;  %v685_v13 = vstv %s2879_s4 }
  0x8d   : > { %s2889_s21 = sld [smem:[#allocation3 + $0x2e]]  ;;  %v3147_v37 = vmul.f32 %v685_v13, %v3034_v40 }
  0x8e   : > { %s2891_s24 = sld [smem:[#allocation3 + $0x30]] }
  0x8f   : > { %5596 = sst [smem:[#allocation43_spill]] %s2881_s30 }
  0x90   : > { %s2893_s6 = sld [smem:[#allocation3 + $0x2b]] }
  0x91   : > { %s2895_s14 = sld [smem:[#allocation3 + $0x51]]  ;;  %v823_v25 = vstv %s2883_s23 }
  0x92   : > { %5597 = sst [smem:[#allocation44_spill]] %s2885_s27  ;;  %v3169_v49 = vmul.f32 %v823_v25, %v3038_v41  ;;  %v3172_v53 = vmul.f32 %v823_v25, %v3078_v57  ;;  %v3204_v25 = vsel %vm538_vm1, %v585_v28, %v586_v29  ;;  %v3225_v28 = vsel %vm3157_vm9, %v588_v4, 0.0 }
  0x93   : > { %5598 = sst [smem:[#allocation45_spill]] %s2889_s21 }
  0x94   : > { %5599 = sst [smem:[#allocation46_spill]] %s2891_s24  ;;  %5675 = vst [vmem:[#allocation94_spill] sm:$0xff] %v3169_v49  ;;  %5676 = vst [vmem:[#allocation95_spill] sm:$0xff] %v3172_v53 }
  0x95   : > { %s2899_s7 = sld [smem:[#allocation3 + $0x52]] }
  0x96   : > { %5600 = sst [smem:[#allocation47_spill]] %s2893_s6 }
  0x97   : > { %5601 = sst [smem:[#allocation48_spill]] %s2895_s14 }
  0x98   : > { %s2901_s25 = sld [smem:[#allocation3 + $0x54]] }
  0x99   : > { %s2903_s22 = sld [smem:[#allocation3 + $0x4f]] }
  0x9a   : > { %s2905_s11 = sld [smem:[#allocation3 + $0x75]] }
  0x9b   : > { %5602 = sst [smem:[#allocation49_spill]] %s2899_s7 }
  0x9c   : > { %s2909_s5 = sld [smem:[#allocation3 + $0x76]] }
  0x9d   : > { %s2911_s24 = sld [smem:[#allocation3 + $0x78]] }
  0x9e   : > { %5603 = sst [smem:[#allocation50_spill]] %s2901_s25 }
  0x9f   : > { %5604 = sst [smem:[#allocation51_spill]] %s2903_s22 }
  0xa0   : > { %5605 = sst [smem:[#allocation52_spill]] %s2905_s11 }
  0xa1   : > { %s2913_s14 = sld [smem:[#allocation3 + $0x73]] }
  0xa2   : > { %5606 = sst [smem:[#allocation53_spill]] %s2909_s5 }
  0xa3   : > { %5607 = sst [smem:[#allocation54_spill]] %s2911_s24 }
  0xa4   : > { %s2915_s6 = sld [smem:[#allocation3 + $0x1]] }
  0xa5   : > { %s2919_s25 = sld [smem:[#allocation3 + $0x1e]] }
  0xa6   : > { %s2921_s22 = sld [smem:[#allocation3 + $0x21]] }
  0xa7   : > { %5608 = sst [smem:[#allocation55_spill]] %s2913_s14 }
  0xa8   : > { %s2923_s11 = sld [smem:[#allocation3 + $0x22]] }
  0xa9   : > { %s2925_s7 = sld [smem:[#allocation3 + $0x25]] }
  0xaa   : > { %5609 = sst [smem:[#allocation56_spill]] %s2915_s6 }
  0xab   : > { %5610 = sst [smem:[#allocation57_spill]] %s2919_s25 }
  0xac   : > { %5611 = sst [smem:[#allocation58_spill]] %s2921_s22 }
  0xad   : > { %s2927_s21 = sld [smem:[#allocation3 + $0x42]] }
  0xae   : > { %5612 = sst [smem:[#allocation59_spill]] %s2923_s11 }
  0xaf   : > { %s2929_s5 = sld [smem:[#allocation3 + $0x45]]  ;;  %v903_v60 = vstv %s2925_s7 }
  0xb0   : > { %s2931_s24 = sld [smem:[#allocation3 + $0x46]] }
  0xb1   : > { %s2933_s14 = sld [smem:[#allocation3 + $0x49]] }
  0xb2   : > { %s2935_s6 = sld [smem:[#allocation3 + $0x66]] }
  0xb3   : > { %5613 = sst [smem:[#allocation60_spill]] %s2927_s21 }
  0xb4   : > { %s2937_s27 = sld [smem:[#allocation3 + $0x69]] }
  0xb5   : > { %5614 = sst [smem:[#allocation61_spill]] %s2929_s5 }
  0xb6   : > { %5615 = sst [smem:[#allocation62_spill]] %s2931_s24 }
  0xb7   : > { %5616 = sst [smem:[#allocation63_spill]] %s2933_s14 }
  0xb8   : > { %5617 = sst [smem:[#allocation64_spill]] %s2935_s6 }
  0xb9   : > { %s2939_s8 = sld [smem:[#allocation3 + $0x6a]] }
  0xba   : > { %5618 = sst [smem:[#allocation65_spill]] %s2937_s27 }
  0xbb   : > { %s2941_s25 = sld [smem:[#allocation3 + $0x6d]] }
  0xbc   : > { %s2943_s22 = sld [smem:[#allocation3 + $0x8a]] }
  0xbd   : > { %s2945_s11 = sld [smem:[#allocation3 + $0x8d]] }
  0xbe   : > { %s2947_s21 = sld [smem:[#allocation3 + $0x8e]] }
  0xbf   : > { %5619 = sst [smem:[#allocation66_spill]] %s2939_s8 }
  0xc0   : > { %s2949_s5 = sld [smem:[#allocation3 + $0x15]] }
  0xc1   : > { %5620 = sst [smem:[#allocation67_spill]] %s2941_s25 }
  0xc2   : > { %5621 = sst [smem:[#allocation68_spill]] %s2943_s22 }
  0xc3   : > { %5622 = sst [smem:[#allocation69_spill]] %s2945_s11 }
  0xc4   : > { %5623 = sst [smem:[#allocation70_spill]] %s2947_s21 }
  0xc5   : > { %s2951_s24 = sld [smem:[#allocation3 + $0x39]] }
  0xc6   : > { %5624 = sst [smem:[#allocation71_spill]] %s2949_s5 }
  0xc7   : > { %s2953_s14 = sld [smem:[#allocation3 + $0x5d]] }
  0xc8   : > { %s2957_s27 = sld [smem:[#allocation3 + $0x81]] }
  0xc9   : > { %s2959_s8 = sld [smem:[#allocation3 + $0x12]] }
  0xca   : > { %s2961_s25 = sld [smem:[#allocation3 + $0x13]] }
  0xcb   : > { %5625 = sst [smem:[#allocation72_spill]] %s2951_s24 }
  0xcc   : > { %s2963_s22 = sld [smem:[#allocation3 + $0xf]] }
  0xcd   : > { %5626 = sst [smem:[#allocation73_spill]] %s2953_s14 }
  0xce   : > { %5627 = sst [smem:[#allocation74_spill]] %s2957_s27 }
  0xcf   : > { %5628 = sst [smem:[#allocation75_spill]] %s2959_s8 }
  0xd0   : > { %s2966_s11 = sld [smem:[#allocation3 + $0x10]]  ;;  %v691_v43 = vstv %s2961_s25 }
  0xd1   : > { %s2968_s21 = sld [smem:[#allocation3 + $0x36]]  ;;  %v3363_v32 = vmul.f32 %v691_v43, %v3128_v16 }
  0xd2   : > { %5629 = sst [smem:[#allocation76_spill]] %s2963_s22 }
  0xd3   : > { %s2971_s14 = sld [smem:[#allocation3 + $0x37]] }
  0xd4   : > { %s2975_s27 = sld [smem:[#allocation3 + $0x33]] }
  0xd5   : > { %s2978_s22 = sld [smem:[#allocation3 + $0x34]] }
  0xd6   : > { %s3011_s19 = sld [smem:[#allocation3 + $0x7e]] }
  0xd7   : > { %5630 = sst [smem:[#allocation77_spill]] %s2968_s21 }
  0xd8   : > { %s2984_s21 = sld [smem:[#allocation3 + $0x5a]] }
  0xd9   : > { %s3020_s9 = sld [smem:[#allocation3 + $0x7f]] }
  0xda   : > { %5632 = sst [smem:[#allocation79_spill]] %s2975_s27 }
  0xdb   : > { %5633 = sst [smem:[#allocation80_spill]] %s2978_s22 }
  0xdc   : > { %s2987_s27 = sld [smem:[#allocation3 + $0x5b]] }
  0xdd   : > { %s2993_s22 = sld [smem:[#allocation3 + $0x57]] }
  0xde   : > { %5634 = sst [smem:[#allocation81_spill]] %s2984_s21 }
  0xdf   : > { %s3001_s21 = sld [smem:[#allocation3 + $0x58]] }
  0xe0   : > { %5638 = sst [smem:[#allocation83_spill]] %s3011_s19 }
  0xe1   : > { %s3029_s19 = sld [smem:[#allocation3 + $0x7b]] }
  0xe2   : > { %s3044_s12 = sld [smem:[#allocation3 + $0x7c]]  ;;  %v1138_v31 = vstv %s2987_s27 }
  0xe3   : > { %5635 = sst [smem:[#allocation82_spill]] %s2993_s22 }
  0xe4   : > { %s3056_s17 = sld [smem:[#allocation3 + $0x1b]] }
  0xe5   : > { %s3061_s15 = sld [smem:[#allocation3 + $0x3f]]  ;;  %v1276_v20 = vstv %s3001_s21 }
  0xe6   : > { %s3068_s13 = sld [smem:[#allocation3 + $0x63]] }
  0xe7   : > { %5643 = sst [smem:[#allocation84_spill]] %s3029_s19 }
  0xe8   : > { %s3080_s18 = sld [smem:[#allocation3 + $0x87]] }
  0xe9   : > { %s3093_s20 = sld [smem:[#allocation3 + $0x1c]] }
  0xea   : > { %5646 = sst [smem:[#allocation85_spill]] %s3056_s17 }
  0xeb   : > { %5647 = sst [smem:[#allocation86_spill]] %s3061_s15 }
  0xec   : > { %5648 = sst [smem:[#allocation87_spill]] %s3068_s13 }
  0xed   : > { %s3104_s26 = sld [smem:[#allocation3 + $0x18]] }
  0xee   : > { %5649 = sst [smem:[#allocation88_spill]] %s3080_s18 }
  0xef   : > { %s3117_s29 = sld [smem:[#allocation3 + $0x19]]  ;;  %v697_v12 = vstv %s3093_s20 }
  0xf0   : > { %s3122_s10 = sld [smem:[#allocation3 + $0x40]] }
  0xf1   : > { %s5658_s28 = sld [smem:[#allocation45_spill]] }
  0xf2   : > { %s5660_s18 = sld [smem:[#allocation47_spill]] }
  0xf3   : > { %5652 = sst [smem:[#allocation89_spill]] %s3104_s26 }
  0xf4   : > { %s3134_s26 = sld [smem:[#allocation3 + $0x3c]] }
  0xf5   : > { %s3140_s0 = sld [smem:[#allocation3 + $0x3d]] }
  0xf6   : > { %5656 = sst [smem:[#allocation91_spill]] %s3122_s10 }
  0xf7   : > { %s5663_s13 = sld [smem:[#allocation49_spill]]  ;;  %v909_v44 = vstv %s5658_s28 }
  0xf8   : > { %s3153_s2 = sld [smem:[#allocation3 + $0x64]]  ;;  %v1047_v47 = vstv %s5660_s18  ;;  %v3194_v48 = vmul.f32 %v909_v44, %v3034_v40  ;;  %v3320_v18 = vmul.f32 %v909_v44, %v3091_v62 }
  0xf9   : > { %s5668_s23 = sld [smem:[#allocation51_spill]]  ;;  %v3211_v21 = vmul.f32 %v1047_v47, %v3038_v41  ;;  %v3214_v7 = vmul.f32 %v1047_v47, %v3078_v57 }
  0xfa   : > { %5659 = sst [smem:[#allocation45_spill]] %s3134_s26 }
  0xfb   : > { %5661 = sst [smem:[#allocation47_spill]] %s3140_s0  ;;  %5686 = vst [vmem:[#allocation96_spill] sm:$0xff] %v3211_v21  ;;  %5687 = vst [vmem:[#allocation97_spill] sm:$0xff] %v3214_v7 }
  0xfc   : > { %s3165_s3 = sld [smem:[#allocation3 + $0x60]] }
  0xfd   : > { %s5674_s26 = sld [smem:[#allocation53_spill]]  ;;  %v1132_v1 = vstv %s5663_s13 }
  0xfe   : > { %5667 = sst [smem:[#allocation49_spill]] %s3153_s2  ;;  %v3221_v29 = vmul.f32 %v1132_v1, %v3034_v40  ;;  %v3331_v6 = vmul.f32 %v1132_v1, %v3091_v62 }
  0xff   : > { %s3178_s16 = sld [smem:[#allocation3 + $0x61]]  ;;  %v1270_v14 = vstv %s5668_s23 }
 0x100   : > { %s5679_s0 = sld [smem:[#allocation55_spill]]  ;;  %v3231_v47 = vmul.f32 %v1270_v14, %v3038_v41  ;;  %v3235_v46 = vmul.f32 %v1270_v14, %v3078_v57 }
 0x101   : > { %s3188_s18 = sld [smem:[#allocation3 + $0x88]] }
 0x102   : > { %5672 = sst [smem:[#allocation51_spill]] %s3165_s3  ;;  %5694 = vst [vmem:[#allocation98_spill] sm:$0xff] %v3231_v47  ;;  %5695 = vst [vmem:[#allocation99_spill] sm:$0xff] %v3235_v46 }
 0x103   : > { %s5682_s1 = sld [smem:[#allocation56_spill]]  ;;  %v1355_v27 = vstv %s5674_s26 }
 0x104   : > { %s3206_s13 = sld [smem:[#allocation3 + $0x84]]  ;;  %v3241_v4 = vmul.f32 %v1355_v27, %v3034_v40  ;;  %v3277_v40 = vmul.f32 %v903_v60, %v3066_v52  ;;  %v3334_v26 = vmul.f32 %v1355_v27, %v3091_v62  ;;  %v829_v27 = vstv %s2966_s11 }
 0x105   : > { %5677 = sst [smem:[#allocation53_spill]] %s3178_s16 }
 0x106   : > { %s5685_s23 = sld [smem:[#allocation59_spill]]  ;;  %v1493_v30 = vstv %s5679_s0  ;;  %5719 = vst [vmem:[#allocation109_spill] sm:$0xff] %v3334_v26 }
 0x107   : > { %5680 = sst [smem:[#allocation55_spill]] %s3188_s18  ;;  %v3248_v50 = vmul.f32 %v1493_v30, %v3038_v41  ;;  %v3253_v22 = vmul.f32 %v1493_v30, %v3078_v57  ;;  %v3274_v30 = vmul.f32 %v903_v60, %v3074_v56 }
 0x108   : > { %s3216_s16 = sld [smem:[#allocation3 + $0x85]] }
 0x109   : > { %s5690_s10 = sld [smem:[#allocation62_spill]]  ;;  %v679_v58 = vstv %s5682_s1  ;;  %5700 = vst [vmem:[#allocation101_spill] sm:$0xff] %v3248_v50  ;;  %5702 = vst [vmem:[#allocation102_spill] sm:$0xff] %v3253_v22  ;;  %v835_v50 = vstv %s3117_s29 }
 0x10a   : > { %5683 = sst [smem:[#allocation56_spill]] %s3206_s13  ;;  %v3260_v35 = vmul.f32 %v679_v58, %v3074_v56  ;;  %v3263_v41 = vmul.f32 %v679_v58, %v3066_v52 }
 0x10b   : > { %s3227_s26 = sld [smem:[#allocation3 + $0x20]] }
 0x10c   : > { %s5693_s13 = sld [smem:[#allocation63_spill]]  ;;  %v5468_v2 = vstv %s5685_s23 }
 0x10d   : > { %s3237_s0 = sld [smem:[#allocation3 + $0x44]]  ;;  %v3271_v57 = vmul.f32 %v5468_v2, %v3087_v61 }
 0x10e   : > { %5688 = sst [smem:[#allocation59_spill]] %s3216_s16 }
 0x10f   : > { %s5701_s1 = sld [smem:[#allocation66_spill]]  ;;  %v5467_v14 = vstv %s5690_s10  ;;  %5708 = vst [vmem:[#allocation103_spill] sm:$0xff] %v3271_v57  ;;  %v5771_v57 = vstv %s5685_s23 }
 0x110   : > { %s3255_s18 = sld [smem:[#allocation3 + $0x8c]]  ;;  %v3287_v51 = vmul.f32 %v5467_v14, %v3087_v61  ;;  %v3404_v14 = vmul.f32 %v1138_v31, %v3128_v16 }
 0x111   : > { %5691 = sst [smem:[#allocation62_spill]] %s3227_s26 }
 0x112   : > { %s3245_s26 = sld [smem:[#allocation3 + $0x68]]  ;;  %v1126_v34 = vstv %s5693_s13  ;;  %5710 = vst [vmem:[#allocation104_spill] sm:$0xff] %v3287_v51 }
 0x113   : > { %5696 = sst [smem:[#allocation63_spill]] %s3237_s0  ;;  %v3294_v60 = vmul.f32 %v1126_v34, %v3074_v56  ;;  %v3297_v55 = vmul.f32 %v1126_v34, %v3066_v52  ;;  %v3315_v34 = vmul.f32 %v685_v13, %v3091_v62  ;;  %v3370_v62 = vmul.f32 %v691_v43, %v3176_v54 }
 0x114   : > { %s5705_s16 = sld [smem:[#allocation67_spill]]  ;;  %v3373_v13 = vmul.f32 %v829_v27, %v3115_v10 }
 0x115   : > { %s3265_s7 = sld [smem:[#allocation3 + $0x2]]  ;;  %v5466_v5 = vstv %s5701_s1  ;;  %5729 = vst [vmem:[#allocation114_spill] sm:$0xff] %v3370_v62 }
 0x116   : > { %5703 = sst [smem:[#allocation66_spill]] %s3255_s18  ;;  %v3326_v3 = vmul.f32 %v5466_v5, %v3087_v61  ;;  %5731 = vst [vmem:[#allocation115_spill] sm:$0xff] %v3373_v13  ;;  %v1499_v5 = vstv %s3044_s12 }
 0x117   : > { %s5707_s15 = sld [smem:[#allocation70_spill]]  ;;  %v3435_v23 = vmul.f32 %v1499_v5, %v3132_v19 }
 0x118   : > { %5698 = sst [smem:[#allocation100_spill]] %s3245_s26  ;;  %5717 = vst [vmem:[#allocation107_spill] sm:$0xff] %v3326_v3  ;;  %v3427_v3 = vmul.f32 %v1499_v5, %v3115_v10 }
 0x119   : > { %s3279_s13 = sld [smem:[#allocation3 + $0x5]]  ;;  %5755 = vst [vmem:[#allocation129_spill] sm:$0xff] %v3435_v23 }
 0x11a   : > { %s3289_s2 = sld [smem:[#allocation3 + $0x23]]  ;;  %v1349_v59 = vstv %s5705_s16  ;;  %5752 = vst [vmem:[#allocation127_spill] sm:$0xff] %v3427_v3  ;;  %v3446_v3 = vmul.f32 %v697_v12, %v3198_v15 }
 0x11b   : > { %5706 = sst [smem:[#allocation67_spill]] %s3265_s7  ;;  %v3338_v17 = vmul.f32 %v1349_v59, %v3074_v56  ;;  %v3341_v44 = vmul.f32 %v1349_v59, %v3066_v52  ;;  %v915_v59 = vstv %s2971_s14  ;;  %v3376_v52 = vmul.f32 %v829_v27, %v3132_v19 }
 0x11c   : > { %s3299_s3 = sld [smem:[#allocation3 + $0x26]]  ;;  %v3390_v43 = vmul.f32 %v915_v59, %v3176_v54 }
 0x11d   : > { %v5465_v58 = vstv %s5707_s15  ;;  %s3302_s6 = sld [smem:[#allocation3 + $0x29]]  ;;  %5732 = vst [vmem:[#allocation116_spill] sm:$0xff] %v3376_v52 }
 0x11e   : > { %s5721_s28 = sld [smem:[#allocation80_spill]]  ;;  %v3349_v39 = vmul.f32 %v5465_v58, %v3087_v61  ;;  %v3383_v61 = vmul.f32 %v915_v59, %v3128_v16  ;;  %5736 = vst [vmem:[#allocation119_spill] sm:$0xff] %v3390_v43  ;;  %v1361_v58 = vstv %s3020_s9  ;;  %v3410_v59 = vmul.f32 %v1138_v31, %v3176_v54 }
 0x11f   : > { %s3344_s30 = sld [smem:[#allocation3 + $0x4a]]  ;;  %v3423_v2 = vmul.f32 %v1361_v58, %v3128_v16  ;;  %v3459_v16 = vmul.f32 %v835_v50, %v3186_v11 }
 0x120   : > { %5711 = sst [smem:[#allocation70_spill]] %s3289_s2  ;;  %5723 = vst [vmem:[#allocation110_spill] sm:$0xff] %v3349_v39  ;;  %5742 = vst [vmem:[#allocation123_spill] sm:$0xff] %v3410_v59  ;;  %v3416_v39 = vmul.f32 %v1276_v20, %v3132_v19 }
 0x121   : > { %s3354_s7 = sld [smem:[#allocation3 + $0x4d]]  ;;  %5764 = vst [vmem:[#allocation131_spill] sm:$0xff] %v3459_v16 }
 0x122   : > { %5713 = sst [smem:[#allocation105_spill]] %s3299_s3  ;;  %5746 = vst [vmem:[#allocation125_spill] sm:$0xff] %v3416_v39  ;;  %v3480_v39 = vmul.f32 %v5771_v57, %v3204_v25 }
 0x123   : > { %5714 = sst [smem:[#allocation106_spill]] %s3302_s6 }
 0x124   : > { %s3328_s6 = sld [smem:[#allocation3 + $0x47]]  ;;  %v1053_v1 = vstv %s5721_s28  ;;  %5772 = vst [vmem:[#allocation135_spill] sm:$0xff] %v3480_v39 }
 0x125   : > { %5722 = sst [smem:[#allocation80_spill]] %s3344_s30  ;;  %v3393_v27 = vmul.f32 %v1053_v1, %v3115_v10  ;;  %v3396_v56 = vmul.f32 %v1053_v1, %v3132_v19  ;;  %v3413_v1 = vmul.f32 %v1276_v20, %v3115_v10  ;;  %v3432_v20 = vmul.f32 %v1361_v58, %v3176_v54  ;;  %v6087_v33 = vld [vmem:[#allocation119_spill] sm:$0xff] }
 0x126   : > { %s3360_s25 = sld [smem:[#allocation3 + $0x6b]]  ;;  %v3454_v58 = vmul.f32 %v697_v12, %v3310_v63  ;;  %v3462_v10 = vmul.f32 %v835_v50, %v3225_v28 }
 0x127   : > { %5725 = sst [smem:[#allocation111_spill]] %s3354_s7  ;;  %5737 = vst [vmem:[#allocation120_spill] sm:$0xff] %v3393_v27  ;;  %5738 = vst [vmem:[#allocation121_spill] sm:$0xff] %v3396_v56 }
 0x128   : > { %s3367_s24 = sld [smem:[#allocation3 + $0x6e]]  ;;  %5744 = vst [vmem:[#allocation124_spill] sm:$0xff] %v3413_v1  ;;  %5754 = vst [vmem:[#allocation128_spill] sm:$0xff] %v3432_v20 }
 0x129   : > { %s3380_s14 = sld [smem:[#allocation3 + $0x71]]  ;;  %5761 = vst [vmem:[#allocation130_spill] sm:$0xff] %v3454_v58  ;;  %5766 = vst [vmem:[#allocation132_spill] sm:$0xff] %v3462_v10 }
 0x12a   : > { %5718 = sst [smem:[#allocation108_spill]] %s3328_s6 }
 0x12b   : > { %s3387_s4 = sld [smem:[#allocation3 + $0x8f]] }
 0x12c   : > { %5727 = sst [smem:[#allocation112_spill]] %s3360_s25 }
 0x12d   : > { %s3400_s27 = sld [smem:[#allocation3 + $0xe]] }
 0x12e   : > { %5728 = sst [smem:[#allocation113_spill]] %s3367_s24 }
 0x12f   : > { %5733 = sst [smem:[#allocation117_spill]] %s3380_s14 }
 0x130   : > { %s5740_s21 = sld [smem:[#allocation91_spill]] }
 0x131   : > { %5735 = sst [smem:[#allocation118_spill]] %s3387_s4 }
 0x132   : > { %s3407_s3 = sld [smem:[#allocation3 + $0x32]] }
 0x133   : > { %5739 = sst [smem:[#allocation122_spill]] %s3400_s27 }
 0x134   : > { %s3420_s11 = sld [smem:[#allocation3 + $0x56]] }
 0x135   : > { %s5750_s8 = sld [smem:[#allocation47_spill]] }
 0x136   : > { %s5751_s0 = sld [smem:[#allocation49_spill]]  ;;  %v921_v22 = vstv %s5740_s21 }
 0x137   : > { %s3429_s16 = sld [smem:[#allocation3 + $0x7a]]  ;;  %v3465_v31 = vmul.f32 %v921_v22, %v3198_v15  ;;  %v3473_v23 = vmul.f32 %v921_v22, %v3310_v63 }
 0x138   : > { %5741 = sst [smem:[#allocation91_spill]] %s3407_s3 }
 0x139   : > { %s5756_s20 = sld [smem:[#allocation53_spill]]  ;;  %5768 = vst [vmem:[#allocation133_spill] sm:$0xff] %v3473_v23 }
 0x13a   : > { %5748 = sst [smem:[#allocation126_spill]] %s3420_s11 }
 0x13b   : > { %s3440_s28 = sld [smem:[#allocation3 + $0xb]]  ;;  %v1059_v5 = vstv %s5750_s8 }
 0x13c   : > { %s5759_s19 = sld [smem:[#allocation55_spill]]  ;;  %v1144_v19 = vstv %s5751_s0  ;;  %v3483_v50 = vmul.f32 %v1059_v5, %v3186_v11  ;;  %v3486_v10 = vmul.f32 %v1059_v5, %v3225_v28  ;;  %v5781_v5 = vstv %s5690_s10 }
 0x13d   : > { %5753 = sst [smem:[#allocation47_spill]] %s3429_s16  ;;  %v3489_v54 = vmul.f32 %v1144_v19, %v3198_v15  ;;  %v3499_v39 = vmul.f32 %v1144_v19, %v3310_v63 }
 0x13e   : > { %s3448_s16 = sld [smem:[#allocation3 + $0x8]]  ;;  %5773 = vst [vmem:[#allocation136_spill] sm:$0xff] %v3483_v50  ;;  %5774 = vst [vmem:[#allocation137_spill] sm:$0xff] %v3486_v10  ;;  %v3506_v10 = vmul.f32 %v5781_v5, %v3204_v25 }
 0x13f   : > { %s5762_s29 = sld [smem:[#allocation59_spill]]  ;;  %v1282_v51 = vstv %s5756_s20  ;;  %5779 = vst [vmem:[#allocation139_spill] sm:$0xff] %v3499_v39 }
 0x140   : > { %s3456_s21 = sld [smem:[#allocation3 + $0x2f]]  ;;  %v3496_v57 = vmul.f32 %v1282_v51, %v3186_v11  ;;  %5782 = vst [vmem:[#allocation140_spill] sm:$0xff] %v3506_v10  ;;  %v3509_v50 = vmul.f32 %v1282_v51, %v3225_v28 }
 0x141   : > { %5757 = sst [smem:[#allocation49_spill]] %s3440_s28 }
 0x142   : > { %s3468_s22 = sld [smem:[#allocation3 + $0x2c]]  ;;  %v1367_v12 = vstv %s5759_s19  ;;  %5778 = vst [vmem:[#allocation138_spill] sm:$0xff] %v3496_v57  ;;  %5784 = vst [vmem:[#allocation141_spill] sm:$0xff] %v3509_v50 }
 0x143   : > { %s3475_s0 = sld [smem:[#allocation3 + $0x53]]  ;;  %v3512_v1 = vmul.f32 %v1367_v12, %v3198_v15  ;;  %v3516_v19 = vmul.f32 %v1367_v12, %v3310_v63  ;;  %v5793_v15 = vstv %s5701_s1 }
 0x144   : > { %5760 = sst [smem:[#allocation53_spill]] %s3448_s16  ;;  %v3532_v63 = vmul.f32 %v5793_v15, %v3204_v25 }
 0x145   : > { %s5775_s20 = sld [smem:[#allocation62_spill]]  ;;  %v1505_v22 = vstv %s5762_s29  ;;  %5786 = vst [vmem:[#allocation142_spill] sm:$0xff] %v3516_v19 }
 0x146   : > { %5763 = sst [smem:[#allocation55_spill]] %s3456_s21  ;;  %v3521_v5 = vmul.f32 %v1505_v22, %v3186_v11  ;;  %v3524_v51 = vmul.f32 %v1505_v22, %v3225_v28  ;;  %5794 = vst [vmem:[#allocation147_spill] sm:$0xff] %v3532_v63  ;;  %v5796_v28 = vstv %s5707_s15  ;;  %v440_v63 = vpop.permute.xlu0 %439 }
 0x147   : > { %s3492_s19 = sld [smem:[#allocation3 + $0x50]]  ;;  %v3542_v22 = vmul.f32 %v5796_v28, %v3204_v25  ;;  %v442_v25 = vpop.permute.xlu1 %441  ;;  %v464_v56 = vsel %vm463_vm10, 0.0, %v440_v63 }
 0x148   : > { %5767 = sst [smem:[#allocation59_spill]] %s3468_s22  ;;  %5789 = vst [vmem:[#allocation144_spill] sm:$0xff] %v3521_v5  ;;  %5791 = vst [vmem:[#allocation145_spill] sm:$0xff] %v3524_v51  ;;  %v465_v10 = vsel %vm463_vm10, 0.0, %v442_v25  ;;  %v505_v25 = vrot.slane %v464_v56, 7  ;;  %v530_v63 = vrot.slane %v464_v56, 1 }
 0x149   : > { %5770 = sst [smem:[#allocation134_spill]] %s3475_s0  ;;  %5797 = vst [vmem:[#allocation149_spill] sm:$0xff] %v3542_v22  ;;  %v506_v5 = vrot.slane %v465_v10, 7  ;;  %v531_v57 = vrot.slane %v465_v10, 1 }
 0x14a   : > { %s5777_s5 = sld [smem:[#allocation63_spill]]  ;;  %v454_v21 = vpop.permute.xlu0 %453 }
 0x14b   : > { %s3501_s23 = sld [smem:[#allocation3 + $0x77]]  ;;  %v520_v13 = vsel %vm513_vm0, %v505_v25, %v506_v5 }
 0x14c   : > { %s3518_s9 = sld [smem:[#allocation3 + $0x74]] }
 0x14d   : > { %5776 = sst [smem:[#allocation62_spill]] %s3492_s19 }
 0x14e   : > { %s3527_s17 = sld [smem:[#allocation3 + $0x17]] }
 0x14f   : > { %s3537_s8 = sld [smem:[#allocation3 + $0x3b]] }
 0x150   : > { %s3548_s26 = sld [smem:[#allocation3 + $0x5f]] }
 0x151   : > { %5780 = sst [smem:[#allocation63_spill]] %s3501_s23 }
 0x152   : > { %5787 = sst [smem:[#allocation143_spill]] %s3518_s9 }
 0x153   : > { %s5800_s15 = sld [smem:[#allocation25_spill]] }
 0x154   : > { %5792 = sst [smem:[#allocation146_spill]] %s3527_s17 }
 0x155   : > { %5795 = sst [smem:[#allocation148_spill]] %s3537_s8 }
 0x156   : > { %5799 = sst [smem:[#allocation150_spill]] %s3548_s26 }
 0x157   : > { %s5801_s30 = sld [smem:[#allocation26_spill]] }
 0x158   : > { %s5802_s6 = sld [smem:[#allocation27_spill]] }
 0x159   : > { %s5803_s24 = sld [smem:[#allocation29_spill]]  ;;  %v5804_v51 = vstv %s5800_s15 }
 0x15a   : > { %v3576_v16 = vmul.f32 %v5804_v51, %v465_v10  ;;  %s5806_s0 = sld [smem:[#allocation31_spill]]  ;;  %v5817_v52 = vmov %v5804_v51 }
 0x15b   : > { %s5808_s19 = sld [smem:[#allocation32_spill]]  ;;  %v3593_v51 = vmul.f32 %v5817_v52, %v464_v56 }
 0x15c   : > { %5805 = vst [vmem:[#allocation151_spill] sm:$0xff] %v3576_v16  ;;  %s5811_s9 = sld [smem:[#allocation34_spill]] }
 0x15d   : > { %v5807_v50 = vstv %s5801_s30  ;;  %s5813_s23 = sld [smem:[#allocation35_spill]]  ;;  %5819 = vst [vmem:[#allocation155_spill] sm:$0xff] %v3593_v51 }
 0x15e   : > { %v3581_v22 = vmul.f32 %v5807_v50, %v465_v10  ;;  %v5810_v15 = vstv %s5802_s6  ;;  %s5815_s8 = sld [smem:[#allocation37_spill]]  ;;  %v5820_v28 = vmov %v5807_v50 }
 0x15f   : > { %v3585_v47 = vmul.f32 %v5810_v15, %v465_v10  ;;  %v5814_v12 = vstv %s5803_s24  ;;  %s5818_s17 = sld [smem:[#allocation38_spill]]  ;;  %v3597_v46 = vmul.f32 %v5820_v28, %v464_v56  ;;  %v5823_v50 = vmov %v5810_v15  ;;  %v444_v15 = vpop.permute.xlu1 %443 }
 0x160   : > { %5809 = vst [vmem:[#allocation152_spill] sm:$0xff] %v3581_v22  ;;  %v3589_v11 = vmul.f32 %v5814_v12, %v465_v10  ;;  %s5821_s26 = sld [smem:[#allocation40_spill]]  ;;  %v3601_v27 = vmul.f32 %v5823_v50, %v464_v56  ;;  %v545_v10 = vsel %vm538_vm1, %v530_v63, %v531_v57  ;;  %v5828_v52 = vmov %v5814_v12 }
 0x161   : > { %5812 = vst [vmem:[#allocation153_spill] sm:$0xff] %v3585_v47  ;;  %5822 = vst [vmem:[#allocation156_spill] sm:$0xff] %v3597_v46  ;;  %s5824_s22 = sld [smem:[#allocation30_spill]]  ;;  %v3609_v12 = vmul.f32 %v5828_v52, %v464_v56  ;;  %v3612_v28 = vsel %vm463_vm10, 0.0, %v444_v15  ;;  %v5832_v50 = vstv %s5806_s0  ;;  %v5834_v7 = vstv %s5808_s19 }
 0x162   : > { %5816 = vst [vmem:[#allocation154_spill] sm:$0xff] %v3589_v11  ;;  %5825 = vst [vmem:[#allocation157_spill] sm:$0xff] %v3601_v27  ;;  %s5826_s21 = sld [smem:[#allocation41_spill]]  ;;  %v657_v49 = vmul.f32 %v5832_v50, %v520_v13  ;;  %v3618_v53 = vmul.f32 %v5834_v7, %v545_v10  ;;  %v5836_v11 = vstv %s5811_s9  ;;  %v3623_v27 = vsel %vm463_vm10, 0.0, %v454_v21 }
 0x163   : > { %s5827_s15 = sld [smem:[#allocation33_spill]]  ;;  %5830 = vst [vmem:[#allocation158_spill] sm:$0xff] %v3609_v12  ;;  %v881_v47 = vmul.f32 %v5836_v11, %v520_v13  ;;  %v5838_v22 = vstv %s5813_s23  ;;  %v5520_v21 = vrot.slane %v3612_v28, 7  ;;  %v5887_v19 = vstv %s5811_s9 }
 0x164   : > { %s5829_s16 = sld [smem:[#allocation36_spill]]  ;;  %5835 = vst [vmem:[#allocation159_spill] sm:$0xff] %v3618_v53  ;;  %v3627_v56 = vmul.f32 %v5838_v22, %v545_v10  ;;  %v5841_v52 = vstv %s5815_s8  ;;  %v5519_v22 = vrot.slane %v3612_v28, 1 }
 0x165   : > { %s5831_s30 = sld [smem:[#allocation39_spill]]  ;;  %v1104_v12 = vmul.f32 %v5841_v52, %v520_v13  ;;  %v5842_v15 = vstv %s5818_s17 }
 0x166   : > { %s5833_s6 = sld [smem:[#allocation43_spill]]  ;;  %5840 = vst [vmem:[#allocation160_spill] sm:$0xff] %v3627_v56  ;;  %v3633_v16 = vmul.f32 %v5842_v15, %v545_v10  ;;  %v5845_v50 = vstv %s5821_s26 }
 0x167   : > { %s5837_s28 = sld [smem:[#allocation46_spill]]  ;;  %v1327_v46 = vmul.f32 %v5845_v50, %v520_v13  ;;  %v5846_v7 = vstv %s5824_s22 }
 0x168   : > { %s5839_s24 = sld [smem:[#allocation50_spill]]  ;;  %5844 = vst [vmem:[#allocation161_spill] sm:$0xff] %v3633_v16  ;;  %v3639_v53 = vadd.f32 %v657_v49, %v5846_v7  ;;  %v5847_v11 = vstv %s5826_s21  ;;  %v519_v7 = vsel %vm513_vm0, %v506_v5, %v5520_v21 }
 0x169   : > { %s5843_s1 = sld [smem:[#allocation54_spill]]  ;;  %v3643_v51 = vmul.f32 %v5847_v11, %v545_v10  ;;  %v5851_v56 = vstv %s5827_s15  ;;  %v5901_v23 = vstv %s5827_s15 }
 0x16a   : > { %s5849_s19 = sld [smem:[#allocation42_spill]]  ;;  %v3649_v52 = vadd.f32 %v881_v47, %v5851_v56  ;;  %v5853_v15 = vstv %s5829_s16  ;;  %v544_v47 = vsel %vm538_vm1, %v531_v57, %v5519_v22  ;;  %v5525_v57 = vrot.slane %v3623_v27, 7 }
 0x16b   : > { %5848 = vst [vmem:[#allocation162_spill] sm:$0xff] %v3643_v51  ;;  %s5850_s23 = sld [smem:[#allocation44_spill]]  ;;  %v3653_v16 = vadd.f32 %v1104_v12, %v5853_v15  ;;  %v5855_v13 = vstv %s5831_s30  ;;  %v524_v15 = vsel %vm3015_vm3, %v519_v7, 0.0  ;;  %v5905_v62 = vstv %s5831_s30 }
 0x16c   : > { %s5852_s11 = sld [smem:[#allocation48_spill]]  ;;  %v3657_v49 = vadd.f32 %v1327_v46, %v5855_v13  ;;  %v5856_v10 = vstv %s5833_s6 }
 0x16d   : > { %s5854_s17 = sld [smem:[#allocation52_spill]]  ;;  %v3662_v50 = vmul.f32 %v5856_v10, %v3612_v28  ;;  %v5859_v12 = vstv %s5837_s28  ;;  %v521_v10 = vsel %vm513_vm0, %v5525_v57, %v505_v25 }
 0x16e   : > { %s5858_s21 = sld [smem:[#allocation57_spill]]  ;;  %v3675_v56 = vmul.f32 %v5859_v12, %v3612_v28  ;;  %v5861_v46 = vstv %s5839_s24  ;;  %v3693_v12 = vsel %vm2996_vm2, %v544_v47, 0.0  ;;  %v5876_v47 = vrot.slane %v3623_v27, 1 }
 0x16f   : > { %5857 = vst [vmem:[#allocation163_spill] sm:$0xff] %v3662_v50  ;;  %v3680_v11 = vmul.f32 %v5861_v46, %v3612_v28  ;;  %s5863_s3 = sld [smem:[#allocation60_spill]]  ;;  %v5864_v13 = vstv %s5843_s1  ;;  %5868 = vst [vmem:[#allocation167_spill] sm:$0xff] %v3693_v12 }
 0x170   : > { %5860 = vst [vmem:[#allocation164_spill] sm:$0xff] %v3675_v56  ;;  %s5865_s27 = sld [smem:[#allocation64_spill]]  ;;  %v3687_v5 = vmul.f32 %v5864_v13, %v3612_v28  ;;  %v5869_v46 = vstv %s5849_s19 }
 0x171   : > { %5862 = vst [vmem:[#allocation165_spill] sm:$0xff] %v3680_v11  ;;  %s5867_s4 = sld [smem:[#allocation58_spill]]  ;;  %v662_v22 = vmul.f32 %v5869_v46, %v524_v15  ;;  %v5871_v7 = vstv %s5850_s23  ;;  %v546_v46 = vsel %vm538_vm1, %v5876_v47, %v530_v63 }
 0x172   : > { %5866 = vst [vmem:[#allocation166_spill] sm:$0xff] %v3687_v5  ;;  %s5870_s14 = sld [smem:[#allocation68_spill]]  ;;  %v886_v21 = vmul.f32 %v5871_v7, %v524_v15  ;;  %v5872_v51 = vstv %s5852_s11  ;;  %v554_v25 = vsel %vm3040_vm5, %v546_v46, 0.0 }
 0x173   : > { %s5873_s25 = sld [smem:[#allocation61_spill]]  ;;  %v1109_v13 = vmul.f32 %v5872_v51, %v524_v15  ;;  %v5874_v5 = vstv %s5854_s17  ;;  %v448_v51 = vpop.permute.xlu1 %447 }
 0x174   : > { %v1332_v11 = vmul.f32 %v5874_v5, %v524_v15  ;;  %s5875_s7 = sld [smem:[#allocation65_spill]]  ;;  %v5877_v7 = vstv %s5858_s21  ;;  %v522_v15 = vsel %vm3023_vm4, %v521_v10, 0.0  ;;  %v3764_v43 = vsel %vm463_vm10, 0.0, %v448_v51 }
 0x175   : > { %v3714_v56 = vmul.f32 %v5877_v7, %v3623_v27  ;;  %s5879_s12 = sld [smem:[#allocation69_spill]]  ;;  %v5880_v5 = vstv %s5863_s3  ;;  %v5884_v7 = vstv %s5806_s0  ;;  %v880_v10 = vmul.f32 %v5887_v19, %v522_v15 }
 0x176   : > { %v3723_v57 = vmul.f32 %v5880_v5, %v3623_v27  ;;  %v5882_v63 = vstv %s5865_s27  ;;  %s5889_s2 = sld [smem:[#allocation71_spill]]  ;;  %v446_v5 = vpop.permute.xlu0 %445  ;;  %v5900_v19 = vstv %s5824_s22 }
 0x177   : > { %5878 = vst [vmem:[#allocation168_spill] sm:$0xff] %v3714_v56  ;;  %v3728_v47 = vmul.f32 %v5882_v63, %v3623_v27  ;;  %v656_v56 = vmul.f32 %v5884_v7, %v522_v15  ;;  %v5885_v50 = vstv %s5867_s4  ;;  %s5891_s29 = sld [smem:[#allocation72_spill]]  ;;  %v5895_v63 = vstv %s5815_s8 }
 0x178   : > { %5881 = vst [vmem:[#allocation169_spill] sm:$0xff] %v3723_v57  ;;  %v3734_v12 = vmul.f32 %v5885_v50, %v554_v25  ;;  %v5888_v20 = vstv %s5870_s14  ;;  %s5893_s10 = sld [smem:[#allocation73_spill]]  ;;  %v5899_v50 = vstv %s5821_s26  ;;  %v882_v58 = vadd.f32 %v880_v10, %v5901_v23 }
 0x179   : > { %5883 = vst [vmem:[#allocation170_spill] sm:$0xff] %v3728_v47  ;;  %v3741_v46 = vmul.f32 %v5888_v20, %v3623_v27  ;;  %v5892_v57 = vstv %s5873_s25  ;;  %v1103_v47 = vmul.f32 %v5895_v63, %v522_v15  ;;  %s5897_s0 = sld [smem:[#allocation74_spill]]  ;;  %v658_v59 = vadd.f32 %v656_v56, %v5900_v19 }
 0x17a   : > { %5886 = vst [vmem:[#allocation171_spill] sm:$0xff] %v3734_v12  ;;  %v3745_v26 = vmul.f32 %v5892_v57, %v554_v25  ;;  %v5896_v39 = vstv %s5875_s7  ;;  %v1326_v12 = vmul.f32 %v5899_v50, %v522_v15  ;;  %v5904_v57 = vstv %s5829_s16  ;;  %s5914_s22 = sld [smem:[#allocation75_spill]] }
 0x17b   : > { %5890 = vst [vmem:[#allocation172_spill] sm:$0xff] %v3741_v46  ;;  %v3751_v7 = vmul.f32 %v5896_v39, %v554_v25  ;;  %v5902_v20 = vstv %s5879_s12  ;;  %v467_v15 = vsel %vm463_vm10, 0.0, %v446_v5  ;;  %v664_v19 = vadd.f32 %v662_v22, %v658_v59  ;;  %s5916_s26 = sld [smem:[#allocation76_spill]] }
 0x17c   : > { %5894 = vst [vmem:[#allocation173_spill] sm:$0xff] %v3745_v26  ;;  %v3761_v46 = vmul.f32 %v5902_v20, %v554_v25  ;;  %v1105_v26 = vadd.f32 %v1103_v47, %v5904_v57  ;;  %v1328_v63 = vadd.f32 %v1326_v12, %v5905_v62  ;;  %v5906_v23 = vstv %s5889_s2  ;;  %v452_v12 = vpop.permute.xlu1 %451  ;;  %s5919_s16 = sld [smem:[#allocation77_spill]] }
 0x17d   : > { %5898 = vst [vmem:[#allocation174_spill] sm:$0xff] %v3751_v7  ;;  %v3776_v25 = vmul.f32 %v5906_v23, %v3764_v43  ;;  %v5908_v51 = vstv %s5891_s29  ;;  %v888_v20 = vadd.f32 %v886_v21, %v882_v58  ;;  %v508_v23 = vrot.slane %v467_v15, 7  ;;  %s5925_s9 = sld [smem:[#allocation79_spill]] }
 0x17e   : > { %5903 = vst [vmem:[#allocation175_spill] sm:$0xff] %v3761_v46  ;;  %v3781_v10 = vmul.f32 %v5908_v51, %v3764_v43  ;;  %v5910_v47 = vstv %s5893_s10  ;;  %v1111_v57 = vadd.f32 %v1109_v13, %v1105_v26  ;;  %v1334_v56 = vadd.f32 %v1332_v11, %v1328_v63  ;;  %s5932_s8 = sld [smem:[#allocation82_spill]] }
 0x17f   : > { %5907 = vst [vmem:[#allocation176_spill] sm:$0xff] %v3776_v25  ;;  %v3786_v62 = vmul.f32 %v5910_v47, %v3764_v43  ;;  %v5912_v50 = vstv %s5897_s0  ;;  %v533_v39 = vrot.slane %v467_v15, 1  ;;  %v5915_v46 = vstv %s5833_s6  ;;  %v450_v47 = vpop.permute.xlu0 %449  ;;  %s5939_s15 = sld [smem:[#allocation84_spill]] }
 0x180   : > { %5909 = vst [vmem:[#allocation177_spill] sm:$0xff] %v3781_v10  ;;  %v3791_v5 = vmul.f32 %v5912_v50, %v3764_v43  ;;  %v3795_v51 = vmul.f32 %v5915_v46, %v467_v15  ;;  %v5918_v7 = vstv %s5837_s28  ;;  %v5921_v50 = vstv %s5839_s24  ;;  %s5930_s28 = sld [smem:[#allocation81_spill]] }
 0x181   : > { %5911 = vst [vmem:[#allocation178_spill] sm:$0xff] %v3786_v62  ;;  %v3799_v62 = vmul.f32 %v5918_v7, %v467_v15  ;;  %v5923_v59 = vstv %s5843_s1  ;;  %v470_v58 = vsel %vm463_vm10, 0.0, %v452_v12  ;;  %v5926_v21 = vrot.slane %v3764_v43, 7  ;;  %s5938_s1 = sld [smem:[#allocation83_spill]] }
 0x182   : > { %5913 = vst [vmem:[#allocation179_spill] sm:$0xff] %v3791_v5  ;;  %5917 = vst [vmem:[#allocation180_spill] sm:$0xff] %v3795_v51  ;;  %v3803_v5 = vmul.f32 %v5921_v50, %v467_v15  ;;  %v3807_v26 = vmul.f32 %v5923_v59, %v467_v15  ;;  %v5927_v11 = vrot.slane %v3612_v28, 7  ;;  %v5928_v46 = vrot.slane %v3764_v43, 1  ;;  %s6030_s30 = sld [smem:[#allocation67_spill]] }
 0x183   : > { %5920 = vst [vmem:[#allocation181_spill] sm:$0xff] %v3799_v62  ;;  %v517_v22 = vsel %vm513_vm0, %v508_v23, %v5926_v21  ;;  %v5929_v63 = vrot.slane %v3612_v28, 1  ;;  %v5931_v59 = vstv %s5849_s19  ;;  %v3833_v21 = vsel %vm463_vm10, 0.0, %v450_v47  ;;  %s5956_s19 = sld [smem:[#allocation86_spill]] }
 0x184   : > { %5922 = vst [vmem:[#allocation182_spill] sm:$0xff] %v3803_v5  ;;  %5924 = vst [vmem:[#allocation183_spill] sm:$0xff] %v3807_v26  ;;  %v518_v13 = vsel %vm513_vm0, %v5927_v11, %v508_v23  ;;  %v542_v7 = vsel %vm538_vm1, %v533_v39, %v5928_v46  ;;  %v526_v12 = vsel %vm3096_vm6, %v517_v22, 0.0  ;;  %v5933_v11 = vstv %s5914_s22  ;;  %s6031_s6 = sld [smem:[#allocation70_spill]] }
 0x185   : > { %v543_v15 = vsel %vm538_vm1, %v5929_v63, %v533_v39  ;;  %v550_v50 = vsel %vm3107_vm7, %v542_v7, 0.0  ;;  %v663_v23 = vmul.f32 %v5931_v59, %v518_v13  ;;  %v668_v28 = vmul.f32 %v5933_v11, %v526_v12  ;;  %s6032_s24 = sld [smem:[#allocation105_spill]] }
 0x186   : > { %v5934_v46 = vstv %s5916_s26  ;;  %v5936_v39 = vstv %s5850_s23  ;;  %v5937_v5 = vstv %s5919_s16  ;;  %v5942_v47 = vstv %s5925_s9  ;;  %s5961_s23 = sld [smem:[#allocation88_spill]] }
 0x187   : > { %v3839_v26 = vmul.f32 %v5934_v46, %v543_v15  ;;  %v887_v63 = vmul.f32 %v5936_v39, %v518_v13  ;;  %v892_v22 = vmul.f32 %v5937_v5, %v526_v12  ;;  %v665_v7 = vadd.f32 %v663_v23, %v3639_v53  ;;  %s6036_s26 = sld [smem:[#allocation80_spill]] }
 0x188   : > { %v5940_v59 = vmov %v5934_v46  ;;  %v3852_v62 = vmul.f32 %v5942_v47, %v543_v15  ;;  %v5944_v11 = vstv %s5852_s11  ;;  %v670_v46 = vadd.f32 %v668_v28, %v664_v19  ;;  %s5952_s11 = sld [smem:[#allocation85_spill]] }
 0x189   : > { %5935 = vst [vmem:[#allocation184_spill] sm:$0xff] %v3839_v26  ;;  %v3848_v10 = vmul.f32 %v5940_v59, %v550_v50  ;;  %v1110_v25 = vmul.f32 %v5944_v11, %v518_v13  ;;  %v889_v26 = vadd.f32 %v887_v63, %v3649_v52  ;;  %v5945_v51 = vmov %v5942_v47  ;;  %s6038_s9 = sld [smem:[#allocation113_spill]] }
 0x18a   : > { %5943 = vst [vmem:[#allocation186_spill] sm:$0xff] %v3852_v62  ;;  %v3859_v39 = vmul.f32 %v5945_v51, %v550_v50  ;;  %v5947_v5 = vstv %s5930_s28  ;;  %v894_v53 = vadd.f32 %v892_v22, %v888_v20  ;;  %v5948_v59 = vstv %s5932_s8  ;;  %s6047_s8 = sld [smem:[#allocation118_spill]] }
 0x18b   : > { %5941 = vst [vmem:[#allocation185_spill] sm:$0xff] %v3848_v10  ;;  %v1115_v8 = vmul.f32 %v5947_v5, %v526_v12  ;;  %v1112_v23 = vadd.f32 %v1110_v25, %v3653_v16  ;;  %v3866_v10 = vmul.f32 %v5948_v59, %v543_v15  ;;  %v5950_v47 = vstv %s5854_s17  ;;  %s5960_s17 = sld [smem:[#allocation87_spill]] }
 0x18c   : > { %5946 = vst [vmem:[#allocation187_spill] sm:$0xff] %v3859_v39  ;;  %v1333_v62 = vmul.f32 %v5950_v47, %v518_v13  ;;  %v5951_v19 = vmov %v5948_v59  ;;  %v5954_v28 = vstv %s5938_s1  ;;  %v5955_v63 = vstv %s5939_s15  ;;  %s6053_s15 = sld [smem:[#allocation91_spill]] }
 0x18d   : > { %5949 = vst [vmem:[#allocation188_spill] sm:$0xff] %v3866_v10  ;;  %v1117_v11 = vadd.f32 %v1115_v8, %v1111_v57  ;;  %v3872_v52 = vmul.f32 %v5951_v19, %v550_v50  ;;  %v1338_v51 = vmul.f32 %v5954_v28, %v526_v12  ;;  %v3878_v5 = vmul.f32 %v5955_v63, %v543_v15 }
 0x18e   : > { %v3881_v16 = vadd.f32 %v1333_v62, %v3657_v49  ;;  %v5958_v25 = vmov %v5955_v63  ;;  %v511_v8 = vrot.slane %v470_v58, 7  ;;  %v536_v57 = vrot.slane %v470_v58, 1 }
 0x18f   : > { %5953 = vst [vmem:[#allocation189_spill] sm:$0xff] %v3872_v52  ;;  %5957 = vst [vmem:[#allocation190_spill] sm:$0xff] %v3878_v5  ;;  %v3885_v20 = vmul.f32 %v5958_v25, %v550_v50  ;;  %v3887_v13 = vadd.f32 %v1338_v51, %v1334_v56  ;;  %v5962_v12 = vstv %s5858_s21  ;;  %v5964_v15 = vstv %s5863_s3  ;;  %s5977_s3 = sld [smem:[#allocation89_spill]] }
 0x190   : > { %v3891_v22 = vmul.f32 %v5962_v12, %v470_v58  ;;  %v3895_v59 = vmul.f32 %v5964_v15, %v470_v58  ;;  %v5966_v47 = vstv %s5865_s27  ;;  %v5968_v62 = vrot.slane %v3623_v27, 7  ;;  %s6010_s21 = sld [smem:[#allocation56_spill]] }
 0x191   : > { %5959 = vst [vmem:[#allocation191_spill] sm:$0xff] %v3885_v20  ;;  %v3899_v49 = vmul.f32 %v5966_v47, %v470_v58  ;;  %v5969_v19 = vrot.slane %v3623_v27, 1  ;;  %v510_v28 = vrot.slane %v3833_v21, 7  ;;  %v535_v51 = vrot.slane %v3833_v21, 1  ;;  %s6080_s27 = sld [smem:[#allocation59_spill]] }
 0x192   : > { %5963 = vst [vmem:[#allocation192_spill] sm:$0xff] %v3891_v22  ;;  %5965 = vst [vmem:[#allocation193_spill] sm:$0xff] %v3895_v59  ;;  %v514_v50 = vsel %vm513_vm0, %v511_v8, %v5968_v62  ;;  %v5970_v63 = vstv %s5952_s11  ;;  %v5971_v12 = vstv %s5867_s4  ;;  %v5973_v47 = vstv %s5956_s19  ;;  %s4193_s4 = sld [smem:[#allocation3 + $0x38]] }
 0x193   : > { %5967 = vst [vmem:[#allocation194_spill] sm:$0xff] %v3899_v49  ;;  %v539_v56 = vsel %vm538_vm1, %v536_v57, %v5969_v19  ;;  %v675_v25 = vmul.f32 %v5970_v63, %v514_v50  ;;  %v899_v20 = vmul.f32 %v5973_v47, %v514_v50  ;;  %v5974_v62 = vstv %s5870_s14  ;;  %s6007_s14 = sld [smem:[#allocation272_spill]] }
 0x194   : > { %v3915_v15 = vmul.f32 %v5971_v12, %v539_v56  ;;  %v3921_v27 = vmul.f32 %v5974_v62, %v470_v58  ;;  %v5976_v5 = vstv %s5873_s25  ;;  %v5979_v52 = vstv %s5960_s17  ;;  %s4207_s25 = sld [smem:[#allocation3 + $0x35]] }
 0x195   : > { %v3925_v19 = vmul.f32 %v5976_v5, %v539_v56  ;;  %v1122_v10 = vmul.f32 %v5979_v52, %v514_v50  ;;  %v5980_v39 = vstv %s5875_s7  ;;  %v5982_v49 = vstv %s5961_s23  ;;  %s5985_s7 = sld [smem:[#allocation45_spill]] }
 0x196   : > { %5972 = vst [vmem:[#allocation195_spill] sm:$0xff] %v3915_v15  ;;  %5975 = vst [vmem:[#allocation196_spill] sm:$0xff] %v3921_v27  ;;  %v3931_v63 = vmul.f32 %v5980_v39, %v539_v56  ;;  %v1345_v12 = vmul.f32 %v5982_v49, %v514_v50  ;;  %v515_v47 = vsel %vm513_vm0, %v510_v28, %v511_v8  ;;  %v5983_v58 = vrot.slane %v3764_v43, 7 }
 0x197   : > { %5978 = vst [vmem:[#allocation197_spill] sm:$0xff] %v3925_v19  ;;  %v540_v62 = vsel %vm538_vm1, %v535_v51, %v536_v57  ;;  %v5984_v52 = vrot.slane %v3764_v43, 1  ;;  %v5986_v49 = vstv %s5879_s12  ;;  %v528_v8 = vsel %vm3149_vm8, %v515_v47, 0.0  ;;  %s4218_s12 = sld [smem:[#allocation3 + $0x5c]] }
 0x198   : > { %5981 = vst [vmem:[#allocation198_spill] sm:$0xff] %v3931_v63  ;;  %v516_v5 = vsel %vm513_vm0, %v5983_v58, %v510_v28  ;;  %v3949_v50 = vmul.f32 %v5986_v49, %v539_v56  ;;  %v552_v28 = vsel %vm3157_vm9, %v540_v62, 0.0  ;;  %v5988_v58 = vstv %s5914_s22  ;;  %s6035_s22 = sld [smem:[#allocation108_spill]] }
 0x199   : > { %v541_v39 = vsel %vm538_vm1, %v5984_v52, %v535_v51  ;;  %v669_v57 = vmul.f32 %v5988_v58, %v516_v5  ;;  %v5989_v63 = vstv %s5952_s11  ;;  %v5990_v51 = vstv %s5889_s2  ;;  %s5999_s2 = sld [smem:[#allocation51_spill]] }
 0x19a   : > { %5987 = vst [vmem:[#allocation199_spill] sm:$0xff] %v3949_v50  ;;  %v674_v43 = vmul.f32 %v5989_v63, %v528_v8  ;;  %v3962_v52 = vmul.f32 %v5990_v51, %v3833_v21  ;;  %v5992_v19 = vstv %s5977_s3  ;;  %v5994_v56 = vstv %s5919_s16  ;;  %s6037_s16 = sld [smem:[#allocation112_spill]] }
 0x19b   : > { %v3966_v15 = vmul.f32 %v5992_v19, %v541_v39  ;;  %v893_v49 = vmul.f32 %v5994_v56, %v516_v5  ;;  %v671_v47 = vadd.f32 %v669_v57, %v665_v7  ;;  %v5995_v50 = vmov %v5992_v19  ;;  %s6054_s11 = sld [smem:[#allocation126_spill]] }
 0x19c   : > { %5991 = vst [vmem:[#allocation200_spill] sm:$0xff] %v3962_v52  ;;  %v3972_v27 = vmul.f32 %v5995_v50, %v552_v28  ;;  %v5997_v62 = vstv %s5956_s19  ;;  %v5998_v58 = vstv %s5891_s29  ;;  %v676_v63 = vadd.f32 %v674_v43, %v670_v46  ;;  %s6018_s29 = sld [smem:[#allocation100_spill]] }
 0x19d   : > { %5993 = vst [vmem:[#allocation201_spill] sm:$0xff] %v3966_v15  ;;  %v898_v59 = vmul.f32 %v5997_v62, %v528_v8  ;;  %v3979_v22 = vmul.f32 %v5998_v58, %v3833_v21  ;;  %v895_v51 = vadd.f32 %v893_v49, %v889_v26  ;;  %v6000_v52 = vstv %s5985_s7  ;;  %s6058_s19 = sld [smem:[#allocation47_spill]] }
 0x19e   : > { %5996 = vst [vmem:[#allocation202_spill] sm:$0xff] %v3972_v27  ;;  %v3983_v45 = vmul.f32 %v6000_v52, %v541_v39  ;;  %v6002_v19 = vstv %s5930_s28  ;;  %v677_v56 = vadd.f32 %v675_v25, %v671_v47  ;;  %v6003_v7 = vmov %v6000_v52  ;;  %v1811_v25 = vld [vmem:[%s6007_s14 + $0x8] sm:$0xff]  ;;  %s6043_s28 = sld [smem:[#allocation117_spill]] }
 0x19f   : > { %v1116_v15 = vmul.f32 %v6002_v19, %v516_v5  ;;  %v900_v38 = vadd.f32 %v898_v59, %v894_v53  ;;  %v3989_v50 = vmul.f32 %v6003_v7, %v552_v28  ;;  %v6005_v57 = vstv %s5960_s17  ;;  %2406 = vmatprep.subr.mxu1 %v1811_v25  ;;  %2396 = vmatprep.subr.mxu0 %v1811_v25  ;;  %s4155_s17 = sld [smem:[#allocation3 + $0x83]] }
 0x1a0   : > { %6001 = vst [vmem:[#allocation203_spill] sm:$0xff] %v3983_v45  ;;  %v1121_v62 = vmul.f32 %v6005_v57, %v528_v8  ;;  %v682_v58 = vadd.f32 %v3260_v35, %v676_v63  ;;  %v901_v27 = vadd.f32 %v899_v20, %v895_v51  ;;  %v6006_v26 = vstv %s5893_s10  ;;  %v1810_v35 = vld [vmem:[%s6007_s14] sm:$0xff]  ;;  %2407 = vmatpush3.msra.mxu1 %v1811_v25  ;;  %s6028_s10 = sld [smem:[#allocation106_spill]] }
 0x1a1   : > { %6004 = vst [vmem:[#allocation204_spill] sm:$0xff] %v3989_v50  ;;  %v1118_v46 = vadd.f32 %v1116_v15, %v1112_v23  ;;  %v3997_v43 = vmul.f32 %v6006_v26, %v3833_v21  ;;  %v4003_v53 = vadd.f32 %v3263_v41, %v677_v56  ;;  %v906_v59 = vadd.f32 %v3274_v30, %v900_v38  ;;  %v487_v30 = vpop.permute.xlu1 %486  ;;  %s4179_s3 = sld [smem:[#allocation3 + $0x11]] }
 0x1a2   : > { %v1123_v52 = vadd.f32 %v1121_v62, %v1117_v11  ;;  %v6008_v49 = vstv %s5999_s2  ;;  %v688_v23 = vadd.f32 %v3147_v37, %v682_v58  ;;  %v6013_v63 = vstv %s5938_s1  ;;  %v473_v11 = vpop.permute.xlu0 %472  ;;  %2408 = vmatprep.subr.mxu1 %v1810_v35  ;;  %2397 = vmatpush3.msra.mxu0 %v1811_v25  ;;  %s6051_s1 = sld [smem:[#allocation122_spill]] }
 0x1a3   : > { %v4008_v47 = vmul.f32 %v6008_v49, %v541_v39  ;;  %v1124_v20 = vadd.f32 %v1122_v10, %v1118_v46  ;;  %v6011_v15 = vmov %v6008_v49  ;;  %v1339_v38 = vmul.f32 %v6013_v63, %v516_v5  ;;  %2409 = vmatpush3.msra.mxu1 %v1810_v35  ;;  %2398 = vmatprep.subr.mxu0 %v1810_v35  ;;  %s6074_s7 = sld [smem:[#allocation49_spill]] }
 0x1a4   : > { %v4016_v41 = vmul.f32 %v6011_v15, %v552_v28  ;;  %v4021_v51 = vadd.f32 %v3277_v40, %v901_v27  ;;  %v912_v19 = vadd.f32 %v3194_v48, %v906_v59  ;;  %v1129_v56 = vadd.f32 %v3294_v60, %v1123_v52  ;;  %2399 = vmatpush3.msra.mxu0 %v1810_v35  ;;  %s6076_s2 = sld [smem:[#allocation53_spill]] }
 0x1a5   : > { %6009 = vst [vmem:[#allocation205_spill] sm:$0xff] %v4008_v47  ;;  %v6014_v7 = vstv %s5961_s23  ;;  %v4028_v37 = vadd.f32 %v3297_v55, %v1124_v20  ;;  %v1341_v10 = vadd.f32 %v1339_v38, %v3881_v16  ;;  %v6015_v5 = vstv %s5897_s0  ;;  %s6033_s0 = sld [smem:[#allocation111_spill]] }
 0x1a6   : > { %6012 = vst [vmem:[#allocation206_spill] sm:$0xff] %v4016_v41  ;;  %v1344_v57 = vmul.f32 %v6014_v7, %v528_v8  ;;  %v4034_v62 = vmul.f32 %v6015_v5, %v3833_v21  ;;  %v6016_v58 = vstv %s6010_s21  ;;  %v4046_v55 = vsel %vm496_vm11, %v487_v30, 0.0  ;;  %6065 = sst [smem:[#allocation25_spill]] %s4155_s17 }
 0x1a7   : > { %v4038_v40 = vmul.f32 %v6016_v58, %v541_v39  ;;  %v6019_v60 = vmov %v6016_v58  ;;  %v4049_v16 = vsel %vm496_vm11, %v473_v11, 0.0  ;;  %v1135_v21 = vadd.f32 %v3221_v29, %v1129_v56  ;;  %s4170_s23 = sld [smem:[#allocation3 + $0x14]] }
 0x1a8   : > { %v1346_v48 = vadd.f32 %v1344_v57, %v3887_v13  ;;  %v4043_v27 = vmul.f32 %v6019_v60, %v552_v28  ;;  %v1347_v39 = vadd.f32 %v1345_v12, %v1341_v10  ;;  %v5533_v8 = vrot.slane %v4046_v55, 7  ;;  %v477_v60 = vpop.permute.xlu1 %476  ;;  %s6088_s21 = sld [smem:[#allocation134_spill]] }
 0x1a9   : > { %6017 = vst [vmem:[#allocation207_spill] sm:$0xff] %v4038_v40  ;;  %v5532_v13 = vrot.slane %v4046_v55, 1  ;;  %v6021_v46 = vstv %s5775_s20  ;;  %v6023_v59 = vstv %s5777_s5  ;;  %v6025_v25 = vstv %s6018_s29  ;;  %s6103_s14 = sld [smem:[#allocation143_spill]] }
 0x1aa   : > { %6020 = vst [vmem:[#allocation208_spill] sm:$0xff] %v4043_v27  ;;  %v1352_v28 = vadd.f32 %v3338_v17, %v1346_v48  ;;  %v4058_v26 = vmul.f32 %v6021_v46, %v4046_v55  ;;  %v4063_v52 = vmul.f32 %v6023_v59, %v4046_v55  ;;  %v4068_v29 = vmul.f32 %v6025_v25, %v4046_v55 }
 0x1ab   : > { %v6027_v12 = vstv %s3255_s18  ;;  %v603_v17 = vrot.slane %v4049_v16, 7  ;;  %v627_v20 = vrot.slane %v4049_v16, 1  ;;  %v694_v15 = vadd.f32 %v3363_v32, %v688_v23  ;;  %s6114_s18 = sld [smem:[#allocation150_spill]] }
 0x1ac   : > { %6022 = vst [vmem:[#allocation209_spill] sm:$0xff] %v4058_v26  ;;  %6024 = vst [vmem:[#allocation210_spill] sm:$0xff] %v4063_v52  ;;  %v4073_v49 = vmul.f32 %v6027_v12, %v4046_v55  ;;  %v4079_v63 = vadd.f32 %v3341_v44, %v1347_v39  ;;  %v1358_v35 = vadd.f32 %v3241_v4, %v1352_v28  ;;  %v6034_v38 = vstv %s3279_s13 }
 0x1ad   : > { %6026 = vst [vmem:[#allocation211_spill] sm:$0xff] %v4068_v29  ;;  %v4085_v30 = vmul.f32 %v6034_v38, %v4049_v16  ;;  %v918_v11 = vadd.f32 %v3383_v61, %v912_v19  ;;  %v618_v56 = vsel %vm513_vm0, %v5533_v8, %v603_v17  ;;  %v642_v32 = vsel %vm538_vm1, %v5532_v13, %v627_v20 }
 0x1ae   : > { %6029 = vst [vmem:[#allocation212_spill] sm:$0xff] %v4073_v49  ;;  %v700_v4 = vadd.f32 %v3446_v3, %v694_v15  ;;  %v1141_v44 = vadd.f32 %v3404_v14, %v1135_v21  ;;  %v619_v23 = vsel %vm3023_vm4, %v618_v56, 0.0  ;;  %v650_v61 = vsel %vm3040_vm5, %v642_v32, 0.0  ;;  %v475_v32 = vpop.permute.xlu0 %474 }
 0x1af   : > { %v924_v19 = vadd.f32 %v3465_v31, %v918_v11  ;;  %v6039_v7 = vstv %s6028_s10  ;;  %v6041_v10 = vstv %s6030_s30  ;;  %v6042_v58 = vstv %s6031_s6 }
 0x1b0   : > { %v4106_v57 = vmul.f32 %v6039_v7, %v4049_v16  ;;  %v704_v5 = vmul.f32 %v6041_v10, %v619_v23  ;;  %v4112_v3 = vmul.f32 %v6042_v58, %v650_v61  ;;  %v6045_v14 = vstv %s6032_s24 }
 0x1b1   : > { %v928_v36 = vmul.f32 %v6045_v14, %v619_v23  ;;  %v6046_v48 = vstv %s6033_s0  ;;  %v6049_v21 = vstv %s6035_s22  ;;  %v1147_v39 = vadd.f32 %v3489_v54, %v1141_v44  ;;  %s4285_s22 = sld [smem:[#allocation3 + $0x65]] }
 0x1b2   : > { %6040 = vst [vmem:[#allocation213_spill] sm:$0xff] %v4106_v57  ;;  %6044 = vst [vmem:[#allocation214_spill] sm:$0xff] %v4112_v3  ;;  %v4119_v42 = vmul.f32 %v6046_v48, %v4049_v16  ;;  %v4123_v31 = vmul.f32 %v6049_v21, %v650_v61  ;;  %v6052_v28 = vstv %s6036_s26  ;;  %v1364_v59 = vadd.f32 %v3423_v2, %v1358_v35 }
 0x1b3   : > { %v1151_v46 = vmul.f32 %v6052_v28, %v619_v23  ;;  %v706_v25 = vadd.f32 %v704_v5, %v700_v4  ;;  %v930_v12 = vadd.f32 %v928_v36, %v924_v19  ;;  %v6055_v15 = vstv %s6037_s16  ;;  %s6111_s16 = sld [smem:[#allocation146_spill]] }
 0x1b4   : > { %6048 = vst [vmem:[#allocation215_spill] sm:$0xff] %v4119_v42  ;;  %6050 = vst [vmem:[#allocation216_spill] sm:$0xff] %v4123_v31  ;;  %v4131_v38 = vmul.f32 %v6055_v15, %v650_v61  ;;  %v6057_v11 = vstv %s6038_s9  ;;  %v1370_v10 = vadd.f32 %v3512_v1, %v1364_v59  ;;  %v6059_v54 = vstv %s6043_s28 }
 0x1b5   : > { %v1374_v56 = vmul.f32 %v6057_v11, %v619_v23  ;;  %v1153_v7 = vadd.f32 %v1151_v46, %v1147_v39  ;;  %v4139_v44 = vmul.f32 %v6059_v54, %v4049_v16  ;;  %v4142_v2 = vsel %vm496_vm11, %v477_v60, 0.0  ;;  %v6079_v54 = vld [vmem:[#allocation114_spill] sm:$0xff] }
 0x1b6   : > { %6056 = vst [vmem:[#allocation217_spill] sm:$0xff] %v4131_v38  ;;  %v6061_v35 = vstv %s6047_s8  ;;  %v5537_v19 = vrot.slane %v4142_v2, 7  ;;  %v5536_v23 = vrot.slane %v4142_v2, 1  ;;  %v6063_v5 = vstv %s6051_s1  ;;  %s4262_s8 = sld [smem:[#allocation3 + $0x1d]] }
 0x1b7   : > { %6060 = vst [vmem:[#allocation218_spill] sm:$0xff] %v4139_v44  ;;  %v4146_v4 = vmul.f32 %v6061_v35, %v650_v61  ;;  %v4153_v58 = vmul.f32 %v6063_v5, %v4142_v2  ;;  %v4157_v1 = vadd.f32 %v1374_v56, %v1370_v10  ;;  %v6066_v16 = vstv %s6053_s15 }
 0x1b8   : > { %v4162_v14 = vmul.f32 %v6066_v16, %v4142_v2  ;;  %v6068_v61 = vstv %s6054_s11  ;;  %v498_v48 = vsel %vm496_vm11, %v475_v32, 0.0  ;;  %v6070_v60 = vstv %s6058_s19 }
 0x1b9   : > { %6062 = vst [vmem:[#allocation219_spill] sm:$0xff] %v4146_v4  ;;  %6064 = vst [vmem:[#allocation220_spill] sm:$0xff] %v4153_v58  ;;  %v4167_v36 = vmul.f32 %v6068_v61, %v4142_v2  ;;  %v4175_v21 = vmul.f32 %v6070_v60, %v4142_v2  ;;  %v604_v39 = vrot.slane %v498_v48, 7  ;;  %v628_v28 = vrot.slane %v498_v48, 1 }
 0x1ba   : > { %6067 = vst [vmem:[#allocation221_spill] sm:$0xff] %v4162_v14  ;;  %v689_v46 = vadd.f32 %v3315_v34, %v4003_v53  ;;  %v6072_v59 = vstv %s3279_s13  ;;  %v913_v11 = vadd.f32 %v3320_v18, %v4021_v51  ;;  %v6075_v56 = vstv %s6028_s10  ;;  %s6078_s13 = sld [smem:[#allocation55_spill]] }
 0x1bb   : > { %6069 = vst [vmem:[#allocation222_spill] sm:$0xff] %v4167_v36  ;;  %6071 = vst [vmem:[#allocation223_spill] sm:$0xff] %v4175_v21  ;;  %v4183_v15 = vmul.f32 %v6072_v59, %v498_v48  ;;  %v4189_v32 = vmul.f32 %v6075_v56, %v498_v48  ;;  %v1136_v10 = vadd.f32 %v3331_v6, %v4028_v37  ;;  %v6081_v35 = vstv %s6033_s0  ;;  %s4229_s10 = sld [smem:[#allocation3 + $0x59]]  ;;  %v6089_v59 = vld [vmem:[#allocation130_spill] sm:$0xff] }
 0x1bc   : > { %v616_v34 = vsel %vm513_vm0, %v604_v39, %v5537_v19  ;;  %v617_v53 = vsel %vm513_vm0, %v603_v17, %v604_v39  ;;  %v640_v18 = vsel %vm538_vm1, %v628_v28, %v5536_v23  ;;  %v641_v6 = vsel %vm538_vm1, %v627_v20, %v628_v28  ;;  %s4240_s0 = sld [smem:[#allocation3 + $0x80]] }
 0x1bd   : > { %6073 = vst [vmem:[#allocation224_spill] sm:$0xff] %v4183_v15  ;;  %6077 = vst [vmem:[#allocation225_spill] sm:$0xff] %v4189_v32  ;;  %v621_v51 = vsel %vm3015_vm3, %v616_v34, 0.0  ;;  %v644_v37 = vsel %vm2996_vm2, %v640_v18, 0.0  ;;  %v695_v17 = vadd.f32 %v6079_v54, %v689_v46  ;;  %v4216_v5 = vmul.f32 %v6081_v35, %v498_v48 }
 0x1be   : > { %v6083_v16 = vstv %s6030_s30  ;;  %v6084_v60 = vstv %s6074_s7  ;;  %v6085_v39 = vstv %s6076_s2  ;;  %v919_v24 = vadd.f32 %v6087_v33, %v913_v11  ;;  %s6094_s30 = sld [smem:[#allocation62_spill]] }
 0x1bf   : > { %6082 = vst [vmem:[#allocation114_spill] sm:$0xff] %v4216_v5  ;;  %v705_v61 = vmul.f32 %v6083_v16, %v617_v53  ;;  %v710_v20 = vmul.f32 %v6084_v60, %v621_v51  ;;  %v4226_v28 = vmul.f32 %v6085_v39, %v641_v6  ;;  %v701_v46 = vadd.f32 %v6089_v59, %v695_v17  ;;  %v6098_v17 = vld [vmem:[#allocation123_spill] sm:$0xff]  ;;  %s4250_s2 = sld [smem:[#allocation3 + $0x7d]] }
 0x1c0   : > { %v6090_v56 = vmov %v6085_v39  ;;  %v6092_v18 = vstv %s6032_s24  ;;  %v6093_v35 = vstv %s6078_s13  ;;  %v6095_v39 = vld [vmem:[#allocation133_spill] sm:$0xff]  ;;  %v6096_v11 = vstv %s6080_s27  ;;  %s6100_s24 = sld [smem:[#allocation63_spill]] }
 0x1c1   : > { %6086 = vst [vmem:[#allocation226_spill] sm:$0xff] %v4226_v28  ;;  %v4234_v34 = vmul.f32 %v6090_v56, %v644_v37  ;;  %v929_v54 = vmul.f32 %v6092_v18, %v617_v53  ;;  %v934_v16 = vmul.f32 %v6093_v35, %v621_v51  ;;  %v4242_v60 = vadd.f32 %v710_v20, %v706_v25  ;;  %s4273_s27 = sld [smem:[#allocation3 + $0x41]] }
 0x1c2   : > { %v925_v13 = vadd.f32 %v6095_v39, %v919_v24  ;;  %v4247_v33 = vmul.f32 %v6096_v11, %v641_v6  ;;  %v1142_v59 = vadd.f32 %v6098_v17, %v1136_v10  ;;  %v4252_v56 = vadd.f32 %v705_v61, %v701_v46  ;;  %v6104_v10 = vld [vmem:[#allocation139_spill] sm:$0xff] }
 0x1c3   : > { %6091 = vst [vmem:[#allocation119_spill] sm:$0xff] %v4234_v34  ;;  %v4254_v18 = vadd.f32 %v934_v16, %v930_v12  ;;  %v6099_v35 = vmov %v6096_v11  ;;  %v6102_v25 = vstv %s6088_s21  ;;  %v6105_v11 = vstv %s6036_s26  ;;  %v481_v16 = vpop.permute.xlu1 %480  ;;  %s6113_s26 = sld [smem:[#allocation148_spill]] }
 0x1c4   : > { %6097 = vst [vmem:[#allocation130_spill] sm:$0xff] %v4247_v33  ;;  %v4258_v8 = vmul.f32 %v6099_v35, %v644_v37  ;;  %v1157_v20 = vmul.f32 %v6102_v25, %v621_v51  ;;  %v4264_v24 = vadd.f32 %v929_v54, %v925_v13  ;;  %v1148_v39 = vadd.f32 %v6104_v10, %v1142_v59  ;;  %v6110_v13 = vld [vmem:[#allocation109_spill] sm:$0xff] }
 0x1c5   : > { %v1152_v61 = vmul.f32 %v6105_v11, %v617_v53  ;;  %v6106_v46 = vstv %s6094_s30  ;;  %v1359_v54 = vadd.f32 %v6110_v13, %v4079_v63  ;;  %v6112_v59 = vstv %s6038_s9  ;;  %s4299_s30 = sld [smem:[#allocation3 + $0x89]]  ;;  %v6120_v63 = vld [vmem:[#allocation128_spill] sm:$0xff] }
 0x1c6   : > { %6101 = vst [vmem:[#allocation133_spill] sm:$0xff] %v4258_v8  ;;  %v4271_v12 = vmul.f32 %v6106_v46, %v641_v6  ;;  %v4275_v17 = vadd.f32 %v1157_v20, %v1153_v7  ;;  %v6108_v35 = vmov %v6106_v46  ;;  %v1375_v10 = vmul.f32 %v6112_v59, %v617_v53  ;;  %s4349_s9 = sld [smem:[#allocation3 + $0xd]] }
 0x1c7   : > { %v4279_v25 = vmul.f32 %v6108_v35, %v644_v37  ;;  %v4287_v11 = vadd.f32 %v1152_v61, %v1148_v39  ;;  %v6115_v46 = vstv %s6100_s24  ;;  %v6116_v7 = vstv %s6043_s28  ;;  %s4356_s28 = sld [smem:[#allocation3 + $0x16]] }
 0x1c8   : > { %6107 = vst [vmem:[#allocation123_spill] sm:$0xff] %v4271_v12  ;;  %v1380_v23 = vmul.f32 %v6115_v46, %v621_v51  ;;  %v4293_v20 = vmul.f32 %v6116_v7, %v498_v48  ;;  %v6118_v35 = vstv %s6103_s14  ;;  %v1365_v53 = vadd.f32 %v6120_v63, %v1359_v54  ;;  %s4343_s14 = sld [smem:[#allocation3 + $0x4]] }
 0x1c9   : > { %6109 = vst [vmem:[#allocation139_spill] sm:$0xff] %v4279_v25  ;;  %v4297_v19 = vmul.f32 %v6118_v35, %v641_v6  ;;  %v6121_v13 = vmov %v6118_v35  ;;  %v5538_v61 = vstv %s4155_s17  ;;  %v4308_v51 = vsel %vm496_vm11, %v481_v16, 0.0  ;;  %s4484_s17 = sld [smem:[#allocation3 + $0x5e]] }
 0x1ca   : > { %6117 = vst [vmem:[#allocation109_spill] sm:$0xff] %v4293_v20  ;;  %v4304_v39 = vmul.f32 %v6121_v13, %v644_v37  ;;  %v4311_v48 = vadd.f32 %v1380_v23, %v4157_v1  ;;  %v6123_v54 = vstv %s6111_s16  ;;  %v6125_v37 = vld [vmem:[#allocation142_spill] sm:$0xff]  ;;  %v6126_v35 = vstv %s6113_s26  ;;  %v479_v13 = vpop.permute.xlu0 %478 }
 0x1cb   : > { %6119 = vst [vmem:[#allocation227_spill] sm:$0xff] %v4297_v19  ;;  %v4318_v46 = vmul.f32 %v6123_v54, %v4308_v51  ;;  %v1371_v7 = vadd.f32 %v6125_v37, %v1365_v53  ;;  %v4324_v16 = vmul.f32 %v6126_v35, %v4308_v51  ;;  %v6128_v23 = vstv %s6114_s18  ;;  %v485_v35 = vpop.permute.xlu1 %484 }
 0x1cc   : > { %6122 = vst [vmem:[#allocation128_spill] sm:$0xff] %v4304_v39  ;;  %v4329_v1 = vmul.f32 %v6128_v23, %v4308_v51  ;;  %v4334_v63 = vmul.f32 %v5538_v61, %v4308_v51  ;;  %v853_v54 = vstv %s4179_s3  ;;  %v1077_v37 = vstv %s4207_s25  ;;  %s4421_s3 = sld [smem:[#allocation3 + $0x3a]] }
 0x1cd   : > { %6124 = vst [vmem:[#allocation228_spill] sm:$0xff] %v4318_v46  ;;  %6127 = vst [vmem:[#allocation142_spill] sm:$0xff] %v4324_v16  ;;  %v1377_v6 = vadd.f32 %v1375_v10, %v1371_v7  ;;  %v1300_v4 = vstv %s4229_s10  ;;  %v1523_v23 = vstv %s4250_s2  ;;  %v500_v61 = vsel %vm496_vm11, %v479_v13, 0.0  ;;  %s4456_s25 = sld [smem:[#allocation3 + $0x4c]] }
 0x1ce   : > { %6129 = vst [vmem:[#allocation229_spill] sm:$0xff] %v4329_v1  ;;  %6130 = vst [vmem:[#allocation230_spill] sm:$0xff] %v4334_v63  ;;  %v606_v39 = vrot.slane %v500_v61, 7  ;;  %v630_v53 = vrot.slane %v500_v61, 1  ;;  %v6131_v19 = vstv %s6051_s1  ;;  %v6133_v38 = vstv %s6053_s15  ;;  %s4371_s1 = sld [smem:[#allocation3 + $0x1f]]  ;;  %v483_v14 = vpop.permute.xlu0 %482 }
 0x1cf   : > { %v4353_v10 = vmul.f32 %v6131_v19, %v500_v61  ;;  %v4360_v3 = vmul.f32 %v6133_v38, %v500_v61  ;;  %v6135_v25 = vstv %s6054_s11  ;;  %v6137_v59 = vstv %s6058_s19  ;;  %s4389_s15 = sld [smem:[#allocation3 + $0x1a]] }
 0x1d0   : > { %v4364_v13 = vmul.f32 %v6135_v25, %v500_v61  ;;  %v4368_v31 = vmul.f32 %v6137_v59, %v500_v61  ;;  %v6139_v19 = vrot.slane %v4308_v51, 7  ;;  %v6140_v8 = vrot.slane %v4142_v2, 7  ;;  %s4400_s11 = sld [smem:[#allocation3 + $0x28]] }
 0x1d1   : > { %6132 = vst [vmem:[#allocation231_spill] sm:$0xff] %v4353_v10  ;;  %6134 = vst [vmem:[#allocation232_spill] sm:$0xff] %v4360_v3  ;;  %v6141_v25 = vrot.slane %v4308_v51, 1  ;;  %v6142_v59 = vrot.slane %v4142_v2, 1  ;;  %v4398_v28 = vsel %vm496_vm11, %v485_v35, 0.0  ;;  %v6145_v2 = vstv %s4170_s23  ;;  %s4410_s19 = sld [smem:[#allocation3 + $0x31]] }
 0x1d2   : > { %6136 = vst [vmem:[#allocation233_spill] sm:$0xff] %v4364_v13  ;;  %6138 = vst [vmem:[#allocation234_spill] sm:$0xff] %v4368_v31  ;;  %v614_v7 = vsel %vm513_vm0, %v606_v39, %v6139_v19  ;;  %v615_v38 = vsel %vm513_vm0, %v6140_v8, %v606_v39  ;;  %v6144_v8 = vstv %s6074_s7  ;;  %s4433_s7 = sld [smem:[#allocation3 + $0x43]]  ;;  %v987_v31 = vstv %s4421_s3 }
 0x1d3   : > { %v638_v61 = vsel %vm538_vm1, %v630_v53, %v6141_v25  ;;  %v639_v12 = vsel %vm538_vm1, %v6142_v59, %v630_v53  ;;  %v623_v19 = vsel %vm3096_vm6, %v614_v7, 0.0  ;;  %v711_v39 = vmul.f32 %v6144_v8, %v615_v38  ;;  %s4464_s10 = sld [smem:[#allocation3 + $0x55]] }
 0x1d4   : > { %v646_v33 = vsel %vm3107_vm7, %v638_v61, 0.0  ;;  %v716_v25 = vmul.f32 %v6145_v2, %v623_v19  ;;  %v4404_v27 = vmul.f32 %v853_v54, %v639_v12  ;;  %v6148_v59 = vstv %s6078_s13  ;;  %s4445_s13 = sld [smem:[#allocation3 + $0x3e]] }
 0x1d5   : > { %v4406_v53 = vmul.f32 %v853_v54, %v646_v33  ;;  %v935_v0 = vmul.f32 %v6148_v59, %v615_v38  ;;  %v4413_v34 = vadd.f32 %v711_v39, %v4252_v56  ;;  %v6149_v7 = vstv %s4193_s4  ;;  %s6161_s2 = sld [smem:[#allocation108_spill]] }
 0x1d6   : > { %6146 = vst [vmem:[#allocation90_spill] sm:$0xff] %v4404_v27  ;;  %v940_v61 = vmul.f32 %v6149_v7, %v623_v19  ;;  %v4417_v35 = vmul.f32 %v1077_v37, %v639_v12  ;;  %v6151_v8 = vstv %s6088_s21  ;;  %v4424_v54 = vadd.f32 %v716_v25, %v4242_v60  ;;  %s6160_s21 = sld [smem:[#allocation66_spill]]  ;;  %v6187_v27 = vld [vmem:[#allocation167_spill] sm:$0xff] }
 0x1d7   : > { %6147 = vst [vmem:[#allocation235_spill] sm:$0xff] %v4406_v53  ;;  %v1158_v40 = vmul.f32 %v6151_v8, %v615_v38  ;;  %v4427_v2 = vadd.f32 %v935_v0, %v4264_v24  ;;  %v4429_v59 = vmul.f32 %v1077_v37, %v646_v33  ;;  %v6153_v53 = vstv %s4218_s12  ;;  %s4915_s3 = sld [smem:[#allocation8 + $0x30]] }
 0x1d8   : > { %6150 = vst [vmem:[#allocation236_spill] sm:$0xff] %v4417_v35  ;;  %v1163_v56 = vmul.f32 %v6153_v53, %v623_v19  ;;  %v4436_v39 = vadd.f32 %v940_v61, %v4254_v18  ;;  %v4441_v8 = vmul.f32 %v1300_v4, %v639_v12  ;;  %v6155_v60 = vstv %s6100_s24  ;;  %s6165_s24 = sld [smem:[#allocation112_spill]] }
 0x1d9   : > { %6152 = vst [vmem:[#allocation237_spill] sm:$0xff] %v4429_v59  ;;  %v4439_v7 = vadd.f32 %v1158_v40, %v4287_v11  ;;  %v1381_v24 = vmul.f32 %v6155_v60, %v615_v38  ;;  %v4450_v25 = vmul.f32 %v1300_v4, %v646_v33  ;;  %v6157_v53 = vstv %s4240_s0 }
 0x1da   : > { %6154 = vst [vmem:[#allocation238_spill] sm:$0xff] %v4441_v8  ;;  %v4448_v37 = vadd.f32 %v1163_v56, %v4275_v17  ;;  %v1386_v18 = vmul.f32 %v6157_v53, %v623_v19  ;;  %v4454_v0 = vmul.f32 %v1523_v23, %v639_v12  ;;  %v4460_v11 = vmul.f32 %v1523_v23, %v646_v33 }
 0x1db   : > { %6156 = vst [vmem:[#allocation239_spill] sm:$0xff] %v4450_v25  ;;  %v4458_v40 = vadd.f32 %v1381_v24, %v1377_v6  ;;  %v5540_v17 = vrot.slane %v4398_v28, 7  ;;  %v5541_v4 = vrot.slane %v4398_v28, 1  ;;  %v6162_v38 = vstv %s5775_s20  ;;  %s6170_s20 = sld [smem:[#allocation28_spill]] }
 0x1dc   : > { %6158 = vst [vmem:[#allocation240_spill] sm:$0xff] %v4454_v0  ;;  %6159 = vst [vmem:[#allocation241_spill] sm:$0xff] %v4460_v11  ;;  %v4467_v12 = vadd.f32 %v1386_v18, %v4311_v48  ;;  %v4472_v6 = vmul.f32 %v6162_v38, %v4398_v28  ;;  %v6164_v33 = vstv %s5777_s5  ;;  %v6167_v19 = vstv %s6018_s29  ;;  %s4502_s5 = sld [smem:[#allocation3 + $0x67]] }
 0x1dd   : > { %v4477_v23 = vmul.f32 %v6164_v33, %v4398_v28  ;;  %v4482_v61 = vmul.f32 %v6167_v19, %v4398_v28  ;;  %v6169_v48 = vrot.slane %v4046_v55, 7  ;;  %v6171_v60 = vrot.slane %v4046_v55, 1  ;;  %s4522_s29 = sld [smem:[#allocation3 + $0x62]] }
 0x1de   : > { %6163 = vst [vmem:[#allocation242_spill] sm:$0xff] %v4472_v6  ;;  %v757_v18 = vstv %s4349_s9  ;;  %v6173_v38 = vstv %s4262_s8  ;;  %v6174_v19 = vstv %s6031_s6  ;;  %v6179_v53 = vstv %s6161_s2  ;;  %s6185_s6 = sld [smem:[#allocation32_spill]] }
 0x1df   : > { %6166 = vst [vmem:[#allocation243_spill] sm:$0xff] %v4477_v23  ;;  %6168 = vst [vmem:[#allocation244_spill] sm:$0xff] %v4482_v61  ;;  %v611_v56 = vsel %vm513_vm0, %v5540_v17, %v6169_v48  ;;  %v4498_v24 = vsel %vm538_vm1, %v5541_v4, %v6171_v60  ;;  %v6176_v48 = vstv %s4273_s27  ;;  %v6177_v60 = vstv %s6160_s21  ;;  %s4542_s9 = sld [smem:[#allocation3 + $0x70]] }
 0x1e0   : > { %6172 = vst [vmem:[#allocation245_spill] sm:$0xff] %v4498_v24  ;;  %v4506_v33 = vmul.f32 %v6173_v38, %v611_v56  ;;  %v4511_v55 = vmul.f32 %v6174_v19, %v4498_v24  ;;  %v4515_v17 = vmul.f32 %v6176_v48, %v611_v56  ;;  %v4520_v4 = vmul.f32 %v6177_v60, %v4398_v28  ;;  %s4556_s21 = sld [smem:[#allocation3 + $0x79]] }
 0x1e1   : > { %v4527_v38 = vmul.f32 %v6179_v53, %v4498_v24  ;;  %v6181_v11 = vstv %s4285_s22  ;;  %v6182_v19 = vstv %s6165_s24  ;;  %v2500_v60 = vld [vmem:[%s6170_s20 + $0x8] sm:$0xff]  ;;  %v6186_v8 = vstv %s4343_s14  ;;  %s4570_s2 = sld [smem:[#allocation3 + $0x82]] }
 0x1e2   : > { %6175 = vst [vmem:[#allocation246_spill] sm:$0xff] %v4511_v55  ;;  %6178 = vst [vmem:[#allocation247_spill] sm:$0xff] %v4520_v4  ;;  %v4531_v0 = vmul.f32 %v6181_v11, %v611_v56  ;;  %v4536_v48 = vmul.f32 %v6182_v19, %v4498_v24  ;;  %v6184_v55 = vstv %s4299_s30  ;;  %v4547_v59 = vmul.f32 %v2500_v60, %v6186_v8  ;;  %v2501_v53 = vld [vmem:[%s6170_s20 + $0x10] sm:$0xff]  ;;  %v2504_v8 = vld [vmem:[%s6170_s20 + $0x28] sm:$0xff]  ;;  %s4580_s24 = sld [smem:[#allocation3 + $0x8b]] }
 0x1e3   : > { %6180 = vst [vmem:[#allocation248_spill] sm:$0xff] %v4527_v38  ;;  %v4540_v25 = vmul.f32 %v6184_v55, %v611_v56  ;;  %v4550_v11 = vmul.f32 %v2501_v53, %v757_v18  ;;  %v2502_v38 = vld [vmem:[%s6170_s20 + $0x18] sm:$0xff]  ;;  %v763_v24 = vstv %s4356_s28  ;;  %v2503_v56 = vld [vmem:[%s6170_s20 + $0x20] sm:$0xff]  ;;  %v769_v35 = vstv %s4371_s1  ;;  %s6190_s28 = sld [smem:[#allocation35_spill]] }
 0x1e4   : > { %6183 = vst [vmem:[#allocation249_spill] sm:$0xff] %v4536_v48  ;;  %v4553_v19 = vmul.f32 %v2502_v38, %v757_v18  ;;  %v4559_v55 = vmul.f32 %v2503_v56, %v763_v24  ;;  %v4562_v48 = vmul.f32 %v2504_v8, %v763_v24  ;;  %v6188_v41 = vstv %s6185_s6  ;;  %v2505_v18 = vld [vmem:[%s6170_s20 + $0x30] sm:$0xff]  ;;  %v2506_v49 = vld [vmem:[%s6170_s20 + $0x38] sm:$0xff]  ;;  %s4587_s1 = sld [smem:[#allocation3 + $0x86]] }
 0x1e5   : > { %v4568_v47 = vmul.f32 %v6188_v41, %v6187_v27  ;;  %v4573_v50 = vmul.f32 %v2505_v18, %v769_v35  ;;  %v4576_v4 = vmul.f32 %v2506_v49, %v769_v35  ;;  %v975_v63 = vstv %s4400_s11  ;;  %s6191_s11 = sld [smem:[#allocation38_spill]] }
 0x1e6   : > { %v4582_v24 = vmul.f32 %v2500_v60, %v975_v63  ;;  %v981_v41 = vstv %s4410_s19  ;;  %v993_v29 = vstv %s4433_s7  ;;  %v4593_v61 = vmul.f32 %v2503_v56, %v987_v31  ;;  %s6194_s19 = sld [smem:[#allocation41_spill]] }
 0x1e7   : > { %6189 = vst [vmem:[#allocation167_spill] sm:$0xff] %v4568_v47  ;;  %v4589_v47 = vmul.f32 %v2501_v53, %v981_v41  ;;  %v4591_v35 = vmul.f32 %v2502_v38, %v981_v41  ;;  %v4595_v45 = vmul.f32 %v2504_v8, %v987_v31  ;;  %v4597_v52 = vmul.f32 %v2505_v18, %v993_v29  ;;  %s4921_s7 = sld [smem:[#allocation8 + $0x34]] }
 0x1e8   : > { %v4599_v21 = vmul.f32 %v2506_v49, %v993_v29  ;;  %v1083_v1 = vstv %s4445_s13  ;;  %v1198_v41 = vstv %s4456_s25  ;;  %v1204_v23 = vstv %s4464_s10  ;;  %s4927_s13 = sld [smem:[#allocation8 + $0x38]] }
 0x1e9   : > { %v6192_v20 = vstv %s6190_s28  ;;  %v1210_v6 = vstv %s4484_s17  ;;  %v1216_v44 = vstv %s4502_s5  ;;  %v4611_v31 = vmul.f32 %v2500_v60, %v1198_v41  ;;  %s4854_s17 = sld [smem:[#allocation8 + $0x8]] }
 0x1ea   : > { %v4604_v26 = vmul.f32 %v6192_v20, %v6187_v27  ;;  %v4613_v13 = vmul.f32 %v2501_v53, %v1204_v23  ;;  %v4615_v36 = vmul.f32 %v2502_v38, %v1204_v23  ;;  %v4617_v29 = vmul.f32 %v2503_v56, %v1210_v6  ;;  %s4933_s25 = sld [smem:[#allocation8 + $0x3c]] }
 0x1eb   : > { %v4619_v16 = vmul.f32 %v2504_v8, %v1210_v6  ;;  %v4621_v20 = vmul.f32 %v2505_v18, %v1216_v44  ;;  %v6197_v3 = vstv %s6191_s11  ;;  %v1306_v5 = vstv %s4522_s29  ;;  %s4939_s10 = sld [smem:[#allocation9 + $0x1]] }
 0x1ec   : > { %6193 = vst [vmem:[#allocation250_spill] sm:$0xff] %v4604_v26  ;;  %v4623_v26 = vmul.f32 %v2506_v49, %v1216_v44  ;;  %v4628_v46 = vmul.f32 %v6197_v3, %v6187_v27  ;;  %v1421_v10 = vstv %s4542_s9  ;;  %v1427_v23 = vstv %s4556_s21  ;;  %s4951_s5 = sld [smem:[#allocation8 + $0x5]] }
 0x1ed   : > { %6195 = vst [vmem:[#allocation251_spill] sm:$0xff] %v4621_v20  ;;  %v1433_v42 = vstv %s4570_s2  ;;  %v4634_v32 = vmul.f32 %v2500_v60, %v1421_v10  ;;  %v4636_v6 = vmul.f32 %v2501_v53, %v1427_v23  ;;  %v4638_v58 = vmul.f32 %v2502_v38, %v1427_v23  ;;  %v2507_v38 = vld [vmem:[%s6170_s20] sm:$0xff]  ;;  %s4945_s20 = sld [smem:[#allocation8 + $0x1]] }
 0x1ee   : > { %6196 = vst [vmem:[#allocation252_spill] sm:$0xff] %v4623_v26  ;;  %6198 = vst [vmem:[#allocation253_spill] sm:$0xff] %v4628_v46  ;;  %v4640_v44 = vmul.f32 %v2503_v56, %v1433_v42  ;;  %v4642_v3 = vmul.f32 %v2504_v8, %v1433_v42  ;;  %v1439_v46 = vstv %s4580_s24  ;;  %v6199_v26 = vstv %s6194_s19  ;;  %s4957_s29 = sld [smem:[#allocation8 + $0x9]] }
 0x1ef   : > { %v4648_v15 = vmul.f32 %v6199_v26, %v6187_v27  ;;  %v4651_v57 = vmul.f32 %v2505_v18, %v1439_v46  ;;  %v4653_v60 = vmul.f32 %v2506_v49, %v1439_v46  ;;  %v4656_v53 = vsel %vm496_vm11, %v483_v14, 0.0  ;;  %s4963_s6 = sld [smem:[#allocation8 + $0xd]] }
 0x1f0   : > { %6203 = vst [vmem:[#allocation257_spill] sm:$0xff] %v4656_v53  ;;  %v6204_v23 = vstv %s4343_s14  ;;  %v608_v42 = vrot.slane %v4656_v53, 7  ;;  %v632_v27 = vrot.slane %v4656_v53, 1  ;;  %v6205_v26 = vstv %s6111_s16  ;;  %s6287_s16 = sld [smem:[#allocation25_spill]] }
 0x1f1   : > { %6200 = vst [vmem:[#allocation254_spill] sm:$0xff] %v4648_v15  ;;  %6201 = vst [vmem:[#allocation255_spill] sm:$0xff] %v4651_v57  ;;  %v4661_v56 = vmul.f32 %v2507_v38, %v6204_v23  ;;  %v4668_v8 = vmul.f32 %v6205_v26, %v4656_v53  ;;  %v4670_v49 = vmul.f32 %v2507_v38, %v975_v63  ;;  %v6207_v14 = vstv %s6113_s26  ;;  %s4891_s26 = sld [smem:[#allocation8 + $0x20]] }
 0x1f2   : > { %6202 = vst [vmem:[#allocation256_spill] sm:$0xff] %v4653_v60  ;;  %v4675_v46 = vmul.f32 %v6207_v14, %v4656_v53  ;;  %v4677_v18 = vmul.f32 %v2507_v38, %v1198_v41  ;;  %v6209_v23 = vstv %s6114_s18  ;;  %v4684_v15 = vmul.f32 %v2507_v38, %v1421_v10  ;;  %s4836_s18 = sld [smem:[#allocation9]] }
 0x1f3   : > { %6206 = vst [vmem:[#allocation258_spill] sm:$0xff] %v4668_v8  ;;  %v4682_v20 = vmul.f32 %v6209_v23, %v4656_v53  ;;  %v6211_v60 = vrot.slane %v4398_v28, 7  ;;  %v6212_v26 = vrot.slane %v4308_v51, 7  ;;  %v6213_v41 = vrot.slane %v4398_v28, 1  ;;  %s4903_s14 = sld [smem:[#allocation8 + $0x28]] }
 0x1f4   : > { %6208 = vst [vmem:[#allocation259_spill] sm:$0xff] %v4675_v46  ;;  %v6214_v23 = vrot.slane %v4308_v51, 1  ;;  %v6220_v28 = vstv %s4389_s15  ;;  %v6226_v57 = vstv %s4273_s27  ;;  %s4885_s27 = sld [smem:[#allocation8 + $0x1c]] }
 0x1f5   : > { %6210 = vst [vmem:[#allocation260_spill] sm:$0xff] %v4682_v20  ;;  %v612_v63 = vsel %vm513_vm0, %v608_v42, %v6211_v60  ;;  %v613_v14 = vsel %vm513_vm0, %v6212_v26, %v608_v42  ;;  %v636_v46 = vsel %vm538_vm1, %v632_v27, %v6213_v41  ;;  %v6219_v42 = vstv %s4170_s23  ;;  %s4860_s23 = sld [smem:[#allocation8 + $0xc]] }
 0x1f6   : > { %v4702_v10 = vsel %vm538_vm1, %v6214_v23, %v632_v27  ;;  %v625_v60 = vsel %vm3149_vm8, %v612_v63, 0.0  ;;  %v4708_v20 = vsel %vm3157_vm9, %v636_v46, 0.0  ;;  %v717_v26 = vmul.f32 %v6219_v42, %v613_v14  ;;  %s4909_s15 = sld [smem:[#allocation8 + $0x2c]] }
 0x1f7   : > { %6215 = vst [vmem:[#allocation261_spill] sm:$0xff] %v4702_v10  ;;  %6218 = vst [vmem:[#allocation92_spill] sm:$0xff] %v4708_v20  ;;  %v4715_v8 = vmul.f32 %v6220_v28, %v4702_v10  ;;  %v6222_v41 = vstv %s4262_s8  ;;  %v6223_v9 = vmov %v6220_v28  ;;  %v6225_v23 = vstv %s4193_s4  ;;  %s4848_s8 = sld [smem:[#allocation8 + $0x4]] }
 0x1f8   : > { %v722_v51 = vmul.f32 %v6222_v41, %v625_v60  ;;  %v4722_v27 = vmul.f32 %v6223_v9, %v4708_v20  ;;  %v941_v38 = vmul.f32 %v6225_v23, %v613_v14  ;;  %v946_v63 = vmul.f32 %v6226_v57, %v625_v60  ;;  %s4868_s4 = sld [smem:[#allocation8 + $0x10]] }
 0x1f9   : > { %6221 = vst [vmem:[#allocation93_spill] sm:$0xff] %v4715_v8  ;;  %v719_v53 = vadd.f32 %v717_v26, %v4413_v34  ;;  %v4730_v46 = vmul.f32 %v1083_v1, %v4702_v10  ;;  %v4733_v42 = vmul.f32 %v1083_v1, %v4708_v20  ;;  %v6229_v28 = vstv %s4218_s12  ;;  %s4874_s12 = sld [smem:[#allocation8 + $0x14]] }
 0x1fa   : > { %6224 = vst [vmem:[#allocation262_spill] sm:$0xff] %v4722_v27  ;;  %v1164_v8 = vmul.f32 %v6229_v28, %v613_v14  ;;  %v724_v41 = vadd.f32 %v722_v51, %v4424_v54  ;;  %v943_v9 = vadd.f32 %v941_v38, %v4427_v2  ;;  %v948_v23 = vadd.f32 %v946_v63, %v4436_v39  ;;  %v6233_v28 = vld [vmem:[#allocation155_spill] sm:$0xff]  ;;  %v6234_v51 = vld [vmem:[#allocation156_spill] sm:$0xff]  ;;  %s4969_s9 = sld [smem:[#allocation8 + $0x11]] }
 0x1fb   : > { %6227 = vst [vmem:[#allocation263_spill] sm:$0xff] %v4730_v46  ;;  %6228 = vst [vmem:[#allocation264_spill] sm:$0xff] %v4733_v42  ;;  %v6230_v27 = vstv %s4285_s22  ;;  %v725_v34 = vadd.f32 %v4506_v33, %v719_v53  ;;  %v4745_v46 = vmul.f32 %v1306_v5, %v4702_v10  ;;  %v4748_v1 = vmul.f32 %v1306_v5, %v4708_v20  ;;  %v6235_v38 = vld [vmem:[#allocation151_spill] sm:$0xff]  ;;  %v6239_v5 = vld [vmem:[#allocation152_spill] sm:$0xff]  ;;  %s4842_s22 = sld [smem:[#allocation8]] }
 0x1fc   : > { %v1169_v57 = vmul.f32 %v6230_v27, %v625_v60  ;;  %v1166_v26 = vadd.f32 %v1164_v8, %v4439_v7  ;;  %v730_v42 = vadd.f32 %v6233_v28, %v724_v41  ;;  %v949_v54 = vadd.f32 %v4515_v17, %v943_v9  ;;  %v6238_v10 = vld [vmem:[#allocation163_spill] sm:$0xff]  ;;  %v6241_v28 = vld [vmem:[#allocation157_spill] sm:$0xff]  ;;  %v6242_v9 = vld [vmem:[#allocation180_spill] sm:$0xff]  ;;  %s4981_s21 = sld [smem:[#allocation8 + $0x15]] }
 0x1fd   : > { %6231 = vst [vmem:[#allocation265_spill] sm:$0xff] %v4745_v46  ;;  %6232 = vst [vmem:[#allocation266_spill] sm:$0xff] %v4748_v1  ;;  %v954_v2 = vadd.f32 %v6234_v51, %v948_v23  ;;  %v731_v27 = vadd.f32 %v6235_v38, %v725_v34  ;;  %v6236_v63 = vstv %s4240_s0  ;;  %v6237_v8 = vstv %s4299_s30  ;;  %v6240_v1 = vld [vmem:[#allocation164_spill] sm:$0xff]  ;;  %v6243_v51 = vld [vmem:[#allocation153_spill] sm:$0xff]  ;;  %s4879_s0 = sld [smem:[#allocation8 + $0x18]] }
 0x1fe   : > { %v1171_v39 = vadd.f32 %v1169_v57, %v4448_v37  ;;  %v1172_v33 = vadd.f32 %v4531_v0, %v1166_v26  ;;  %v1387_v7 = vmul.f32 %v6236_v63, %v613_v14  ;;  %v1392_v53 = vmul.f32 %v6237_v8, %v625_v60  ;;  %v6244_v34 = vld [vmem:[#allocation176_spill] sm:$0xff]  ;;  %v6245_v26 = vld [vmem:[#allocation181_spill] sm:$0xff]  ;;  %v6250_v8 = vld [vmem:[#allocation158_spill] sm:$0xff]  ;;  %s4897_s30 = sld [smem:[#allocation8 + $0x24]] }
 0x1ff   : > { %v736_v46 = vadd.f32 %v6238_v10, %v730_v42  ;;  %v955_v20 = vadd.f32 %v6239_v5, %v949_v54  ;;  %v960_v41 = vadd.f32 %v6240_v1, %v954_v2  ;;  %v737_v23 = vadd.f32 %v6242_v9, %v731_v27  ;;  %v6246_v38 = vld [vmem:[#allocation177_spill] sm:$0xff]  ;;  %v6248_v63 = vld [vmem:[#allocation200_spill] sm:$0xff]  ;;  %v6249_v2 = vld [vmem:[#allocation182_spill] sm:$0xff]  ;;  %s4987_s2 = sld [smem:[#allocation8 + $0x19]] }
 0x200   : > { %v1177_v17 = vadd.f32 %v6241_v28, %v1171_v39  ;;  %v1178_v37 = vadd.f32 %v6243_v51, %v1172_v33  ;;  %v1389_v57 = vadd.f32 %v1387_v7, %v4458_v40  ;;  %v1394_v0 = vadd.f32 %v1392_v53, %v4467_v12  ;;  %v6247_v42 = vld [vmem:[#allocation165_spill] sm:$0xff]  ;;  %v6251_v5 = vld [vmem:[#allocation192_spill] sm:$0xff]  ;;  %v6253_v53 = vld [vmem:[#allocation178_spill] sm:$0xff]  ;;  %s4993_s28 = sld [smem:[#allocation8 + $0x1d]] }
 0x201   : > { %v742_v14 = vadd.f32 %v6244_v34, %v736_v46  ;;  %v961_v60 = vadd.f32 %v6245_v26, %v955_v20  ;;  %v966_v10 = vadd.f32 %v6246_v38, %v960_v41  ;;  %v743_v1 = vadd.f32 %v6248_v63, %v737_v23  ;;  %v6252_v7 = vld [vmem:[#allocation193_spill] sm:$0xff]  ;;  %v6254_v28 = vld [vmem:[#allocation168_spill] sm:$0xff]  ;;  %v6255_v9 = vld [vmem:[#allocation154_spill] sm:$0xff]  ;;  %s4999_s24 = sld [smem:[#allocation8 + $0x21]] }
 0x202   : > { %v1183_v54 = vadd.f32 %v6247_v42, %v1177_v17  ;;  %v1184_v39 = vadd.f32 %v6249_v2, %v1178_v37  ;;  %v1395_v27 = vadd.f32 %v4540_v25, %v1389_v57  ;;  %v1400_v33 = vadd.f32 %v6250_v8, %v1394_v0  ;;  %v6256_v51 = vld [vmem:[#allocation166_spill] sm:$0xff]  ;;  %v6257_v57 = vld [vmem:[#allocation169_spill] sm:$0xff]  ;;  %s5005_s11 = sld [smem:[#allocation8 + $0x25]] }
 0x203   : > { %v748_v40 = vadd.f32 %v6251_v5, %v742_v14  ;;  %v967_v12 = vadd.f32 %v3979_v22, %v961_v60  ;;  %v972_v46 = vadd.f32 %v6252_v7, %v966_v10  ;;  %v749_v41 = vadd.f32 %v6254_v28, %v743_v1  ;;  %v6258_v14 = vld [vmem:[#allocation194_spill] sm:$0xff]  ;;  %v6260_v10 = vld [vmem:[#allocation183_spill] sm:$0xff]  ;;  %v6267_v28 = vld [vmem:[#allocation252_spill] sm:$0xff]  ;;  %s5009_s19 = sld [smem:[#allocation8 + $0x29]] }
 0x204   : > { %v1189_v20 = vadd.f32 %v6253_v53, %v1183_v54  ;;  %v1190_v17 = vadd.f32 %v3997_v43, %v1184_v39  ;;  %v1401_v23 = vadd.f32 %v6255_v9, %v1395_v27  ;;  %v1406_v37 = vadd.f32 %v6256_v51, %v1400_v33  ;;  %v6259_v60 = vld [vmem:[#allocation170_spill] sm:$0xff]  ;;  %v6261_v54 = vld [vmem:[#allocation179_spill] sm:$0xff]  ;;  %v6262_v27 = vld [vmem:[#allocation196_spill] sm:$0xff] }
 0x205   : > { %v754_v25 = vadd.f32 %v4661_v56, %v748_v40  ;;  %v973_v0 = vadd.f32 %v6257_v57, %v967_v12  ;;  %v978_v34 = vadd.f32 %v4670_v49, %v972_v46  ;;  %v755_v26 = vadd.f32 %v4547_v59, %v749_v41  ;;  %v6263_v40 = vld [vmem:[#allocation172_spill] sm:$0xff]  ;;  %v6264_v46 = vld [vmem:[#allocation213_spill] sm:$0xff]  ;;  %v6265_v53 = vld [vmem:[#allocation251_spill] sm:$0xff] }
 0x206   : > { %v1195_v22 = vadd.f32 %v6258_v14, %v1189_v20  ;;  %v1196_v38 = vadd.f32 %v6259_v60, %v1190_v17  ;;  %v1407_v42 = vadd.f32 %v6260_v10, %v1401_v23  ;;  %v1412_v43 = vadd.f32 %v6261_v54, %v1406_v37  ;;  %v6266_v20 = vld [vmem:[#allocation224_spill] sm:$0xff]  ;;  %v6269_v17 = vld [vmem:[#allocation225_spill] sm:$0xff]  ;;  %v6271_v23 = vld [vmem:[#allocation215_spill] sm:$0xff] }
 0x207   : > { %v760_v63 = vadd.f32 %v4550_v11, %v754_v25  ;;  %v979_v1 = vadd.f32 %v4582_v24, %v973_v0  ;;  %v984_v56 = vadd.f32 %v4589_v47, %v978_v34  ;;  %v761_v49 = vadd.f32 %v4553_v19, %v755_v26  ;;  %v6268_v41 = vld [vmem:[#allocation220_spill] sm:$0xff]  ;;  %v6270_v9 = vld [vmem:[#allocation221_spill] sm:$0xff]  ;;  %v6272_v51 = vld [vmem:[#allocation231_spill] sm:$0xff] }
 0x208   : > { %v1201_v2 = vadd.f32 %v4677_v18, %v1195_v22  ;;  %v1202_v39 = vadd.f32 %v4611_v31, %v1196_v38  ;;  %v1413_v59 = vadd.f32 %v4034_v62, %v1407_v42  ;;  %v1418_v8 = vadd.f32 %v6262_v27, %v1412_v43  ;;  %v6273_v25 = vld [vmem:[#allocation114_spill] sm:$0xff]  ;;  %v6275_v22 = vld [vmem:[#allocation228_spill] sm:$0xff]  ;;  %v6277_v60 = vld [vmem:[#allocation142_spill] sm:$0xff]  ;;  %6392 = sst [smem:[#allocation26_spill]] %s5005_s11 }
 0x209   : > { %v766_v33 = vadd.f32 %v4559_v55, %v760_v63  ;;  %v985_v5 = vadd.f32 %v4591_v35, %v979_v1  ;;  %v990_v11 = vadd.f32 %v4593_v61, %v984_v56  ;;  %v767_v47 = vadd.f32 %v4562_v48, %v761_v49  ;;  %v6274_v34 = vld [vmem:[#allocation255_spill] sm:$0xff]  ;;  %v6276_v26 = vld [vmem:[#allocation232_spill] sm:$0xff]  ;;  %v6278_v10 = vld [vmem:[#allocation222_spill] sm:$0xff]  ;;  %6395 = sst [smem:[#allocation27_spill]] %s5009_s19 }
 0x20a   : > { %v1207_v24 = vadd.f32 %v4613_v13, %v1201_v2  ;;  %v1208_v18 = vadd.f32 %v4615_v36, %v1202_v39  ;;  %v1419_v19 = vadd.f32 %v6263_v40, %v1413_v59  ;;  %v1424_v31 = vadd.f32 %v4684_v15, %v1418_v8  ;;  %v6279_v54 = vld [vmem:[#allocation258_spill] sm:$0xff]  ;;  %v6280_v63 = vld [vmem:[#allocation233_spill] sm:$0xff]  ;;  %v6281_v56 = vld [vmem:[#allocation256_spill] sm:$0xff]  ;;  %s5014_s11 = sld [smem:[#allocation8 + $0x2d]] }
 0x20b   : > { %v772_v62 = vadd.f32 %v4573_v50, %v766_v33  ;;  %v991_v12 = vadd.f32 %v4595_v45, %v985_v5  ;;  %v996_v55 = vadd.f32 %v4597_v52, %v990_v11  ;;  %v773_v61 = vadd.f32 %v4576_v4, %v767_v47  ;;  %v6282_v49 = vld [vmem:[#allocation218_spill] sm:$0xff]  ;;  %v6284_v27 = vld [vmem:[#allocation259_spill] sm:$0xff]  ;;  %v6286_v11 = vld [vmem:[#allocation229_spill] sm:$0xff]  ;;  %s5024_s19 = sld [smem:[#allocation8 + $0x31]] }
 0x20c   : > { %v1213_v35 = vadd.f32 %v4617_v29, %v1207_v24  ;;  %v1214_v13 = vadd.f32 %v4619_v16, %v1208_v18  ;;  %v1425_v48 = vadd.f32 %v4634_v32, %v1419_v19  ;;  %v1430_v36 = vadd.f32 %v4636_v6, %v1424_v31  ;;  %v6283_v39 = vld [vmem:[#allocation242_spill] sm:$0xff]  ;;  %v6285_v33 = vld [vmem:[#allocation243_spill] sm:$0xff]  ;;  %v6288_v47 = vld [vmem:[#allocation209_spill] sm:$0xff] }
 0x20d   : > { %v778_v7 = vadd.f32 %v4085_v30, %v772_v62  ;;  %v997_v15 = vadd.f32 %v4599_v21, %v991_v12  ;;  %v1002_v50 = vadd.f32 %v6264_v46, %v996_v55  ;;  %v779_v52 = vadd.f32 %v6266_v20, %v773_v61  ;;  %v6289_v40 = vld [vmem:[#allocation260_spill] sm:$0xff]  ;;  %v6290_v31 = vld [vmem:[#allocation109_spill] sm:$0xff]  ;;  %v6291_v12 = vld [vmem:[#allocation223_spill] sm:$0xff] }
 0x20e   : > { %v1219_v45 = vadd.f32 %v6265_v53, %v1213_v35  ;;  %v1220_v29 = vadd.f32 %v6267_v28, %v1214_v13  ;;  %v1431_v4 = vadd.f32 %v4638_v58, %v1425_v48  ;;  %v1436_v16 = vadd.f32 %v4640_v44, %v1430_v36  ;;  %v6292_v35 = vld [vmem:[#allocation159_spill] sm:$0xff]  ;;  %v6293_v13 = vld [vmem:[#allocation210_spill] sm:$0xff]  ;;  %v6294_v36 = vld [vmem:[#allocation160_spill] sm:$0xff] }
 0x20f   : > { %v784_v32 = vadd.f32 %v6268_v41, %v778_v7  ;;  %v1003_v6 = vadd.f32 %v6269_v17, %v997_v15  ;;  %v1008_v30 = vadd.f32 %v6270_v9, %v1002_v50  ;;  %v785_v37 = vadd.f32 %v6272_v51, %v779_v52  ;;  %v6295_v15 = vld [vmem:[#allocation244_spill] sm:$0xff]  ;;  %v6296_v50 = vld [vmem:[#allocation167_spill] sm:$0xff]  ;;  %v6298_v52 = vld [vmem:[#allocation234_spill] sm:$0xff] }
 0x210   : > { %v1225_v21 = vadd.f32 %v6271_v23, %v1219_v45  ;;  %v1226_v57 = vadd.f32 %v6273_v25, %v1220_v29  ;;  %v1437_v0 = vadd.f32 %v4642_v3, %v1431_v4  ;;  %v1442_v14 = vadd.f32 %v6274_v34, %v1436_v16  ;;  %v6297_v45 = vld [vmem:[#allocation211_spill] sm:$0xff]  ;;  %v6299_v29 = vld [vmem:[#allocation257_spill] sm:$0xff]  ;;  %v6301_v41 = vld [vmem:[#allocation184_spill] sm:$0xff]  ;;  %6400 = sst [smem:[#allocation29_spill]] %s5014_s11 }
 0x211   : > { %v790_v58 = vadd.f32 %v6275_v22, %v784_v32  ;;  %v1009_v44 = vadd.f32 %v6276_v26, %v1003_v6  ;;  %v1014_v38 = vadd.f32 %v6277_v60, %v1008_v30  ;;  %v791_v43 = vadd.f32 %v6279_v54, %v785_v37  ;;  %v6302_v17 = vld [vmem:[#allocation250_spill] sm:$0xff]  ;;  %v6304_v23 = vld [vmem:[#allocation161_spill] sm:$0xff]  ;;  %v6309_v26 = vld [vmem:[#allocation187_spill] sm:$0xff]  ;;  %s5030_s11 = sld [smem:[#allocation8 + $0x35]] }
 0x212   : > { %v1231_v42 = vadd.f32 %v6278_v10, %v1225_v21  ;;  %v1232_v1 = vadd.f32 %v6280_v63, %v1226_v57  ;;  %v1443_v2 = vadd.f32 %v6281_v56, %v1437_v0  ;;  %v1448_v3 = vadd.f32 %v6282_v49, %v1442_v14  ;;  %v6303_v9 = vld [vmem:[#allocation186_spill] sm:$0xff]  ;;  %v6305_v51 = vld [vmem:[#allocation185_spill] sm:$0xff]  ;;  %v6310_v60 = vld [vmem:[#allocation203_spill] sm:$0xff] }
 0x213   : > { %v796_v59 = vadd.f32 %v6283_v39, %v790_v58  ;;  %v1015_v8 = vadd.f32 %v6284_v27, %v1009_v44  ;;  %v1020_v5 = vadd.f32 %v6285_v33, %v1014_v38  ;;  %v797_v18 = vadd.f32 %v6288_v47, %v791_v43  ;;  %v6306_v25 = vld [vmem:[#allocation253_spill] sm:$0xff]  ;;  %v6307_v0 = vld [vmem:[#allocation230_spill] sm:$0xff]  ;;  %v6311_v10 = vld [vmem:[#allocation188_spill] sm:$0xff] }
 0x214   : > { %v1237_v24 = vadd.f32 %v6286_v11, %v1231_v42  ;;  %v1238_v19 = vadd.f32 %v6289_v40, %v1232_v1  ;;  %v1449_v62 = vadd.f32 %v6290_v31, %v1443_v2  ;;  %v1454_v55 = vadd.f32 %v6291_v12, %v1448_v3  ;;  %v6308_v22 = vld [vmem:[#allocation201_spill] sm:$0xff]  ;;  %v6312_v54 = vld [vmem:[#allocation202_spill] sm:$0xff]  ;;  %v6314_v56 = vld [vmem:[#allocation247_spill] sm:$0xff] }
 0x215   : > { %v802_v61 = vadd.f32 %v6292_v35, %v796_v59  ;;  %v1021_v48 = vadd.f32 %v6293_v13, %v1015_v8  ;;  %v1026_v7 = vadd.f32 %v6294_v36, %v1020_v5  ;;  %v803_v53 = vadd.f32 %v6296_v50, %v797_v18  ;;  %v6313_v63 = vld [vmem:[#allocation189_spill] sm:$0xff]  ;;  %v6315_v49 = vld [vmem:[#allocation212_spill] sm:$0xff]  ;;  %v6316_v39 = vld [vmem:[#allocation195_spill] sm:$0xff] }
 0x216   : > { %v1243_v46 = vadd.f32 %v6295_v15, %v1237_v24  ;;  %v1244_v20 = vadd.f32 %v6297_v45, %v1238_v19  ;;  %v1455_v28 = vadd.f32 %v6298_v52, %v1449_v62  ;;  %v6300_v4 = vstv %s6287_s16  ;;  %v6317_v27 = vld [vmem:[#allocation204_spill] sm:$0xff]  ;;  %v6318_v33 = vld [vmem:[#allocation197_spill] sm:$0xff]  ;;  %v6320_v47 = vld [vmem:[#allocation171_spill] sm:$0xff]  ;;  %s6399_s16 = sld [smem:[#allocation118_spill]] }
 0x217   : > { %v1459_v16 = vmul.f32 %v6300_v4, %v6299_v29  ;;  %v808_v32 = vadd.f32 %v6301_v41, %v802_v61  ;;  %v1027_v6 = vadd.f32 %v6302_v17, %v1021_v48  ;;  %v1032_v30 = vadd.f32 %v6303_v9, %v1026_v7  ;;  %v6319_v11 = vld [vmem:[#allocation205_spill] sm:$0xff]  ;;  %v6321_v40 = vld [vmem:[#allocation206_spill] sm:$0xff]  ;;  %v6324_v35 = vld [vmem:[#allocation95_spill] sm:$0xff] }
 0x218   : > { %v1249_v21 = vadd.f32 %v6304_v23, %v1243_v46  ;;  %v809_v37 = vadd.f32 %v6305_v51, %v803_v53  ;;  %v1250_v57 = vadd.f32 %v6306_v25, %v1244_v20  ;;  %v1460_v34 = vadd.f32 %v6307_v0, %v1454_v55  ;;  %v6322_v31 = vld [vmem:[#allocation162_spill] sm:$0xff]  ;;  %v6325_v13 = vld [vmem:[#allocation173_spill] sm:$0xff]  ;;  %v6331_v29 = vld [vmem:[#allocation191_spill] sm:$0xff] }
 0x219   : > { %v1461_v14 = vadd.f32 %v1459_v16, %v1455_v28  ;;  %v814_v58 = vadd.f32 %v6308_v22, %v808_v32  ;;  %v1033_v44 = vadd.f32 %v6309_v26, %v1027_v6  ;;  %v1038_v38 = vadd.f32 %v6310_v60, %v1032_v30  ;;  %v6323_v12 = vld [vmem:[#allocation254_spill] sm:$0xff]  ;;  %v6326_v36 = vld [vmem:[#allocation97_spill] sm:$0xff]  ;;  %v6332_v16 = vld [vmem:[#allocation115_spill] sm:$0xff] }
 0x21a   : > { %v1255_v42 = vadd.f32 %v6311_v10, %v1249_v21  ;;  %v815_v43 = vadd.f32 %v6312_v54, %v809_v37  ;;  %v1256_v1 = vadd.f32 %v6313_v63, %v1250_v57  ;;  %v1466_v2 = vadd.f32 %v6314_v56, %v1460_v34  ;;  %v6327_v15 = vld [vmem:[#allocation198_spill] sm:$0xff]  ;;  %v6333_v32 = vld [vmem:[#allocation96_spill] sm:$0xff]  ;;  %v6334_v6 = vld [vmem:[#allocation120_spill] sm:$0xff] }
 0x21b   : > { %v1467_v3 = vadd.f32 %v6315_v49, %v1461_v14  ;;  %v820_v59 = vadd.f32 %v6316_v39, %v814_v58  ;;  %v1039_v8 = vadd.f32 %v6317_v27, %v1033_v44  ;;  %v1044_v5 = vadd.f32 %v6318_v33, %v1038_v38  ;;  %v6328_v50 = vld [vmem:[#allocation94_spill] sm:$0xff]  ;;  %v6335_v30 = vld [vmem:[#allocation99_spill] sm:$0xff]  ;;  %v6336_v21 = vld [vmem:[#allocation116_spill] sm:$0xff] }
 0x21c   : > { %v1261_v24 = vadd.f32 %v6319_v11, %v1255_v42  ;;  %v821_v18 = vadd.f32 %v6320_v47, %v815_v43  ;;  %v1262_v19 = vadd.f32 %v6321_v40, %v1256_v1  ;;  %v1472_v62 = vadd.f32 %v6322_v31, %v1466_v2  ;;  %v6329_v45 = vld [vmem:[#allocation174_spill] sm:$0xff]  ;;  %v6338_v57 = vld [vmem:[#allocation207_spill] sm:$0xff]  ;;  %v6339_v34 = vld [vmem:[#allocation208_spill] sm:$0xff] }
 0x21d   : > { %v1473_v55 = vadd.f32 %v6323_v12, %v1467_v3  ;;  %v826_v61 = vadd.f32 %v6324_v35, %v820_v59  ;;  %v1045_v48 = vadd.f32 %v6325_v13, %v1039_v8  ;;  %v1050_v7 = vadd.f32 %v6326_v36, %v1044_v5  ;;  %v6330_v52 = vld [vmem:[#allocation190_spill] sm:$0xff]  ;;  %v6340_v22 = vld [vmem:[#allocation131_spill] sm:$0xff]  ;;  %v6344_v54 = vld [vmem:[#allocation132_spill] sm:$0xff] }
 0x21e   : > { %v1267_v46 = vadd.f32 %v6327_v15, %v1261_v24  ;;  %v827_v53 = vadd.f32 %v6328_v50, %v821_v18  ;;  %v1268_v20 = vadd.f32 %v6329_v45, %v1262_v19  ;;  %v1478_v28 = vadd.f32 %v6330_v52, %v1472_v62  ;;  %v6337_v37 = vld [vmem:[#allocation98_spill] sm:$0xff]  ;;  %v6341_v26 = vld [vmem:[#allocation121_spill] sm:$0xff]  ;;  %v6345_v63 = vld [vmem:[#allocation125_spill] sm:$0xff] }
 0x21f   : > { %v1479_v4 = vadd.f32 %v6331_v29, %v1473_v55  ;;  %v832_v41 = vadd.f32 %v6332_v16, %v826_v61  ;;  %v1051_v17 = vadd.f32 %v6333_v32, %v1045_v48  ;;  %v1056_v9 = vadd.f32 %v6334_v6, %v1050_v7  ;;  %v6342_v60 = vld [vmem:[#allocation136_spill] sm:$0xff]  ;;  %v6343_v10 = vld [vmem:[#allocation124_spill] sm:$0xff]  ;;  %v6346_v56 = vld [vmem:[#allocation199_spill] sm:$0xff] }
 0x220   : > { %v1273_v23 = vadd.f32 %v6335_v30, %v1267_v46  ;;  %v833_v51 = vadd.f32 %v6336_v21, %v827_v53  ;;  %v1274_v25 = vadd.f32 %v6337_v37, %v1268_v20  ;;  %v1484_v0 = vadd.f32 %v6338_v57, %v1478_v28  ;;  %v6347_v49 = vld [vmem:[#allocation175_spill] sm:$0xff]  ;;  %v6349_v27 = vld [vmem:[#allocation137_spill] sm:$0xff]  ;;  %v6350_v33 = vld [vmem:[#allocation140_spill] sm:$0xff] }
 0x221   : > { %v1485_v14 = vadd.f32 %v6339_v34, %v1479_v4  ;;  %v838_v58 = vadd.f32 %v6340_v22, %v832_v41  ;;  %v1057_v44 = vadd.f32 %v6341_v26, %v1051_v17  ;;  %v1062_v38 = vadd.f32 %v6342_v60, %v1056_v9  ;;  %v6348_v39 = vld [vmem:[#allocation135_spill] sm:$0xff]  ;;  %v6351_v11 = vld [vmem:[#allocation138_spill] sm:$0xff]  ;;  %v6353_v40 = vld [vmem:[#allocation141_spill] sm:$0xff] }
 0x222   : > { %v1279_v42 = vadd.f32 %v6343_v10, %v1273_v23  ;;  %v839_v43 = vadd.f32 %v6344_v54, %v833_v51  ;;  %v1280_v1 = vadd.f32 %v6345_v63, %v1274_v25  ;;  %v1490_v2 = vadd.f32 %v6346_v56, %v1484_v0  ;;  %v6352_v47 = vld [vmem:[#allocation103_spill] sm:$0xff]  ;;  %v6354_v31 = vld [vmem:[#allocation102_spill] sm:$0xff]  ;;  %v6355_v12 = vld [vmem:[#allocation101_spill] sm:$0xff] }
 0x223   : > { %v1491_v3 = vadd.f32 %v6347_v49, %v1485_v14  ;;  %v844_v59 = vadd.f32 %v6348_v39, %v838_v58  ;;  %v1063_v8 = vadd.f32 %v6349_v27, %v1057_v44  ;;  %v1068_v5 = vadd.f32 %v6350_v33, %v1062_v38  ;;  %v6356_v35 = vld [vmem:[#allocation226_spill] sm:$0xff]  ;;  %v6357_v13 = vld [vmem:[#allocation104_spill] sm:$0xff]  ;;  %v6359_v15 = vld [vmem:[#allocation147_spill] sm:$0xff] }
 0x224   : > { %v1285_v24 = vadd.f32 %v6351_v11, %v1279_v42  ;;  %v845_v18 = vadd.f32 %v6352_v47, %v839_v43  ;;  %v1286_v19 = vadd.f32 %v6353_v40, %v1280_v1  ;;  %v1496_v62 = vadd.f32 %v6354_v31, %v1490_v2  ;;  %v6358_v36 = vld [vmem:[#allocation130_spill] sm:$0xff]  ;;  %v6360_v50 = vld [vmem:[#allocation119_spill] sm:$0xff]  ;;  %v6361_v45 = vld [vmem:[#allocation107_spill] sm:$0xff] }
 0x225   : > { %v1497_v55 = vadd.f32 %v6355_v12, %v1491_v3  ;;  %v850_v61 = vadd.f32 %v6356_v35, %v844_v59  ;;  %v1069_v48 = vadd.f32 %v6357_v13, %v1063_v8  ;;  %v1074_v7 = vadd.f32 %v6358_v36, %v1068_v5  ;;  %v6362_v52 = vld [vmem:[#allocation127_spill] sm:$0xff]  ;;  %v6363_v29 = vld [vmem:[#allocation129_spill] sm:$0xff]  ;;  %v6364_v16 = vld [vmem:[#allocation90_spill] sm:$0xff] }
 0x226   : > { %v1291_v46 = vadd.f32 %v6359_v15, %v1285_v24  ;;  %v851_v53 = vadd.f32 %v6360_v50, %v845_v18  ;;  %v1292_v20 = vadd.f32 %v6361_v45, %v1286_v19  ;;  %v1502_v28 = vadd.f32 %v6362_v52, %v1496_v62  ;;  %v6365_v32 = vld [vmem:[#allocation133_spill] sm:$0xff]  ;;  %v6366_v6 = vld [vmem:[#allocation236_spill] sm:$0xff]  ;;  %v6367_v30 = vld [vmem:[#allocation123_spill] sm:$0xff] }
 0x227   : > { %v1503_v4 = vadd.f32 %v6363_v29, %v1497_v55  ;;  %v856_v41 = vadd.f32 %v6364_v16, %v850_v61  ;;  %v1075_v17 = vadd.f32 %v6365_v32, %v1069_v48  ;;  %v1080_v9 = vadd.f32 %v6366_v6, %v1074_v7  ;;  %v6368_v21 = vld [vmem:[#allocation78_spill] sm:$0xff]  ;;  %v6372_v25 = vld [vmem:[#allocation235_spill] sm:$0xff]  ;;  %v6375_v58 = vld [vmem:[#allocation145_spill] sm:$0xff] }
 0x228   : > { %v1297_v23 = vadd.f32 %v6367_v30, %v1291_v46  ;;  %v6369_v51 = vand.u32 1, %v6368_v21  ;;  %v857_v57 = vadd.f32 %v6372_v25, %v851_v53  ;;  %v6373_v0 = vld [vmem:[#allocation139_spill] sm:$0xff]  ;;  %v6376_v44 = vld [vmem:[#allocation93_spill] sm:$0xff]  ;;  %v6379_v43 = vld [vmem:[#allocation238_spill] sm:$0xff]  ;;  %v1579_v25 = vstv %s4842_s22  ;;  %s5053_s22 = sld [smem:[#allocation9 + $0x2]] }
 0x229   : > { %v1298_v34 = vadd.f32 %v6373_v0, %v1292_v20  ;;  %v6374_v14 = vld [vmem:[#allocation144_spill] sm:$0xff]  ;;  %v1509_v26 = vadd.f32 %v6375_v58, %v1503_v4  ;;  %v862_v60 = vadd.f32 %v6376_v44, %v856_v41  ;;  %v6377_v38 = vld [vmem:[#allocation237_spill] sm:$0xff]  ;;  %v6380_v1 = vld [vmem:[#allocation262_spill] sm:$0xff]  ;;  %v1586_v44 = vstv %s4854_s17  ;;  %s5065_s17 = sld [smem:[#allocation8 + $0x6]] }
 0x22a   : > { %vm4973_vm13 = vcmp.eq.s32.totalorder %v6369_v51, 0  ;;  %v1508_v22 = vadd.f32 %v6374_v14, %v1502_v28  ;;  %v1081_v10 = vadd.f32 %v6377_v38, %v1075_v17  ;;  %v6378_v42 = vld [vmem:[#allocation263_spill] sm:$0xff]  ;;  %v1303_v63 = vadd.f32 %v6379_v43, %v1297_v23  ;;  %v6382_v3 = vld [vmem:[#allocation149_spill] sm:$0xff]  ;;  %v6385_v5 = vld [vmem:[#allocation264_spill] sm:$0xff] }
 0x22b   : > { %v1086_v54 = vadd.f32 %v6378_v42, %v1080_v9  ;;  %v863_v56 = vadd.f32 %v6380_v1, %v857_v57  ;;  %v6381_v2 = vld [vmem:[#allocation239_spill] sm:$0xff]  ;;  %v6383_v59 = vld [vmem:[#allocation110_spill] sm:$0xff]  ;;  %v6386_v24 = vld [vmem:[#allocation248_spill] sm:$0xff]  ;;  %v6402_v17 = vstv %s4587_s1  ;;  %v1575_v51 = vstv %s4836_s18  ;;  %s5039_s1 = sld [smem:[#allocation8 + $0x39]] }
 0x22c   : > { %v1304_v49 = vadd.f32 %v6381_v2, %v1298_v34  ;;  %v1514_v39 = vadd.f32 %v6382_v3, %v1508_v22  ;;  %v1515_v27 = vadd.f32 %v6383_v59, %v1509_v26  ;;  %v6384_v8 = vld [vmem:[#allocation246_spill] sm:$0xff]  ;;  %v1087_v11 = vadd.f32 %v6385_v5, %v1081_v10  ;;  %v6387_v18 = vld [vmem:[#allocation265_spill] sm:$0xff]  ;;  %v6390_v55 = vld [vmem:[#allocation227_spill] sm:$0xff]  ;;  %s5046_s18 = sld [smem:[#allocation8 + $0x3d]] }
 0x22d   : > { %v868_v33 = vadd.f32 %v6384_v8, %v862_v60  ;;  %v1092_v47 = vadd.f32 %v6386_v24, %v1086_v54  ;;  %v1309_v40 = vadd.f32 %v6387_v18, %v1303_v63  ;;  %v6388_v19 = vld [vmem:[#allocation214_spill] sm:$0xff]  ;;  %v6391_v61 = vld [vmem:[#allocation128_spill] sm:$0xff]  ;;  %v6393_v36 = vld [vmem:[#allocation216_spill] sm:$0xff]  ;;  %v6404_v30 = vmov %v6402_v17 }
 0x22e   : > { %v869_v31 = vadd.f32 %v6388_v19, %v863_v56  ;;  %v6389_v62 = vld [vmem:[#allocation266_spill] sm:$0xff]  ;;  %v1520_v35 = vadd.f32 %v6390_v55, %v1514_v39  ;;  %v1521_v13 = vadd.f32 %v6391_v61, %v1515_v27  ;;  %v1093_v7 = vadd.f32 %v6393_v36, %v1087_v11  ;;  %v6394_v46 = vld [vmem:[#allocation249_spill] sm:$0xff]  ;;  %v6397_v52 = vld [vmem:[#allocation240_spill] sm:$0xff] }
 0x22f   : > { %v1310_v12 = vadd.f32 %v6389_v62, %v1304_v49  ;;  %v870_v48 = vmax.f32 %v868_v33, 0.0  ;;  %v1094_v15 = vmax.f32 %v1092_v47, 0.0  ;;  %v1315_v50 = vadd.f32 %v6394_v46, %v1309_v40  ;;  %v6396_v45 = vld [vmem:[#allocation217_spill] sm:$0xff]  ;;  %v6403_v9 = vld [vmem:[#allocation92_spill] sm:$0xff]  ;;  %v6407_v54 = vld [vmem:[#allocation219_spill] sm:$0xff] }
 0x230   : > { %v871_v53 = vmax.f32 %v869_v31, 0.0  ;;  %v1526_v28 = vadd.f32 %v6397_v52, %v1520_v35  ;;  %v6398_v29 = vld [vmem:[#allocation241_spill] sm:$0xff]  ;;  %v1095_v16 = vmax.f32 %v1093_v7, 0.0  ;;  %v1531_v23 = vmul.f32 %v6404_v30, %v6403_v9 }
 0x231   : > { %v1316_v20 = vadd.f32 %v6396_v45, %v1310_v12  ;;  %v1527_v4 = vadd.f32 %v6398_v29, %v1521_v13  ;;  %873 = vst.msk [vmem:[#allocation2] sm:$0xff] %vm872_vm12, %v870_v48  ;;  %1096 = vst.msk [vmem:[#allocation2 + $0x10] sm:$0xff] %vm872_vm12, %v1094_v15  ;;  %v1317_v41 = vmax.f32 %v1315_v50, 0.0  ;;  %v6401_v32 = vld [vmem:[#allocation261_spill] sm:$0xff]  ;;  %v1580_v57 = vstv %s4848_s8  ;;  %s5059_s8 = sld [smem:[#allocation8 + $0x2]] }
 0x232   : > { %v1530_v6 = vmul.f32 %v6402_v17, %v6401_v32  ;;  %874 = vst.msk [vmem:[#allocation2 + $0x8] sm:$0xff] %vm872_vm12, %v871_v53  ;;  %v6405_v0 = vld [vmem:[#allocation245_spill] sm:$0xff]  ;;  %v6406_v34 = vstv %s6399_s16  ;;  %1097 = vst.msk [vmem:[#allocation2 + $0x18] sm:$0xff] %vm872_vm12, %v1095_v16  ;;  %v1576_v26 = vsel %vm4973_vm13, %v1575_v51, 0.0  ;;  %v1587_v60 = vstv %s4860_s23  ;;  %s5071_s23 = sld [smem:[#allocation8 + $0xa]] }
 0x233   : > { %v1318_v21 = vmax.f32 %v1316_v20, 0.0  ;;  %v1536_v14 = vmul.f32 %v6406_v34, %v6405_v0  ;;  %1319 = vst.msk [vmem:[#allocation2 + $0x20] sm:$0xff] %vm872_vm12, %v1317_v41  ;;  %v1533_v58 = vadd.f32 %v1531_v23, %v1527_v4  ;;  %v1593_v38 = vstv %s4868_s4  ;;  %s5085_s4 = sld [smem:[#allocation8 + $0xe]] }
 0x234   : > { %v1532_v22 = vadd.f32 %v1530_v6, %v1526_v28  ;;  %v1594_v10 = vstv %s4874_s12  ;;  %v1581_v63 = vsel %vm4973_vm13, %v1579_v25, %v1580_v57  ;;  %v1588_v1 = vsel %vm4973_vm13, %v1586_v44, %v1587_v60  ;;  %s5096_s12 = sld [smem:[#allocation8 + $0x12]] }
 0x235   : > { %1320 = vst.msk [vmem:[#allocation2 + $0x28] sm:$0xff] %vm872_vm12, %v1318_v21  ;;  %v1539_v43 = vadd.f32 %v6407_v54, %v1533_v58  ;;  %v1600_v56 = vstv %s4879_s0  ;;  %v1601_v2 = vstv %s4885_s27  ;;  %v1607_v49 = vstv %s4891_s26  ;;  %s5105_s0 = sld [smem:[#allocation8 + $0x16]] }
 0x236   : > { %v1538_v42 = vadd.f32 %v1536_v14, %v1532_v22  ;;  %v1608_v3 = vstv %s4897_s30  ;;  %v1595_v27 = vsel %vm4973_vm13, %v1593_v38, %v1594_v10  ;;  %v1602_v8 = vsel %vm4973_vm13, %v1600_v56, %v1601_v2  ;;  %s5113_s27 = sld [smem:[#allocation8 + $0x1a]] }
 0x237   : > { %v1541_v59 = vmax.f32 %v1539_v43, 0.0  ;;  %v1614_v33 = vstv %s4903_s14  ;;  %v1615_v5 = vstv %s4909_s15  ;;  %v1621_v11 = vstv %s4915_s3  ;;  %s5120_s26 = sld [smem:[#allocation8 + $0x1e]] }
 0x238   : > { %v1540_v39 = vmax.f32 %v1538_v42, 0.0  ;;  %v1622_v24 = vstv %s4921_s7  ;;  %v1609_v40 = vsel %vm4973_vm13, %v1607_v49, %v1608_v3  ;;  %v1616_v19 = vsel %vm4973_vm13, %v1614_v33, %v1615_v5  ;;  %s5126_s30 = sld [smem:[#allocation8 + $0x22]] }
 0x239   : > { %1543 = vst.msk [vmem:[#allocation2 + $0x38] sm:$0xff] %vm872_vm12, %v1541_v59  ;;  %v5075_v47 = vld [vmem:[#allocation2] ss:$2 sm:$0xff]  ;;  %v5077_v18 = vld [vmem:[#allocation2 + $0x1] ss:$2 sm:$0xff]  ;;  %v1628_v31 = vstv %s4927_s13  ;;  %v1629_v62 = vstv %s4933_s25  ;;  %v1623_v13 = vsel %vm4973_vm13, %v1621_v11, %v1622_v24  ;;  %v1634_v48 = vstv %s4939_s10  ;;  %s6408_s14 = sld [smem:[#allocation26_spill]] }
 0x23a   : > { %1542 = vst.msk [vmem:[#allocation2 + $0x30] sm:$0xff] %vm872_vm12, %v1540_v39  ;;  %v5087_v12 = vld [vmem:[#allocation2 + $0x10] ss:$2 sm:$0xff]  ;;  %v5089_v55 = vld [vmem:[#allocation2 + $0x11] ss:$2 sm:$0xff]  ;;  %v1582_v35 = vmul.f32 %v1581_v63, %v5075_v47  ;;  %v1589_v61 = vmul.f32 %v1588_v1, %v5077_v18  ;;  %v1630_v46 = vsel %vm4973_vm13, %v1628_v31, %v1629_v62  ;;  %v1638_v50 = vstv %s4945_s20  ;;  %s5133_s15 = sld [smem:[#allocation8 + $0x26]] }
 0x23b   : > { %v1596_v7 = vmul.f32 %v1595_v27, %v5087_v12  ;;  %v1603_v15 = vmul.f32 %v1602_v8, %v5089_v55  ;;  %v1635_v52 = vsel %vm4973_vm13, %v1634_v48, 0.0  ;;  %v1639_v28 = vstv %s4951_s5  ;;  %s6409_s3 = sld [smem:[#allocation27_spill]] }
 0x23c   : > { %v5098_v36 = vld [vmem:[#allocation2 + $0x20] ss:$2 sm:$0xff]  ;;  %v5107_v53 = vld [vmem:[#allocation2 + $0x21] ss:$2 sm:$0xff]  ;;  %v1583_v45 = vadd.f32 %v1582_v35, %v1576_v26  ;;  %v1640_v29 = vsel %vm4973_vm13, %v1638_v50, %v1639_v28  ;;  %v1645_v4 = vstv %s4957_s29  ;;  %v1646_v16 = vstv %s4963_s6  ;;  %s6410_s7 = sld [smem:[#allocation29_spill]] }
 0x23d   : > { %v1610_v20 = vmul.f32 %v1609_v40, %v5098_v36  ;;  %v1652_v41 = vstv %s4969_s9  ;;  %v1641_v17 = vmul.f32 %v1640_v29, %v5075_v47  ;;  %v1647_v6 = vsel %vm4973_vm13, %v1645_v4, %v1646_v16  ;;  %s5141_s13 = sld [smem:[#allocation8 + $0x2a]] }
 0x23e   : > { %v1590_v32 = vadd.f32 %v1589_v61, %v1583_v45  ;;  %v1653_v9 = vstv %s4981_s21  ;;  %v1617_v30 = vmul.f32 %v1616_v19, %v5107_v53  ;;  %v1659_v21 = vstv %s4987_s2  ;;  %s5148_s25 = sld [smem:[#allocation8 + $0x2e]] }
 0x23f   : > { %v1654_v23 = vsel %vm4973_vm13, %v1652_v41, %v1653_v9  ;;  %v1660_v51 = vstv %s4993_s28  ;;  %v1642_v34 = vadd.f32 %v1641_v17, %v1635_v52  ;;  %v1648_v14 = vmul.f32 %v1647_v6, %v5077_v18  ;;  %s5152_s10 = sld [smem:[#allocation8 + $0x32]] }
 0x240   : > { %v1597_v0 = vadd.f32 %v1596_v7, %v1590_v32  ;;  %v1655_v22 = vmul.f32 %v1654_v23, %v5087_v12  ;;  %v1661_v44 = vsel %vm4973_vm13, %v1659_v21, %v1660_v51  ;;  %v1666_v60 = vstv %s4999_s24  ;;  %s5159_s20 = sld [smem:[#allocation8 + $0x36]] }
 0x241   : > { %v5135_v25 = vld [vmem:[#allocation2 + $0x30] ss:$2 sm:$0xff]  ;;  %v5137_v57 = vld [vmem:[#allocation2 + $0x31] ss:$2 sm:$0xff]  ;;  %v1649_v10 = vadd.f32 %v1648_v14, %v1642_v34  ;;  %v1667_v42 = vstv %s6408_s14  ;;  %v1673_v54 = vstv %s6409_s3  ;;  %v1680_v1 = vstv %s5024_s19  ;;  %s5164_s5 = sld [smem:[#allocation8 + $0x3a]] }
 0x242   : > { %v1624_v58 = vmul.f32 %v1623_v13, %v5135_v25  ;;  %v1631_v26 = vmul.f32 %v1630_v46, %v5137_v57  ;;  %v1604_v38 = vadd.f32 %v1603_v15, %v1597_v0  ;;  %v1668_v43 = vsel %vm4973_vm13, %v1666_v60, %v1667_v42  ;;  %s5171_s29 = sld [smem:[#allocation8 + $0x3e]] }
 0x243   : > { %v1674_v63 = vstv %s6410_s7  ;;  %v1681_v56 = vstv %s5030_s11  ;;  %v1656_v49 = vadd.f32 %v1655_v22, %v1649_v10  ;;  %v1662_v3 = vmul.f32 %v1661_v44, %v5089_v55  ;;  %s5175_s6 = sld [smem:[#allocation9 + $0x3]] }
 0x244   : > { %v1611_v2 = vadd.f32 %v1610_v20, %v1604_v38  ;;  %v1675_v39 = vsel %vm4973_vm13, %v1673_v54, %v1674_v63  ;;  %v1669_v59 = vmul.f32 %v1668_v43, %v5098_v36  ;;  %v1682_v27 = vsel %vm4973_vm13, %v1680_v1, %v1681_v56  ;;  %s5182_s9 = sld [smem:[#allocation8 + $0x3]] }
 0x245   : > { %v1687_v8 = vstv %s5039_s1  ;;  %v1688_v33 = vstv %s5046_s18  ;;  %v1663_v11 = vadd.f32 %v1662_v3, %v1656_v49  ;;  %v1676_v24 = vmul.f32 %v1675_v39, %v5107_v53  ;;  %s5188_s21 = sld [smem:[#allocation8 + $0x7]] }
 0x246   : > { %v1618_v5 = vadd.f32 %v1617_v30, %v1611_v2  ;;  %v1683_v40 = vmul.f32 %v1682_v27, %v5135_v25  ;;  %v1689_v19 = vsel %vm4973_vm13, %v1687_v8, %v1688_v33  ;;  %v1693_v31 = vstv %s5053_s22  ;;  %s5194_s2 = sld [smem:[#allocation8 + $0xb]] }
 0x247   : > { %v1697_v62 = vstv %s5059_s8  ;;  %v1698_v35 = vstv %s5065_s17  ;;  %v1670_v13 = vadd.f32 %v1669_v59, %v1663_v11  ;;  %v1694_v48 = vsel %vm4973_vm13, %v1693_v31, 0.0  ;;  %s5200_s28 = sld [smem:[#allocation8 + $0xf]] }
 0x248   : > { %v1625_v61 = vadd.f32 %v1624_v58, %v1618_v5  ;;  %v1699_v7 = vsel %vm4973_vm13, %v1697_v62, %v1698_v35  ;;  %v1704_v46 = vstv %s5071_s23  ;;  %v1705_v50 = vstv %s5085_s4  ;;  %s5206_s24 = sld [smem:[#allocation8 + $0x13]] }
 0x249   : > { %v1700_v15 = vmul.f32 %v1699_v7, %v5075_v47  ;;  %v1711_v45 = vstv %s5096_s12  ;;  %v1677_v20 = vadd.f32 %v1676_v24, %v1670_v13  ;;  %v1690_v52 = vmul.f32 %v1689_v19, %v5137_v57  ;;  %s5210_s11 = sld [smem:[#allocation8 + $0x17]] }
 0x24a   : > { %v1706_v28 = vsel %vm4973_vm13, %v1704_v46, %v1705_v50  ;;  %v1712_v29 = vstv %s5105_s0  ;;  %v1718_v32 = vstv %s5113_s27  ;;  %v1632_v17 = vadd.f32 %v1631_v26, %v1625_v61  ;;  %s5214_s19 = sld [smem:[#allocation8 + $0x1b]] }
 0x24b   : > { %v1701_v4 = vadd.f32 %v1700_v15, %v1694_v48  ;;  %v1707_v16 = vmul.f32 %v1706_v28, %v5077_v18  ;;  %v1713_v41 = vsel %vm4973_vm13, %v1711_v45, %v1712_v29  ;;  %v1684_v6 = vadd.f32 %v1683_v40, %v1677_v20  ;;  %s5220_s16 = sld [smem:[#allocation8 + $0x1f]] }
 0x24c   : > { %v1719_v9 = vstv %s5120_s26  ;;  %v1725_v30 = vstv %s5126_s30  ;;  %v1714_v21 = vmul.f32 %v1713_v41, %v5087_v12  ;;  %v1726_v51 = vstv %s5133_s15  ;;  %s5224_s1 = sld [smem:[#allocation8 + $0x23]] }
 0x24d   : > { %v1708_v23 = vadd.f32 %v1707_v16, %v1701_v4  ;;  %v5216_v0 = vadd.f32 %v1690_v52, %v1684_v6  ;;  %v1720_v34 = vsel %vm4973_vm13, %v1718_v32, %v1719_v9  ;;  %v1727_v22 = vsel %vm4973_vm13, %v1725_v30, %v1726_v51  ;;  %s5229_s18 = sld [smem:[#allocation8 + $0x27]] }
 0x24e   : > { %v1732_v26 = vstv %s5141_s13  ;;  %v1733_v44 = vstv %s5148_s25  ;;  %v1721_v60 = vmul.f32 %v1720_v34, %v5089_v55  ;;  %s5232_s22 = sld [smem:[#allocation8 + $0x2b]]  ;;  %v1728_v42 = vmul.f32 %v1727_v22, %v5098_v36 }
 0x24f   : > { %v1715_v14 = vadd.f32 %v1714_v21, %v1708_v23  ;;  %v1812_v58 = vpack.c.bf16 %v5216_v0, %v1632_v17  ;;  %v1752_v54 = vstv %s5175_s6  ;;  %s5236_s8 = sld [smem:[#allocation8 + $0x2f]]  ;;  %v1734_v63 = vsel %vm4973_vm13, %v1732_v26, %v1733_v44  ;;  %s2648_s6 = smov [#allocation11]  }
 0x250   : > { %v1739_v1 = vstv %s5152_s10  ;;  %v1756_v56 = vstv %s5182_s9  ;;  %s5242_s17 = sld [smem:[#allocation8 + $0x33]]  ;;  %v1757_v49 = vstv %s5188_s21  ;;  %v1763_v3 = vstv %s5194_s2  ;;  %s2572_s9 = sshll.u32 %s2648_s6, 4  ;;  %s2573_s9 = int_to_ptr.vmem [resolvable:$false] %s2572_s9 }
 0x251   : > { %v1814_v38 = vunpack.c.l.bf16 %v1812_v58  ;;  %v1815_v10 = vunpack.c.h.bf16 %v1812_v58  ;;  %v1722_v43 = vadd.f32 %v1721_v60, %v1715_v14  ;;  %v1764_v39 = vstv %s5200_s28  ;;  %s5248_s23 = sld [smem:[#allocation8 + $0x37]]  ;;  %s2574_s21 = scalar_lea.vmem %s2573_s9, 1024 }
 0x252   : > { %v1753_v59 = vsel %vm4973_vm13, %v1752_v54, 0.0  ;;  %v1758_v27 = vsel %vm4973_vm13, %v1756_v56, %v1757_v49  ;;  %v1765_v8 = vsel %vm4973_vm13, %v1763_v3, %v1764_v39  ;;  %v1770_v33 = vstv %s5206_s24  ;;  %s5258_s4 = sld [smem:[#allocation8 + $0x3b]] }
 0x253   : > { %2410 = vmatprep.mubr.msk.f32.mxu1 %vm872_vm12, %v1814_v38  ;;  %v1818_v2 = vsub.f32 %v1632_v17, %v1814_v38  ;;  %v1740_v5 = vstv %s5159_s20  ;;  %v1759_v11 = vmul.f32 %v1758_v27, %v5075_v47  ;;  %v1771_v24 = vstv %s5210_s11  ;;  %s5265_s12 = sld [smem:[#allocation8 + $0x3f]] }
 0x254   : > { %2411 = vmatmul.mubr.msk.f32.vlgmr.msra.gmra.mxu1 %vm872_vm12, %v1815_v10  ;;  %v1777_v40 = vstv %s5214_s19  ;;  %v1729_v19 = vadd.f32 %v1728_v42, %v1722_v43  ;;  %v1772_v31 = vsel %vm4973_vm13, %v1770_v33, %v1771_v24  ;;  %v1778_v62 = vstv %s5220_s16  ;;  %s6411_s0 = sld [smem:[#allocation17_spill]] }
 0x255   : > { %2400 = vmatprep.mubr.msk.f32.mxu0 %vm872_vm12, %v1818_v2  ;;  %v1760_v35 = vadd.f32 %v1759_v11, %v1753_v59  ;;  %v1766_v61 = vmul.f32 %v1765_v8, %v5077_v18  ;;  %v1784_v13 = vstv %s5224_s1  ;;  %v1785_v47 = vstv %s5229_s18  ;;  %s6412_s30 = sld [smem:[#allocation20_spill]] }
 0x256   : > { %v1735_v48 = vmul.f32 %v1734_v63, %v5107_v53  ;;  %v1741_v7 = vsel %vm4973_vm13, %v1739_v1, %v1740_v5  ;;  %v1779_v15 = vsel %vm4973_vm13, %v1777_v40, %v1778_v62  ;;  %v1773_v50 = vmul.f32 %v1772_v31, %v5087_v12  ;;  %s6413_s15 = sld [smem:[#allocation23_spill]] }
 0x257   : > { %v1767_v46 = vadd.f32 %v1766_v61, %v1760_v35  ;;  %v1791_v45 = vstv %s5232_s22  ;;  %v1792_v20 = vstv %s5236_s8  ;;  %v1746_v52 = vstv %s5164_s5  ;;  %s6414_s10 = sld [smem:[#allocation273_spill]] }
 0x258   : > { %v1736_v18 = vadd.f32 %v1735_v48, %v1729_v19  ;;  %v1747_v28 = vstv %s5171_s29  ;;  %v1786_v29 = vsel %vm4973_vm13, %v1784_v13, %v1785_v47  ;;  %v1780_v16 = vmul.f32 %v1779_v15, %v5089_v55 }
 0x259   : > { %v1774_v4 = vadd.f32 %v1773_v50, %v1767_v46  ;;  %v1798_v41 = vstv %s5242_s17  ;;  %v1799_v32 = vstv %s5248_s23  ;;  %v1742_v17 = vmul.f32 %v1741_v7, %v5135_v25 }
 0x25a   : > { %v1793_v12 = vsel %vm4973_vm13, %v1791_v45, %v1792_v20  ;;  %v1819_v6 = vsub.f32 %v5216_v0, %v1815_v10  ;;  %v1787_v30 = vmul.f32 %v1786_v29, %v5098_v36  ;;  %v1805_v23 = vstv %s5258_s4  ;;  %s294_s27 = sand.u32 1, %s6411_s0  }
 0x25b   : > { %v1781_v9 = vadd.f32 %v1780_v16, %v1774_v4  ;;  %v1806_v21 = vstv %s5265_s12  ;;  %v1748_v51 = vsel %vm4973_vm13, %v1746_v52, %v1747_v28  ;;  %v1800_v55 = vsel %vm4973_vm13, %v1798_v41, %v1799_v32  ;;  %s2154_s26 = sshll.u32 %s294_s27, 5  ;;  %s2383_s7 = sshll.u32 %s6412_s30, 9 }
 0x25c   : > { %2401 = vmatmul.mubr.msk.f32.vlgmr.msra.gmra.mxu0 %vm872_vm12, %v1819_v6  ;;  %v1743_v34 = vadd.f32 %v1742_v17, %v1736_v18  ;;  %v1794_v22 = vmul.f32 %v1793_v12, %v5107_v53  ;;  %v1807_v0 = vsel %vm4973_vm13, %v1805_v23, %v1806_v21  ;;  %v1749_v58 = vmul.f32 %v1748_v51, %v5137_v57  ;;  %s296_s14 = scalar_lea.vmem [#allocation11], %s2154_s26  ;;  %s5323_s5 = scalar_lea.sflag [#allocation4], %s294_s27 }
 0x25d   : > { %v1788_v14 = vadd.f32 %v1787_v30, %v1781_v9  ;;  %v1801_v26 = vmul.f32 %v1800_v55, %v5135_v25  ;;  %v1808_v38 = vmul.f32 %v1807_v0, %v5137_v57  ;;  %s2039_s3 = sshll.u32 %s296_s14, 4  ;;  %s5320_s20 = scalar_lea.hbm %s6414_s10, %s2383_s7  ;;  %s5314_s3 = int_to_ptr.vmem [resolvable:$true] %s2039_s3 }
 0x25e   : > { %v1750_v44 = vadd.f32 %v1749_v58, %v1743_v34  ;;  %s2568_s29 = scalar_lea.vmem %s5314_s3, 512  ;;  %p6415_p11 = scmp.ne.s32.totalorder %s6413_s15, 0 }
 0x25f   : > { %v1795_v36 = vadd.f32 %v1794_v22, %v1788_v14  ;;  %p2569_p8 = scmp.ne.s32.totalorder %s5314_s3, %s2568_s29  ;;  %p2575_p2 = scmp.lt.s32.totalorder %s5314_s3, %s2573_s9 }
 0x260   : > { %p2576_p3 = scmp.lt.s32.totalorder %s2574_s21, %s2568_s29 }
 0x261   : > { %v1802_v60 = vadd.f32 %v1801_v26, %v1795_v36  ;;  %p2570_p13 = pnand %p2569_p8, %p6415_p11 }
 0x262   : > { %p2577_p4 = por %p2576_p3, %p2575_p2 }
 0x263   : > { %v1809_v10 = vadd.f32 %v1808_v38, %v1802_v60  ;;  %p2571_p1 = pneg %p2570_p13 }
 0x265   : > { %v1813_v42 = vpack.c.bf16 %v1809_v10, %v1750_v44  ;;  %p2578_p9 = pnand %p2577_p4, %p2571_p1 }
 0x267   : > { %v1816_v54 = vunpack.c.l.bf16 %v1813_v42  ;;  %v1817_v43 = vunpack.c.h.bf16 %v1813_v42 }
 0x269   : > { %2413 = vmatprep.mubr.msk.f32.mxu1 %vm872_vm12, %v1816_v54  ;;  %v1820_v53 = vsub.f32 %v1750_v44, %v1816_v54  ;;  %v1821_v37 = vsub.f32 %v1809_v10, %v1817_v43 }
 0x26a   : > { %2414 = vmatmul.mubr.msk.f32.gmra.mxu1 %vm872_vm12, %v1817_v43 }
 0x26b   : > { %2403 = vmatprep.mubr.msk.f32.mxu0 %vm872_vm12, %v1820_v53 }
 0x26c   : > { %2404 = vmatmul.mubr.msk.f32.gmra.mxu0 %vm872_vm12, %v1821_v37 }
 0x314   : > { %v2412_v25 = vpop.f32.mrf.mxu1 }
 0x316   : > { %v1997_v57 = vpop.f32.mrf.mxu1 }
 0x31c   : > { %v2402_v63 = vpop.f32.mrf.mxu0 }
 0x31d   : > { %v2003_v1 = vadd.f32 %v2412_v25, %v2402_v63 }
 0x31e   : > { %v1900_v56 = vpop.f32.mrf.mxu0 }
 0x31f   : > { %v2017_v2 = vmax.f32 %v2003_v1, 0.0  ;;  %v1998_v49 = vadd.f32 %v1997_v57, %v1900_v56 }
 0x321   : > { %2022 = vst.msk [vmem:[%s296_s14 + $0x8] sm:$0xff] %vm2020_vm14, %v2017_v2  ;;  %v2016_v3 = vmax.f32 %v1998_v49, 0.0 }
 0x323   : > { %2021 = vst.msk [vmem:[%s296_s14] sm:$0xff] %vm2020_vm14, %v2016_v3 }
 0x32a   : > { %v2415_v39 = vpop.f32.mrf.mxu1 }
 0x32c   : > { %v2405_v59 = vpop.f32.mrf.mxu0  ;;  %v2007_v8 = vpop.f32.mrf.mxu1 }
 0x32d   : > { %v2013_v27 = vadd.f32 %v2415_v39, %v2405_v59 }
 0x32e   : > { %v1910_v33 = vpop.f32.mrf.mxu0 }
 0x32f   : > { %v2019_v5 = vmax.f32 %v2013_v27, 0.0  ;;  %v2008_v11 = vadd.f32 %v2007_v8, %v1910_v33 }
 0x331   : > { %2024 = vst.msk [vmem:[%s296_s14 + $0x18] sm:$0xff] %vm2020_vm14, %v2019_v5  ;;  %v2018_v24 = vmax.f32 %v2008_v11, 0.0 }
 0x333   : > { %2023 = vst.msk [vmem:[%s296_s14 + $0x10] sm:$0xff] %vm2020_vm14, %v2018_v24 }
 0x334   : > { %2581 = shalt.err (!%p2578_p9)
}
 0x335   : > { %s2582_s2 = scalar_lea.hbm %s5320_s20, 512  ;;  %s2586_s11 = scalar_lea.hbm %s6414_s10, 1024 }
 0x336   : > { %p2583_p7 = scmp.ne.s32.totalorder %s5320_s20, %s2582_s2  ;;  %p2587_p6 = scmp.lt.s32.totalorder %s5320_s20, %s6414_s10 }
 0x337   : > { %p2588_p12 = scmp.lt.s32.totalorder %s2586_s11, %s2582_s2 }
 0x338   : > { %p2584_p0 = pnand %p2583_p7, %p6415_p11 }
 0x339   : > { %p2589_p10 = por %p2588_p12, %p2587_p6 }
 0x33a   : > { %p2585_p5 = pneg %p2584_p0 }
 0x33c   : > { %p2590_p8 = pnand %p2589_p10, %p2585_p5 }
 0x33e   : > { %2593 = shalt.err (!%p2590_p8)
}
 0x33f   : > { %s2649_s1 = smov 128   ;;  %s2650_s18 = smov 8  }
 0x340   : > { %2432 = dma.vmem_to_hbm [thread:$0]  (%p6415_p11), %s5314_s3, 512, %s5320_s20, %s5323_s5, %s2649_s1, %s2649_s1, %s2650_s18  }
 0x341 PF: > { %s6416_s22 = sld [smem:[#allocation19_spill]] }
 0x342   : > { %s6417_s8 = sld [smem:[#allocation16_spill]] }
 0x343   : > { %s6418_s17 = sld [smem:[#allocation24_spill]] }
 0x347   : > { %p2459_p13 = scmp.ge.s32.totalorder %s6416_s22, 2 }
 0x348   : > { %s2054_s23 = sand.u32 1, %s6417_s8  }
 0x349   : > { %p6419_p1 = scmp.ne.s32.totalorder %s6418_s17, 0  ;;  %s2055_s4 = scalar_lea.sflag [#allocation4], %s2054_s23 }
 0x34b   : > { %p2448_p2 = pnand %p2459_p13, %p6419_p1 }
 0x34d   : > { %p2449_p3 = pneg %p2448_p2 }
 0x34f   : > { %2623 = dma.done.wait (%p2449_p3), %s2055_s4, 512  }
 0x350   : > { %2625 = vsyncadd (%p2449_p3), %s2055_s4, 4294966784  ;;  %s6420_s24 = sld [smem:[#allocation21_spill]] }
 0x351   : > { %s6421_s21 = sld [smem:[#allocation17_spill]] }
 0x352   : > { %s6422_s22 = sld [smem:[#allocation18_spill]] }
 0x353   : > { %s6423_s23 = sld [smem:[#allocation22_spill]] }
 0x356   : > { %p19_p4 = scmp.ge.s32.totalorder %s6420_s24, 4  }
 0x358   :  { %21 = sbr.rel (!%p19_p4) target bundleno = 14 (0xe), region = 103 }
 0x35d   :  { %2060 = vsyncpa [#allocation4], 1 }
 0x35e   :  { %2062 = vsyncpa [#allocation4 + $0x1], 1 }
 0x35f   :  { %2063 = vsyncpa [#allocation5], 1 }
 0x360   :  { %2065 = vsyncpa [#allocation5 + $0x1], 1 }
 0x361   :  { %2066 = vsyncpa [#allocation7], 1 }
 0x362   :  { %2067 = vsyncpa [#allocation10], 1 }

</bundles_post_ra>
